<compile_context>
chip_gen: v7x
topology: tpu7x:2x2x1
jax: 0.10.0
libtpu: 0.0.40
codegen_flags: <defaults>
</compile_context>

<pallas_src>
import functools

import jax
import jax.numpy as jnp
import numpy as np
from jax.experimental import pallas as pl
from jax.experimental.pallas import tpu as pltpu

# Hyper-parameters from the PyTorch module.
HM_VECTOR_SIZE = 40      # LSTM hidden size per direction
NUM_KERNEL = 20          # conv output channels
SEQ_LEN = 12             # attention sequence_length (== pooled width)
CONV_K = 7               # conv kernel (7, 7)
ATT_HIDDEN = 16
BN_EPS = 1e-5

# Combined-gate lane layout: one 128-lane vreg per gate pair so every in-kernel
# gate slice starts at a multiple of 128 (no cross-lane data movement on the
# serial recurrence path).  Gate order: i | f | o | g ; within each gate:
# forward direction at lane offset 0, backward direction at lane offset 40.
GATE_STRIDE = 128
GATES_W = 4 * GATE_STRIDE   # 512


# ----------------------------------------------------------------------------
# Pallas kernel
# ----------------------------------------------------------------------------
def _hm_crnn_kernel(patches_ref, conv_ref, lstm_ref, att_ref,
                    ctx_ref, alpha_ref, pooled2_ref, hcat_ref, *, batch, w_out):
    f32 = jnp.float32
    h = HM_VECTOR_SIZE
    B = batch
    K2 = CONV_K * CONV_K
    GW = GATE_STRIDE

    # ---- unpack parameter slabs ----------------------------------------------
    # Small slabs: load once, take static sub-views of the value.
    cb = conv_ref[...]                                   # (51, 20)
    wc = cb[0:K2, :]                                     # (49, 20)
    gamma = cb[K2:K2 + 1, :]                             # (1, 20)
    beta = cb[K2 + 1:K2 + 2, :]                          # (1, 20)

    att = att_ref[...]                                   # (82, 16)
    w1 = att[0:2 * h, :]                                 # (80, 16)
    b1 = att[2 * h:2 * h + 1, :]                         # (1, 16)
    w2r = att[2 * h + 1:2 * h + 2, :]                    # (1, 16)

    # Large slab: slice the ref directly (sub-block VMEM loads, 8-aligned rows).
    wih = lstm_ref[0:2 * NUM_KERNEL, :]                  # (40, 512)
    whh = lstm_ref[2 * NUM_KERNEL:2 * NUM_KERNEL + 2 * h, :]                  # (80, 512)
    bcomb = lstm_ref[2 * NUM_KERNEL + 2 * h:2 * NUM_KERNEL + 2 * h + 1, :]    # (1, 512)

    # ---- Conv2d(1,20,7x7) as im2col matmul (rows ordered (w, b)) -------------
    # Conv bias omitted: training-mode BatchNorm's mean subtraction cancels it.
    conv = jnp.dot(patches_ref[...], wc, preferred_element_type=f32)  # (w_out*B, 20)

    # ---- BatchNorm2d (training-mode batch stats, single pass) + ReLU ---------
    mean = jnp.mean(conv, axis=0, keepdims=True)
    var = jnp.mean(conv * conv, axis=0, keepdims=True) - mean * mean
    scale = gamma * jax.lax.rsqrt(var + BN_EPS)
    y = jnp.maximum((conv - mean) * scale + beta, 0.0)               # (w_out*B, 20)

    # ---- MaxPool1d(kernel=3, stride=3, padding=1) over width -----------------
    # Width-major rows => window t is the contiguous block [lo*B, hi*B).
    # Padding with -inf is unnecessary: every window has >=2 real post-ReLU rows.
    # Each pooled block is stored twice into scratch: forward-order in cols 0:20
    # and time-reversed in cols 20:40, so one matmul later feeds both directions.
    for t in range(SEQ_LEN):
        lo = max(0, 3 * t - 1)
        hi = min(w_out, 3 * t + 2)
        acc = y[lo * B:(lo + 1) * B, :]
        for w in range(lo + 1, hi):
            acc = jnp.maximum(acc, y[w * B:(w + 1) * B, :])
        pooled2_ref[t * B:(t + 1) * B, 0:NUM_KERNEL] = acc
        pooled2_ref[(SEQ_LEN - 1 - t) * B:(SEQ_LEN - t) * B,
                    NUM_KERNEL:2 * NUM_KERNEL] = acc

    # ---- Fused input projection for BOTH directions: one matmul --------------
    xcomb = jnp.dot(pooled2_ref[...], wih, preferred_element_type=f32) + bcomb  # (12B, 512)

    # ---- Merged, lock-stepped bidirectional LSTM -----------------------------
    # State layout: [h_fwd(40) | h_bwd(40)].  At step s the forward direction
    # processes time s, the backward direction processes time SEQ_LEN-1-s.
    hstate = jnp.zeros((B, 2 * h), f32)
    cstate = jnp.zeros((B, 2 * h), f32)
    for s in range(SEQ_LEN):
        g = xcomb[s * B:(s + 1) * B, :] + jnp.dot(hstate, whh,
                                                  preferred_element_type=f32)  # (B, 512)
        sg = jax.nn.sigmoid(g[:, :3 * GW])              # i|f|o pairs (vreg-aligned)
        gg = jnp.tanh(g[:, 3 * GW:3 * GW + 2 * h])      # g pair, (B, 80)
        cstate = sg[:, GW:GW + 2 * h] * cstate + sg[:, 0:2 * h] * gg
        hstate = sg[:, 2 * GW:2 * GW + 2 * h] * jnp.tanh(cstate)
        # Store per-step outputs straight into VMEM scratch (time-major Hcat).
        hcat_ref[s * B:(s + 1) * B, 0:h] = hstate[:, 0:h]
        hcat_ref[(SEQ_LEN - 1 - s) * B:(SEQ_LEN - s) * B, h:2 * h] = hstate[:, h:2 * h]

    # ---- Attention ------------------------------------------------------------
    Hcat = hcat_ref[...]                                              # (12B, 80)
    svals = jnp.tanh(jnp.dot(Hcat, w1, preferred_element_type=f32) + b1)  # (12B, 16)
    # w2 projection on VPU/XLU (b2 dropped: softmax is shift-invariant).
    sc = jnp.sum(svals * w2r, axis=1, keepdims=True)                  # (12B, 1)

    # Lane-dense softmax over time: (B, 12) tile, hardware lane max/sum.
    sc_lane = jnp.concatenate([sc[t * B:(t + 1) * B, :] for t in range(SEQ_LEN)],
                              axis=1)                                 # (B, 12)
    m = jnp.max(sc_lane, axis=1, keepdims=True)
    e = jnp.exp(sc_lane - m)                                          # (B, 12)
    inv = pl.reciprocal(jnp.sum(e, axis=1, keepdims=True), approx=True)  # (B, 1)
    alpha_ref[...] = e * inv                                          # lane-dense output

    # Context: unnormalized weighted sum, pairwise reduction tree, one deferred
    # reciprocal multiply at the end.
    terms = [e[:, t:t + 1] * Hcat[t * B:(t + 1) * B, :] for t in range(SEQ_LEN)]
    while len(terms) > 1:
        nxt = [terms[i] + terms[i + 1] for i in range(0, len(terms) - 1, 2)]
        if len(terms) % 2:
            nxt.append(terms[-1])
        terms = nxt
    ctx_ref[...] = terms[0] * inv


# ----------------------------------------------------------------------------
# JAX glue: layout transforms done once, outside the kernel
# ----------------------------------------------------------------------------
def _im2col_width_major(x, w_out):
    """patches[(w*B + b), r*7 + c] = x[b, 0, r, w + c]  (width-major rows)."""
    batch = x.shape[0]
    xs = x[:, 0, :, :]                                                # (B, 7, W)
    cols = [xs[:, r, c:c + w_out] for r in range(CONV_K) for c in range(CONV_K)]
    patches = jnp.stack(cols, axis=-1)                                # (B, w_out, 49)
    patches = jnp.transpose(patches, (1, 0, 2)).reshape(w_out * batch, CONV_K * CONV_K)
    return patches.astype(jnp.float32)


def _prepare_kernel_params(p):
    """PyTorch-layout params -> 3 packed kernel slabs (fewer, denser DMAs)."""
    h = HM_VECTOR_SIZE
    GW = GATE_STRIDE
    f32 = jnp.float32

    # conv / bn slab: rows [0:49]=wc, [49]=gamma, [50]=beta            (51, 20)
    conv_slab = jnp.concatenate([
        p["conv_w"].reshape(NUM_KERNEL, CONV_K * CONV_K).T.astype(f32),
        p["bn_gamma"].reshape(1, NUM_KERNEL).astype(f32),
        p["bn_beta"].reshape(1, NUM_KERNEL).astype(f32),
    ], axis=0)

    # lstm slab: rows [0:40]=wih_comb, [40:120]=whh_comb, [120]=bias  (121, 512)
    # Combined gate lanes: i@0, f@128, o@256, g@384; fwd at +0, bwd at +40.
    def place(dst, row0, w_torch, dir_off):
        nrows = w_torch.shape[1]
        gi, gf, gg, go = (w_torch[0:h], w_torch[h:2 * h],
                          w_torch[2 * h:3 * h], w_torch[3 * h:4 * h])
        for gate_idx, blk in ((0, gi), (1, gf), (2, go), (3, gg)):
            col = gate_idx * GW + dir_off
            dst = dst.at[row0:row0 + nrows, col:col + h].set(blk.T.astype(f32))
        return dst

    wih = jnp.zeros((2 * NUM_KERNEL, GATES_W), f32)
    wih = place(wih, 0, p["w_ih_f"], 0)
    wih = place(wih, NUM_KERNEL, p["w_ih_b"], h)

    whh = jnp.zeros((2 * h, GATES_W), f32)
    whh = place(whh, 0, p["w_hh_f"], 0)
    whh = place(whh, h, p["w_hh_b"], h)

    bias = jnp.zeros((1, GATES_W), f32)
    for d, off in (("f", 0), ("b", h)):
        b = (p[f"b_ih_{d}"] + p[f"b_hh_{d}"]).astype(f32)
        bi, bf_, bg, bo = b[0:h], b[h:2 * h], b[2 * h:3 * h], b[3 * h:4 * h]
        for gate_idx, blk in ((0, bi), (1, bf_), (2, bo), (3, bg)):
            col = gate_idx * GW + off
            bias = bias.at[0, col:col + h].set(blk)
    lstm_slab = jnp.concatenate([wih, whh, bias], axis=0)

    # attention slab: rows [0:80]=W1^T, [80]=b1, [81]=w2 row           (82, 16)
    att_slab = jnp.concatenate([
        p["W1_w"].T.astype(f32),
        p["W1_b"].reshape(1, ATT_HIDDEN).astype(f32),
        p["w2_w"].reshape(1, ATT_HIDDEN).astype(f32),
    ], axis=0)

    return conv_slab, lstm_slab, att_slab


@jax.jit
def hm_crnn_forward(x, params):
    batch, chans, height, width = x.shape
    assert chans == 1 and height == CONV_K, "forward requires x of shape (B, 1, 7, W)"
    w_out = width - CONV_K + 1
    assert (w_out + 2 - 3) // 3 + 1 == SEQ_LEN, "pooled length must equal 12"

    patches = _im2col_width_major(x, w_out)
    conv_slab, lstm_slab, att_slab = _prepare_kernel_params(params)

    kernel = functools.partial(_hm_crnn_kernel, batch=batch, w_out=w_out)
    vmem = pl.BlockSpec(memory_space=pltpu.MemorySpace.VMEM)

    ctx, alpha = pl.pallas_call(
        kernel,
        out_shape=(
            jax.ShapeDtypeStruct((batch, 2 * HM_VECTOR_SIZE), jnp.float32),
            jax.ShapeDtypeStruct((batch, SEQ_LEN), jnp.float32),
        ),
        in_specs=[vmem, vmem, vmem, vmem],
        out_specs=(vmem, vmem),
        scratch_shapes=[
            pltpu.VMEM((SEQ_LEN * batch, 2 * NUM_KERNEL), jnp.float32),   # doubled pooled seq
            pltpu.VMEM((SEQ_LEN * batch, 2 * HM_VECTOR_SIZE), jnp.float32),  # time-major Hcat
        ],
    )(patches, conv_slab, lstm_slab, att_slab)
    return ctx, alpha


# ----------------------------------------------------------------------------
# Pure-JAX reference (PyTorch semantics, original layouts) for the sanity check
# ----------------------------------------------------------------------------
def _reference_forward(x, p):
    batch = x.shape[0]
    w_out = x.shape[-1] - CONV_K + 1
    xs = x[:, 0, :, :]
    cols = [xs[:, r, c:c + w_out] for r in range(CONV_K) for c in range(CONV_K)]
    patches = jnp.stack(cols, axis=-1)                                # (B, w_out, 49)
    wmat = p["conv_w"].reshape(NUM_KERNEL, CONV_K * CONV_K).T
    conv = patches @ wmat + p["conv_b"]                               # (B, w_out, 20)

    mean = conv.mean(axis=(0, 1))
    var = ((conv - mean) ** 2).mean(axis=(0, 1))
    y = (conv - mean) * jax.lax.rsqrt(var + BN_EPS) * p["bn_gamma"] + p["bn_beta"]
    y = jnp.maximum(y, 0.0)

    pooled = jnp.stack(
        [y[:, max(0, 3 * t - 1):min(w_out, 3 * t + 2), :].max(axis=1) for t in range(SEQ_LEN)],
        axis=1)                                                       # (B, 12, 20)

    h = HM_VECTOR_SIZE

    def run_dir(wih, whh, bih, bhh, reverse):
        hs = jnp.zeros((batch, h)); cs = jnp.zeros((batch, h))
        outs = [None] * SEQ_LEN
        order = range(SEQ_LEN - 1, -1, -1) if reverse else range(SEQ_LEN)
        for t in order:
            g = pooled[:, t, :] @ wih.T + hs @ whh.T + bih + bhh
            i = jax.nn.sigmoid(g[:, 0:h]); f = jax.nn.sigmoid(g[:, h:2 * h])
            gg = jnp.tanh(g[:, 2 * h:3 * h]); o = jax.nn.sigmoid(g[:, 3 * h:4 * h])
            cs = f * cs + i * gg
            hs = o * jnp.tanh(cs)
            outs[t] = hs
        return outs

    of = run_dir(p["w_ih_f"], p["w_hh_f"], p["b_ih_f"], p["b_hh_f"], False)
    ob = run_dir(p["w_ih_b"], p["w_hh_b"], p["b_ih_b"], p["b_hh_b"], True)
    Hcat = jnp.stack([jnp.concatenate([of[t], ob[t]], axis=1) for t in range(SEQ_LEN)], axis=1)

    s = jnp.tanh(Hcat @ p["W1_w"].T + p["W1_b"])
    sc = (s @ p["w2_w"].T + p["w2_b"])[..., 0]                        # (B, 12)
    alpha = jax.nn.softmax(sc, axis=1)
    ctx = jnp.einsum("bt,btd->bd", alpha, Hcat)
    return ctx, alpha


def init_params(key):
    ks = jax.random.split(key, 16)

    def w(k, shape, scale=0.1):
        return (scale * jax.random.normal(k, shape)).astype(jnp.float32)

    H4 = 4 * HM_VECTOR_SIZE
    return {
        "conv_w": w(ks[0], (NUM_KERNEL, 1, CONV_K, CONV_K), 0.2),
        "conv_b": w(ks[1], (NUM_KERNEL,), 0.1),
        "bn_gamma": (1.0 + 0.1 * jax.random.normal(ks[2], (NUM_KERNEL,))).astype(jnp.float32),
        "bn_beta": w(ks[3], (NUM_KERNEL,), 0.1),
        "w_ih_f": w(ks[4], (H4, NUM_KERNEL)),
        "w_hh_f": w(ks[5], (H4, HM_VECTOR_SIZE)),
        "b_ih_f": w(ks[6], (H4,)),
        "b_hh_f": w(ks[7], (H4,)),
        "w_ih_b": w(ks[8], (H4, NUM_KERNEL)),
        "w_hh_b": w(ks[9], (H4, HM_VECTOR_SIZE)),
        "b_ih_b": w(ks[10], (H4,)),
        "b_hh_b": w(ks[11], (H4,)),
        "W1_w": w(ks[12], (ATT_HIDDEN, 2 * HM_VECTOR_SIZE)),
        "W1_b": w(ks[13], (ATT_HIDDEN,)),
        "w2_w": w(ks[14], (1, ATT_HIDDEN), 0.3),
        "w2_b": w(ks[15], (1,), 0.1),
    }


if __name__ == "__main__":
    key = jax.random.PRNGKey(0)
    pkey, xkey = jax.random.split(key)
    params = init_params(pkey)

    # Input shape implied by the forward: (B, 1, 7, W=40)
    #   conv(7x7) -> (B, 20, 1, 34) -> squeeze(2) -> maxpool(3,3,pad=1) -> length 12.
    x = jax.random.normal(xkey, (2, 1, CONV_K, 40), dtype=jnp.float32)

    ctx, alpha = jax.block_until_ready(hm_crnn_forward(x, params))
    ctx_ref, alpha_ref = _reference_forward(x, params)

    assert ctx.shape == (2, 2 * HM_VECTOR_SIZE)
    assert alpha.shape == (2, SEQ_LEN)
    np.testing.assert_allclose(np.asarray(ctx), np.asarray(ctx_ref), rtol=2e-2, atol=2e-3)
    np.testing.assert_allclose(np.asarray(alpha), np.asarray(alpha_ref), rtol=2e-2, atol=2e-3)
    np.testing.assert_allclose(np.asarray(alpha).sum(axis=1), 1.0, rtol=1e-3, atol=2e-3)

    print("KERNEL_OK")
</pallas_src>

<mosaic_0001>
module attributes {stable_mosaic.version = 11 : i64} {
  func.func @_hm_crnn_kernel(%arg0: memref<68x49xf32, #tpu.memory_space<vmem>>, %arg1: memref<51x20xf32, #tpu.memory_space<vmem>>, %arg2: memref<121x512xf32, #tpu.memory_space<vmem>>, %arg3: memref<82x16xf32, #tpu.memory_space<vmem>>, %arg4: memref<2x80xf32, #tpu.memory_space<vmem>>, %arg5: memref<2x12xf32, #tpu.memory_space<vmem>>, %arg6: memref<24x40xf32, #tpu.memory_space<vmem>>, %arg7: memref<24x80xf32, #tpu.memory_space<vmem>>) attributes {dimension_semantics = [], scalar_prefetch = 0 : i64, scratch_operands = 2 : i64, tpu.core_type = #tpu.core_type<tc>} {
    %c0 = arith.constant 0 : index
    %c0_0 = arith.constant 0 : index
    %0 = vector.load %arg1[%c0, %c0_0] : memref<51x20xf32, #tpu.memory_space<vmem>>, vector<51x20xf32>
    %1 = vector.extract_strided_slice %0 {offsets = [0, 0], sizes = [49, 20], strides = [1, 1]} : vector<51x20xf32> to vector<49x20xf32>
    %2 = vector.extract_strided_slice %0 {offsets = [49, 0], sizes = [1, 20], strides = [1, 1]} : vector<51x20xf32> to vector<1x20xf32>
    %3 = vector.extract_strided_slice %0 {offsets = [50, 0], sizes = [1, 20], strides = [1, 1]} : vector<51x20xf32> to vector<1x20xf32>
    %c0_1 = arith.constant 0 : index
    %c0_2 = arith.constant 0 : index
    %4 = vector.load %arg3[%c0_1, %c0_2] : memref<82x16xf32, #tpu.memory_space<vmem>>, vector<82x16xf32>
    %5 = vector.extract_strided_slice %4 {offsets = [0, 0], sizes = [80, 16], strides = [1, 1]} : vector<82x16xf32> to vector<80x16xf32>
    %6 = vector.extract_strided_slice %4 {offsets = [80, 0], sizes = [1, 16], strides = [1, 1]} : vector<82x16xf32> to vector<1x16xf32>
    %7 = vector.extract_strided_slice %4 {offsets = [81, 0], sizes = [1, 16], strides = [1, 1]} : vector<82x16xf32> to vector<1x16xf32>
    %c0_3 = arith.constant 0 : index
    %c0_4 = arith.constant 0 : index
    %8 = vector.load %arg2[%c0_3, %c0_4] : memref<121x512xf32, #tpu.memory_space<vmem>>, vector<40x512xf32>
    %c40 = arith.constant 40 : index
    %c0_5 = arith.constant 0 : index
    %9 = vector.load %arg2[%c40, %c0_5] : memref<121x512xf32, #tpu.memory_space<vmem>>, vector<80x512xf32>
    %c120 = arith.constant 120 : index
    %c0_6 = arith.constant 0 : index
    %10 = vector.load %arg2[%c120, %c0_6] : memref<121x512xf32, #tpu.memory_space<vmem>>, vector<1x512xf32>
    %c0_7 = arith.constant 0 : index
    %c0_8 = arith.constant 0 : index
    %11 = vector.load %arg0[%c0_7, %c0_8] : memref<68x49xf32, #tpu.memory_space<vmem>>, vector<68x49xf32>
    %cst = arith.constant dense<0.000000e+00> : vector<68x20xf32>
    %12 = tpu.matmul %11, %1, %cst {dimension_numbers = #tpu.dot_dimension_numbers<[1], [0], [0], [1], [0, 0, 1, 1], [], []>} : vector<68x49xf32>, vector<49x20xf32>, vector<68x20xf32> -> vector<68x20xf32>
    %cst_9 = arith.constant dense<0.000000e+00> : vector<20xf32>
    %13 = vector.multi_reduction <add>, %12, %cst_9 [0] : vector<68x20xf32> to vector<20xf32>
    %14 = vector.shape_cast %13 : vector<20xf32> to vector<1x20xf32>
    %cst_10 = arith.constant 6.800000e+01 : f32
    %15 = vector.broadcast %cst_10 : f32 to vector<1x20xf32>
    %16 = arith.divf %14, %15 : vector<1x20xf32>
    %17 = arith.mulf %12, %12 : vector<68x20xf32>
    %cst_11 = arith.constant dense<0.000000e+00> : vector<20xf32>
    %18 = vector.multi_reduction <add>, %17, %cst_11 [0] : vector<68x20xf32> to vector<20xf32>
    %19 = vector.shape_cast %18 : vector<20xf32> to vector<1x20xf32>
    %cst_12 = arith.constant 6.800000e+01 : f32
    %20 = vector.broadcast %cst_12 : f32 to vector<1x20xf32>
    %21 = arith.divf %19, %20 : vector<1x20xf32>
    %22 = arith.mulf %16, %16 : vector<1x20xf32>
    %23 = arith.subf %21, %22 : vector<1x20xf32>
    %cst_13 = arith.constant 9.99999974E-6 : f32
    %24 = vector.broadcast %cst_13 : f32 to vector<1x20xf32>
    %25 = arith.addf %23, %24 : vector<1x20xf32>
    %26 = math.rsqrt %25 : vector<1x20xf32>
    %27 = arith.mulf %2, %26 : vector<1x20xf32>
    %28 = vector.broadcast %16 : vector<1x20xf32> to vector<68x20xf32>
    %29 = arith.subf %12, %28 : vector<68x20xf32>
    %30 = vector.broadcast %27 : vector<1x20xf32> to vector<68x20xf32>
    %31 = arith.mulf %29, %30 : vector<68x20xf32>
    %32 = vector.broadcast %3 : vector<1x20xf32> to vector<68x20xf32>
    %33 = arith.addf %31, %32 : vector<68x20xf32>
    %cst_14 = arith.constant 0.000000e+00 : f32
    %34 = vector.broadcast %cst_14 : f32 to vector<68x20xf32>
    %35 = arith.maximumf %33, %34 : vector<68x20xf32>
    %36 = vector.extract_strided_slice %35 {offsets = [0, 0], sizes = [2, 20], strides = [1, 1]} : vector<68x20xf32> to vector<2x20xf32>
    %37 = vector.extract_strided_slice %35 {offsets = [2, 0], sizes = [2, 20], strides = [1, 1]} : vector<68x20xf32> to vector<2x20xf32>
    %38 = arith.maximumf %36, %37 : vector<2x20xf32>
    %c0_15 = arith.constant 0 : index
    %c0_16 = arith.constant 0 : index
    %39 = vector.load %arg6[%c0_15, %c0_16] : memref<24x40xf32, #tpu.memory_space<vmem>>, vector<2x20xf32>
    tpu.vector_store %arg6[%c0_15, %c0_16], %38 {strides = array<i32>} : memref<24x40xf32, #tpu.memory_space<vmem>>, vector<2x20xf32>,
    %c22 = arith.constant 22 : index
    %c20 = arith.constant 20 : index
    %40 = vector.load %arg6[%c22, %c20] : memref<24x40xf32, #tpu.memory_space<vmem>>, vector<2x20xf32>
    tpu.vector_store %arg6[%c22, %c20], %38 {strides = array<i32>} : memref<24x40xf32, #tpu.memory_space<vmem>>, vector<2x20xf32>,
    %41 = vector.extract_strided_slice %35 {offsets = [4, 0], sizes = [2, 20], strides = [1, 1]} : vector<68x20xf32> to vector<2x20xf32>
    %42 = vector.extract_strided_slice %35 {offsets = [6, 0], sizes = [2, 20], strides = [1, 1]} : vector<68x20xf32> to vector<2x20xf32>
    %43 = arith.maximumf %41, %42 : vector<2x20xf32>
    %44 = vector.extract_strided_slice %35 {offsets = [8, 0], sizes = [2, 20], strides = [1, 1]} : vector<68x20xf32> to vector<2x20xf32>
    %45 = arith.maximumf %43, %44 : vector<2x20xf32>
    %c2 = arith.constant 2 : index
    %c0_17 = arith.constant 0 : index
    %46 = vector.load %arg6[%c2, %c0_17] : memref<24x40xf32, #tpu.memory_space<vmem>>, vector<2x20xf32>
    tpu.vector_store %arg6[%c2, %c0_17], %45 {strides = array<i32>} : memref<24x40xf32, #tpu.memory_space<vmem>>, vector<2x20xf32>,
    %c20_18 = arith.constant 20 : index
    %c20_19 = arith.constant 20 : index
    %47 = vector.load %arg6[%c20_18, %c20_19] : memref<24x40xf32, #tpu.memory_space<vmem>>, vector<2x20xf32>
    tpu.vector_store %arg6[%c20_18, %c20_19], %45 {strides = array<i32>} : memref<24x40xf32, #tpu.memory_space<vmem>>, vector<2x20xf32>,
    %48 = vector.extract_strided_slice %35 {offsets = [10, 0], sizes = [2, 20], strides = [1, 1]} : vector<68x20xf32> to vector<2x20xf32>
    %49 = vector.extract_strided_slice %35 {offsets = [12, 0], sizes = [2, 20], strides = [1, 1]} : vector<68x20xf32> to vector<2x20xf32>
    %50 = arith.maximumf %48, %49 : vector<2x20xf32>
    %51 = vector.extract_strided_slice %35 {offsets = [14, 0], sizes = [2, 20], strides = [1, 1]} : vector<68x20xf32> to vector<2x20xf32>
    %52 = arith.maximumf %50, %51 : vector<2x20xf32>
    %c4 = arith.constant 4 : index
    %c0_20 = arith.constant 0 : index
    %53 = vector.load %arg6[%c4, %c0_20] : memref<24x40xf32, #tpu.memory_space<vmem>>, vector<2x20xf32>
    tpu.vector_store %arg6[%c4, %c0_20], %52 {strides = array<i32>} : memref<24x40xf32, #tpu.memory_space<vmem>>, vector<2x20xf32>,
    %c18 = arith.constant 18 : index
    %c20_21 = arith.constant 20 : index
    %54 = vector.load %arg6[%c18, %c20_21] : memref<24x40xf32, #tpu.memory_space<vmem>>, vector<2x20xf32>
    tpu.vector_store %arg6[%c18, %c20_21], %52 {strides = array<i32>} : memref<24x40xf32, #tpu.memory_space<vmem>>, vector<2x20xf32>,
    %55 = vector.extract_strided_slice %35 {offsets = [16, 0], sizes = [2, 20], strides = [1, 1]} : vector<68x20xf32> to vector<2x20xf32>
    %56 = vector.extract_strided_slice %35 {offsets = [18, 0], sizes = [2, 20], strides = [1, 1]} : vector<68x20xf32> to vector<2x20xf32>
    %57 = arith.maximumf %55, %56 : vector<2x20xf32>
    %58 = vector.extract_strided_slice %35 {offsets = [20, 0], sizes = [2, 20], strides = [1, 1]} : vector<68x20xf32> to vector<2x20xf32>
    %59 = arith.maximumf %57, %58 : vector<2x20xf32>
    %c6 = arith.constant 6 : index
    %c0_22 = arith.constant 0 : index
    %60 = vector.load %arg6[%c6, %c0_22] : memref<24x40xf32, #tpu.memory_space<vmem>>, vector<2x20xf32>
    tpu.vector_store %arg6[%c6, %c0_22], %59 {strides = array<i32>} : memref<24x40xf32, #tpu.memory_space<vmem>>, vector<2x20xf32>,
    %c16 = arith.constant 16 : index
    %c20_23 = arith.constant 20 : index
    %61 = vector.load %arg6[%c16, %c20_23] : memref<24x40xf32, #tpu.memory_space<vmem>>, vector<2x20xf32>
    tpu.vector_store %arg6[%c16, %c20_23], %59 {strides = array<i32>} : memref<24x40xf32, #tpu.memory_space<vmem>>, vector<2x20xf32>,
    %62 = vector.extract_strided_slice %35 {offsets = [22, 0], sizes = [2, 20], strides = [1, 1]} : vector<68x20xf32> to vector<2x20xf32>
    %63 = vector.extract_strided_slice %35 {offsets = [24, 0], sizes = [2, 20], strides = [1, 1]} : vector<68x20xf32> to vector<2x20xf32>
    %64 = arith.maximumf %62, %63 : vector<2x20xf32>
    %65 = vector.extract_strided_slice %35 {offsets = [26, 0], sizes = [2, 20], strides = [1, 1]} : vector<68x20xf32> to vector<2x20xf32>
    %66 = arith.maximumf %64, %65 : vector<2x20xf32>
    %c8 = arith.constant 8 : index
    %c0_24 = arith.constant 0 : index
    %67 = vector.load %arg6[%c8, %c0_24] : memref<24x40xf32, #tpu.memory_space<vmem>>, vector<2x20xf32>
    tpu.vector_store %arg6[%c8, %c0_24], %66 {strides = array<i32>} : memref<24x40xf32, #tpu.memory_space<vmem>>, vector<2x20xf32>,
    %c14 = arith.constant 14 : index
    %c20_25 = arith.constant 20 : index
    %68 = vector.load %arg6[%c14, %c20_25] : memref<24x40xf32, #tpu.memory_space<vmem>>, vector<2x20xf32>
    tpu.vector_store %arg6[%c14, %c20_25], %66 {strides = array<i32>} : memref<24x40xf32, #tpu.memory_space<vmem>>, vector<2x20xf32>,
    %69 = vector.extract_strided_slice %35 {offsets = [28, 0], sizes = [2, 20], strides = [1, 1]} : vector<68x20xf32> to vector<2x20xf32>
    %70 = vector.extract_strided_slice %35 {offsets = [30, 0], sizes = [2, 20], strides = [1, 1]} : vector<68x20xf32> to vector<2x20xf32>
    %71 = arith.maximumf %69, %70 : vector<2x20xf32>
    %72 = vector.extract_strided_slice %35 {offsets = [32, 0], sizes = [2, 20], strides = [1, 1]} : vector<68x20xf32> to vector<2x20xf32>
    %73 = arith.maximumf %71, %72 : vector<2x20xf32>
    %c10 = arith.constant 10 : index
    %c0_26 = arith.constant 0 : index
    %74 = vector.load %arg6[%c10, %c0_26] : memref<24x40xf32, #tpu.memory_space<vmem>>, vector<2x20xf32>
    tpu.vector_store %arg6[%c10, %c0_26], %73 {strides = array<i32>} : memref<24x40xf32, #tpu.memory_space<vmem>>, vector<2x20xf32>,
    %c12 = arith.constant 12 : index
    %c20_27 = arith.constant 20 : index
    %75 = vector.load %arg6[%c12, %c20_27] : memref<24x40xf32, #tpu.memory_space<vmem>>, vector<2x20xf32>
    tpu.vector_store %arg6[%c12, %c20_27], %73 {strides = array<i32>} : memref<24x40xf32, #tpu.memory_space<vmem>>, vector<2x20xf32>,
    %76 = vector.extract_strided_slice %35 {offsets = [34, 0], sizes = [2, 20], strides = [1, 1]} : vector<68x20xf32> to vector<2x20xf32>
    %77 = vector.extract_strided_slice %35 {offsets = [36, 0], sizes = [2, 20], strides = [1, 1]} : vector<68x20xf32> to vector<2x20xf32>
    %78 = arith.maximumf %76, %77 : vector<2x20xf32>
    %79 = vector.extract_strided_slice %35 {offsets = [38, 0], sizes = [2, 20], strides = [1, 1]} : vector<68x20xf32> to vector<2x20xf32>
    %80 = arith.maximumf %78, %79 : vector<2x20xf32>
    %c12_28 = arith.constant 12 : index
    %c0_29 = arith.constant 0 : index
    %81 = vector.load %arg6[%c12_28, %c0_29] : memref<24x40xf32, #tpu.memory_space<vmem>>, vector<2x20xf32>
    tpu.vector_store %arg6[%c12_28, %c0_29], %80 {strides = array<i32>} : memref<24x40xf32, #tpu.memory_space<vmem>>, vector<2x20xf32>,
    %c10_30 = arith.constant 10 : index
    %c20_31 = arith.constant 20 : index
    %82 = vector.load %arg6[%c10_30, %c20_31] : memref<24x40xf32, #tpu.memory_space<vmem>>, vector<2x20xf32>
    tpu.vector_store %arg6[%c10_30, %c20_31], %80 {strides = array<i32>} : memref<24x40xf32, #tpu.memory_space<vmem>>, vector<2x20xf32>,
    %83 = vector.extract_strided_slice %35 {offsets = [40, 0], sizes = [2, 20], strides = [1, 1]} : vector<68x20xf32> to vector<2x20xf32>
    %84 = vector.extract_strided_slice %35 {offsets = [42, 0], sizes = [2, 20], strides = [1, 1]} : vector<68x20xf32> to vector<2x20xf32>
    %85 = arith.maximumf %83, %84 : vector<2x20xf32>
    %86 = vector.extract_strided_slice %35 {offsets = [44, 0], sizes = [2, 20], strides = [1, 1]} : vector<68x20xf32> to vector<2x20xf32>
    %87 = arith.maximumf %85, %86 : vector<2x20xf32>
    %c14_32 = arith.constant 14 : index
    %c0_33 = arith.constant 0 : index
    %88 = vector.load %arg6[%c14_32, %c0_33] : memref<24x40xf32, #tpu.memory_space<vmem>>, vector<2x20xf32>
    tpu.vector_store %arg6[%c14_32, %c0_33], %87 {strides = array<i32>} : memref<24x40xf32, #tpu.memory_space<vmem>>, vector<2x20xf32>,
    %c8_34 = arith.constant 8 : index
    %c20_35 = arith.constant 20 : index
    %89 = vector.load %arg6[%c8_34, %c20_35] : memref<24x40xf32, #tpu.memory_space<vmem>>, vector<2x20xf32>
    tpu.vector_store %arg6[%c8_34, %c20_35], %87 {strides = array<i32>} : memref<24x40xf32, #tpu.memory_space<vmem>>, vector<2x20xf32>,
    %90 = vector.extract_strided_slice %35 {offsets = [46, 0], sizes = [2, 20], strides = [1, 1]} : vector<68x20xf32> to vector<2x20xf32>
    %91 = vector.extract_strided_slice %35 {offsets = [48, 0], sizes = [2, 20], strides = [1, 1]} : vector<68x20xf32> to vector<2x20xf32>
    %92 = arith.maximumf %90, %91 : vector<2x20xf32>
    %93 = vector.extract_strided_slice %35 {offsets = [50, 0], sizes = [2, 20], strides = [1, 1]} : vector<68x20xf32> to vector<2x20xf32>
    %94 = arith.maximumf %92, %93 : vector<2x20xf32>
    %c16_36 = arith.constant 16 : index
    %c0_37 = arith.constant 0 : index
    %95 = vector.load %arg6[%c16_36, %c0_37] : memref<24x40xf32, #tpu.memory_space<vmem>>, vector<2x20xf32>
    tpu.vector_store %arg6[%c16_36, %c0_37], %94 {strides = array<i32>} : memref<24x40xf32, #tpu.memory_space<vmem>>, vector<2x20xf32>,
    %c6_38 = arith.constant 6 : index
    %c20_39 = arith.constant 20 : index
    %96 = vector.load %arg6[%c6_38, %c20_39] : memref<24x40xf32, #tpu.memory_space<vmem>>, vector<2x20xf32>
    tpu.vector_store %arg6[%c6_38, %c20_39], %94 {strides = array<i32>} : memref<24x40xf32, #tpu.memory_space<vmem>>, vector<2x20xf32>,
    %97 = vector.extract_strided_slice %35 {offsets = [52, 0], sizes = [2, 20], strides = [1, 1]} : vector<68x20xf32> to vector<2x20xf32>
    %98 = vector.extract_strided_slice %35 {offsets = [54, 0], sizes = [2, 20], strides = [1, 1]} : vector<68x20xf32> to vector<2x20xf32>
    %99 = arith.maximumf %97, %98 : vector<2x20xf32>
    %100 = vector.extract_strided_slice %35 {offsets = [56, 0], sizes = [2, 20], strides = [1, 1]} : vector<68x20xf32> to vector<2x20xf32>
    %101 = arith.maximumf %99, %100 : vector<2x20xf32>
    %c18_40 = arith.constant 18 : index
    %c0_41 = arith.constant 0 : index
    %102 = vector.load %arg6[%c18_40, %c0_41] : memref<24x40xf32, #tpu.memory_space<vmem>>, vector<2x20xf32>
    tpu.vector_store %arg6[%c18_40, %c0_41], %101 {strides = array<i32>} : memref<24x40xf32, #tpu.memory_space<vmem>>, vector<2x20xf32>,
    %c4_42 = arith.constant 4 : index
    %c20_43 = arith.constant 20 : index
    %103 = vector.load %arg6[%c4_42, %c20_43] : memref<24x40xf32, #tpu.memory_space<vmem>>, vector<2x20xf32>
    tpu.vector_store %arg6[%c4_42, %c20_43], %101 {strides = array<i32>} : memref<24x40xf32, #tpu.memory_space<vmem>>, vector<2x20xf32>,
    %104 = vector.extract_strided_slice %35 {offsets = [58, 0], sizes = [2, 20], strides = [1, 1]} : vector<68x20xf32> to vector<2x20xf32>
    %105 = vector.extract_strided_slice %35 {offsets = [60, 0], sizes = [2, 20], strides = [1, 1]} : vector<68x20xf32> to vector<2x20xf32>
    %106 = arith.maximumf %104, %105 : vector<2x20xf32>
    %107 = vector.extract_strided_slice %35 {offsets = [62, 0], sizes = [2, 20], strides = [1, 1]} : vector<68x20xf32> to vector<2x20xf32>
    %108 = arith.maximumf %106, %107 : vector<2x20xf32>
    %c20_44 = arith.constant 20 : index
    %c0_45 = arith.constant 0 : index
    %109 = vector.load %arg6[%c20_44, %c0_45] : memref<24x40xf32, #tpu.memory_space<vmem>>, vector<2x20xf32>
    tpu.vector_store %arg6[%c20_44, %c0_45], %108 {strides = array<i32>} : memref<24x40xf32, #tpu.memory_space<vmem>>, vector<2x20xf32>,
    %c2_46 = arith.constant 2 : index
    %c20_47 = arith.constant 20 : index
    %110 = vector.load %arg6[%c2_46, %c20_47] : memref<24x40xf32, #tpu.memory_space<vmem>>, vector<2x20xf32>
    tpu.vector_store %arg6[%c2_46, %c20_47], %108 {strides = array<i32>} : memref<24x40xf32, #tpu.memory_space<vmem>>, vector<2x20xf32>,
    %111 = vector.extract_strided_slice %35 {offsets = [64, 0], sizes = [2, 20], strides = [1, 1]} : vector<68x20xf32> to vector<2x20xf32>
    %112 = vector.extract_strided_slice %35 {offsets = [66, 0], sizes = [2, 20], strides = [1, 1]} : vector<68x20xf32> to vector<2x20xf32>
    %113 = arith.maximumf %111, %112 : vector<2x20xf32>
    %c22_48 = arith.constant 22 : index
    %c0_49 = arith.constant 0 : index
    %114 = vector.load %arg6[%c22_48, %c0_49] : memref<24x40xf32, #tpu.memory_space<vmem>>, vector<2x20xf32>
    tpu.vector_store %arg6[%c22_48, %c0_49], %113 {strides = array<i32>} : memref<24x40xf32, #tpu.memory_space<vmem>>, vector<2x20xf32>,
    %c0_50 = arith.constant 0 : index
    %c20_51 = arith.constant 20 : index
    %115 = vector.load %arg6[%c0_50, %c20_51] : memref<24x40xf32, #tpu.memory_space<vmem>>, vector<2x20xf32>
    tpu.vector_store %arg6[%c0_50, %c20_51], %113 {strides = array<i32>} : memref<24x40xf32, #tpu.memory_space<vmem>>, vector<2x20xf32>,
    %c0_52 = arith.constant 0 : index
    %c0_53 = arith.constant 0 : index
    %116 = vector.load %arg6[%c0_52, %c0_53] : memref<24x40xf32, #tpu.memory_space<vmem>>, vector<24x40xf32>
    %cst_54 = arith.constant dense<0.000000e+00> : vector<24x512xf32>
    %117 = tpu.matmul %116, %8, %cst_54 {dimension_numbers = #tpu.dot_dimension_numbers<[1], [0], [0], [1], [0, 0, 1, 1], [], []>} : vector<24x40xf32>, vector<40x512xf32>, vector<24x512xf32> -> vector<24x512xf32>
    %118 = vector.broadcast %10 : vector<1x512xf32> to vector<24x512xf32>
    %119 = arith.addf %117, %118 : vector<24x512xf32>
    %cst_55 = arith.constant 0.000000e+00 : f32
    %120 = vector.broadcast %cst_55 : f32 to vector<2x80xf32>
    %cst_56 = arith.constant 0.000000e+00 : f32
    %121 = vector.broadcast %cst_56 : f32 to vector<2x80xf32>
    %122 = vector.extract_strided_slice %119 {offsets = [0, 0], sizes = [2, 512], strides = [1, 1]} : vector<24x512xf32> to vector<2x512xf32>
    %cst_57 = arith.constant dense<0.000000e+00> : vector<2x512xf32>
    %123 = tpu.matmul %120, %9, %cst_57 {dimension_numbers = #tpu.dot_dimension_numbers<[1], [0], [0], [1], [0, 0, 1, 1], [], []>} : vector<2x80xf32>, vector<80x512xf32>, vector<2x512xf32> -> vector<2x512xf32>
    %124 = arith.addf %122, %123 : vector<2x512xf32>
    %125 = vector.extract_strided_slice %124 {offsets = [0, 0], sizes = [2, 384], strides = [1, 1]} : vector<2x512xf32> to vector<2x384xf32>
    %126 = arith.negf %125 : vector<2x384xf32>
    %127 = math.exp %126 : vector<2x384xf32>
    %cst_58 = arith.constant 1.000000e+00 : f32
    %128 = vector.broadcast %cst_58 : f32 to vector<2x384xf32>
    %129 = arith.addf %128, %127 : vector<2x384xf32>
    %130 = arith.divf %128, %129 : vector<2x384xf32>
    %131 = vector.extract_strided_slice %124 {offsets = [0, 384], sizes = [2, 80], strides = [1, 1]} : vector<2x512xf32> to vector<2x80xf32>
    %132 = math.tanh %131 : vector<2x80xf32>
    %133 = vector.extract_strided_slice %130 {offsets = [0, 128], sizes = [2, 80], strides = [1, 1]} : vector<2x384xf32> to vector<2x80xf32>
    %134 = arith.mulf %133, %121 : vector<2x80xf32>
    %135 = vector.extract_strided_slice %130 {offsets = [0, 0], sizes = [2, 80], strides = [1, 1]} : vector<2x384xf32> to vector<2x80xf32>
    %136 = arith.mulf %135, %132 : vector<2x80xf32>
    %137 = arith.addf %134, %136 : vector<2x80xf32>
    %138 = vector.extract_strided_slice %130 {offsets = [0, 256], sizes = [2, 80], strides = [1, 1]} : vector<2x384xf32> to vector<2x80xf32>
    %139 = math.tanh %137 : vector<2x80xf32>
    %140 = arith.mulf %138, %139 : vector<2x80xf32>
    %141 = vector.extract_strided_slice %140 {offsets = [0, 0], sizes = [2, 40], strides = [1, 1]} : vector<2x80xf32> to vector<2x40xf32>
    %c0_59 = arith.constant 0 : index
    %c0_60 = arith.constant 0 : index
    %142 = vector.load %arg7[%c0_59, %c0_60] : memref<24x80xf32, #tpu.memory_space<vmem>>, vector<2x40xf32>
    tpu.vector_store %arg7[%c0_59, %c0_60], %141 {strides = array<i32>} : memref<24x80xf32, #tpu.memory_space<vmem>>, vector<2x40xf32>,
    %143 = vector.extract_strided_slice %140 {offsets = [0, 40], sizes = [2, 40], strides = [1, 1]} : vector<2x80xf32> to vector<2x40xf32>
    %c22_61 = arith.constant 22 : index
    %c40_62 = arith.constant 40 : index
    %144 = vector.load %arg7[%c22_61, %c40_62] : memref<24x80xf32, #tpu.memory_space<vmem>>, vector<2x40xf32>
    tpu.vector_store %arg7[%c22_61, %c40_62], %143 {strides = array<i32>} : memref<24x80xf32, #tpu.memory_space<vmem>>, vector<2x40xf32>,
    %145 = vector.extract_strided_slice %119 {offsets = [2, 0], sizes = [2, 512], strides = [1, 1]} : vector<24x512xf32> to vector<2x512xf32>
    %cst_63 = arith.constant dense<0.000000e+00> : vector<2x512xf32>
    %146 = tpu.matmul %140, %9, %cst_63 {dimension_numbers = #tpu.dot_dimension_numbers<[1], [0], [0], [1], [0, 0, 1, 1], [], []>} : vector<2x80xf32>, vector<80x512xf32>, vector<2x512xf32> -> vector<2x512xf32>
    %147 = arith.addf %145, %146 : vector<2x512xf32>
    %148 = vector.extract_strided_slice %147 {offsets = [0, 0], sizes = [2, 384], strides = [1, 1]} : vector<2x512xf32> to vector<2x384xf32>
    %149 = arith.negf %148 : vector<2x384xf32>
    %150 = math.exp %149 : vector<2x384xf32>
    %cst_64 = arith.constant 1.000000e+00 : f32
    %151 = vector.broadcast %cst_64 : f32 to vector<2x384xf32>
    %152 = arith.addf %151, %150 : vector<2x384xf32>
    %153 = arith.divf %151, %152 : vector<2x384xf32>
    %154 = vector.extract_strided_slice %147 {offsets = [0, 384], sizes = [2, 80], strides = [1, 1]} : vector<2x512xf32> to vector<2x80xf32>
    %155 = math.tanh %154 : vector<2x80xf32>
    %156 = vector.extract_strided_slice %153 {offsets = [0, 128], sizes = [2, 80], strides = [1, 1]} : vector<2x384xf32> to vector<2x80xf32>
    %157 = arith.mulf %156, %137 : vector<2x80xf32>
    %158 = vector.extract_strided_slice %153 {offsets = [0, 0], sizes = [2, 80], strides = [1, 1]} : vector<2x384xf32> to vector<2x80xf32>
    %159 = arith.mulf %158, %155 : vector<2x80xf32>
    %160 = arith.addf %157, %159 : vector<2x80xf32>
    %161 = vector.extract_strided_slice %153 {offsets = [0, 256], sizes = [2, 80], strides = [1, 1]} : vector<2x384xf32> to vector<2x80xf32>
    %162 = math.tanh %160 : vector<2x80xf32>
    %163 = arith.mulf %161, %162 : vector<2x80xf32>
    %164 = vector.extract_strided_slice %163 {offsets = [0, 0], sizes = [2, 40], strides = [1, 1]} : vector<2x80xf32> to vector<2x40xf32>
    %c2_65 = arith.constant 2 : index
    %c0_66 = arith.constant 0 : index
    %165 = vector.load %arg7[%c2_65, %c0_66] : memref<24x80xf32, #tpu.memory_space<vmem>>, vector<2x40xf32>
    tpu.vector_store %arg7[%c2_65, %c0_66], %164 {strides = array<i32>} : memref<24x80xf32, #tpu.memory_space<vmem>>, vector<2x40xf32>,
    %166 = vector.extract_strided_slice %163 {offsets = [0, 40], sizes = [2, 40], strides = [1, 1]} : vector<2x80xf32> to vector<2x40xf32>
    %c20_67 = arith.constant 20 : index
    %c40_68 = arith.constant 40 : index
    %167 = vector.load %arg7[%c20_67, %c40_68] : memref<24x80xf32, #tpu.memory_space<vmem>>, vector<2x40xf32>
    tpu.vector_store %arg7[%c20_67, %c40_68], %166 {strides = array<i32>} : memref<24x80xf32, #tpu.memory_space<vmem>>, vector<2x40xf32>,
    %168 = vector.extract_strided_slice %119 {offsets = [4, 0], sizes = [2, 512], strides = [1, 1]} : vector<24x512xf32> to vector<2x512xf32>
    %cst_69 = arith.constant dense<0.000000e+00> : vector<2x512xf32>
    %169 = tpu.matmul %163, %9, %cst_69 {dimension_numbers = #tpu.dot_dimension_numbers<[1], [0], [0], [1], [0, 0, 1, 1], [], []>} : vector<2x80xf32>, vector<80x512xf32>, vector<2x512xf32> -> vector<2x512xf32>
    %170 = arith.addf %168, %169 : vector<2x512xf32>
    %171 = vector.extract_strided_slice %170 {offsets = [0, 0], sizes = [2, 384], strides = [1, 1]} : vector<2x512xf32> to vector<2x384xf32>
    %172 = arith.negf %171 : vector<2x384xf32>
    %173 = math.exp %172 : vector<2x384xf32>
    %cst_70 = arith.constant 1.000000e+00 : f32
    %174 = vector.broadcast %cst_70 : f32 to vector<2x384xf32>
    %175 = arith.addf %174, %173 : vector<2x384xf32>
    %176 = arith.divf %174, %175 : vector<2x384xf32>
    %177 = vector.extract_strided_slice %170 {offsets = [0, 384], sizes = [2, 80], strides = [1, 1]} : vector<2x512xf32> to vector<2x80xf32>
    %178 = math.tanh %177 : vector<2x80xf32>
    %179 = vector.extract_strided_slice %176 {offsets = [0, 128], sizes = [2, 80], strides = [1, 1]} : vector<2x384xf32> to vector<2x80xf32>
    %180 = arith.mulf %179, %160 : vector<2x80xf32>
    %181 = vector.extract_strided_slice %176 {offsets = [0, 0], sizes = [2, 80], strides = [1, 1]} : vector<2x384xf32> to vector<2x80xf32>
    %182 = arith.mulf %181, %178 : vector<2x80xf32>
    %183 = arith.addf %180, %182 : vector<2x80xf32>
    %184 = vector.extract_strided_slice %176 {offsets = [0, 256], sizes = [2, 80], strides = [1, 1]} : vector<2x384xf32> to vector<2x80xf32>
    %185 = math.tanh %183 : vector<2x80xf32>
    %186 = arith.mulf %184, %185 : vector<2x80xf32>
    %187 = vector.extract_strided_slice %186 {offsets = [0, 0], sizes = [2, 40], strides = [1, 1]} : vector<2x80xf32> to vector<2x40xf32>
    %c4_71 = arith.constant 4 : index
    %c0_72 = arith.constant 0 : index
    %188 = vector.load %arg7[%c4_71, %c0_72] : memref<24x80xf32, #tpu.memory_space<vmem>>, vector<2x40xf32>
    tpu.vector_store %arg7[%c4_71, %c0_72], %187 {strides = array<i32>} : memref<24x80xf32, #tpu.memory_space<vmem>>, vector<2x40xf32>,
    %189 = vector.extract_strided_slice %186 {offsets = [0, 40], sizes = [2, 40], strides = [1, 1]} : vector<2x80xf32> to vector<2x40xf32>
    %c18_73 = arith.constant 18 : index
    %c40_74 = arith.constant 40 : index
    %190 = vector.load %arg7[%c18_73, %c40_74] : memref<24x80xf32, #tpu.memory_space<vmem>>, vector<2x40xf32>
    tpu.vector_store %arg7[%c18_73, %c40_74], %189 {strides = array<i32>} : memref<24x80xf32, #tpu.memory_space<vmem>>, vector<2x40xf32>,
    %191 = vector.extract_strided_slice %119 {offsets = [6, 0], sizes = [2, 512], strides = [1, 1]} : vector<24x512xf32> to vector<2x512xf32>
    %cst_75 = arith.constant dense<0.000000e+00> : vector<2x512xf32>
    %192 = tpu.matmul %186, %9, %cst_75 {dimension_numbers = #tpu.dot_dimension_numbers<[1], [0], [0], [1], [0, 0, 1, 1], [], []>} : vector<2x80xf32>, vector<80x512xf32>, vector<2x512xf32> -> vector<2x512xf32>
    %193 = arith.addf %191, %192 : vector<2x512xf32>
    %194 = vector.extract_strided_slice %193 {offsets = [0, 0], sizes = [2, 384], strides = [1, 1]} : vector<2x512xf32> to vector<2x384xf32>
    %195 = arith.negf %194 : vector<2x384xf32>
    %196 = math.exp %195 : vector<2x384xf32>
    %cst_76 = arith.constant 1.000000e+00 : f32
    %197 = vector.broadcast %cst_76 : f32 to vector<2x384xf32>
    %198 = arith.addf %197, %196 : vector<2x384xf32>
    %199 = arith.divf %197, %198 : vector<2x384xf32>
    %200 = vector.extract_strided_slice %193 {offsets = [0, 384], sizes = [2, 80], strides = [1, 1]} : vector<2x512xf32> to vector<2x80xf32>
    %201 = math.tanh %200 : vector<2x80xf32>
    %202 = vector.extract_strided_slice %199 {offsets = [0, 128], sizes = [2, 80], strides = [1, 1]} : vector<2x384xf32> to vector<2x80xf32>
    %203 = arith.mulf %202, %183 : vector<2x80xf32>
    %204 = vector.extract_strided_slice %199 {offsets = [0, 0], sizes = [2, 80], strides = [1, 1]} : vector<2x384xf32> to vector<2x80xf32>
    %205 = arith.mulf %204, %201 : vector<2x80xf32>
    %206 = arith.addf %203, %205 : vector<2x80xf32>
    %207 = vector.extract_strided_slice %199 {offsets = [0, 256], sizes = [2, 80], strides = [1, 1]} : vector<2x384xf32> to vector<2x80xf32>
    %208 = math.tanh %206 : vector<2x80xf32>
    %209 = arith.mulf %207, %208 : vector<2x80xf32>
    %210 = vector.extract_strided_slice %209 {offsets = [0, 0], sizes = [2, 40], strides = [1, 1]} : vector<2x80xf32> to vector<2x40xf32>
    %c6_77 = arith.constant 6 : index
    %c0_78 = arith.constant 0 : index
    %211 = vector.load %arg7[%c6_77, %c0_78] : memref<24x80xf32, #tpu.memory_space<vmem>>, vector<2x40xf32>
    tpu.vector_store %arg7[%c6_77, %c0_78], %210 {strides = array<i32>} : memref<24x80xf32, #tpu.memory_space<vmem>>, vector<2x40xf32>,
    %212 = vector.extract_strided_slice %209 {offsets = [0, 40], sizes = [2, 40], strides = [1, 1]} : vector<2x80xf32> to vector<2x40xf32>
    %c16_79 = arith.constant 16 : index
    %c40_80 = arith.constant 40 : index
    %213 = vector.load %arg7[%c16_79, %c40_80] : memref<24x80xf32, #tpu.memory_space<vmem>>, vector<2x40xf32>
    tpu.vector_store %arg7[%c16_79, %c40_80], %212 {strides = array<i32>} : memref<24x80xf32, #tpu.memory_space<vmem>>, vector<2x40xf32>,
    %214 = vector.extract_strided_slice %119 {offsets = [8, 0], sizes = [2, 512], strides = [1, 1]} : vector<24x512xf32> to vector<2x512xf32>
    %cst_81 = arith.constant dense<0.000000e+00> : vector<2x512xf32>
    %215 = tpu.matmul %209, %9, %cst_81 {dimension_numbers = #tpu.dot_dimension_numbers<[1], [0], [0], [1], [0, 0, 1, 1], [], []>} : vector<2x80xf32>, vector<80x512xf32>, vector<2x512xf32> -> vector<2x512xf32>
    %216 = arith.addf %214, %215 : vector<2x512xf32>
    %217 = vector.extract_strided_slice %216 {offsets = [0, 0], sizes = [2, 384], strides = [1, 1]} : vector<2x512xf32> to vector<2x384xf32>
    %218 = arith.negf %217 : vector<2x384xf32>
    %219 = math.exp %218 : vector<2x384xf32>
    %cst_82 = arith.constant 1.000000e+00 : f32
    %220 = vector.broadcast %cst_82 : f32 to vector<2x384xf32>
    %221 = arith.addf %220, %219 : vector<2x384xf32>
    %222 = arith.divf %220, %221 : vector<2x384xf32>
    %223 = vector.extract_strided_slice %216 {offsets = [0, 384], sizes = [2, 80], strides = [1, 1]} : vector<2x512xf32> to vector<2x80xf32>
    %224 = math.tanh %223 : vector<2x80xf32>
    %225 = vector.extract_strided_slice %222 {offsets = [0, 128], sizes = [2, 80], strides = [1, 1]} : vector<2x384xf32> to vector<2x80xf32>
    %226 = arith.mulf %225, %206 : vector<2x80xf32>
    %227 = vector.extract_strided_slice %222 {offsets = [0, 0], sizes = [2, 80], strides = [1, 1]} : vector<2x384xf32> to vector<2x80xf32>
    %228 = arith.mulf %227, %224 : vector<2x80xf32>
    %229 = arith.addf %226, %228 : vector<2x80xf32>
    %230 = vector.extract_strided_slice %222 {offsets = [0, 256], sizes = [2, 80], strides = [1, 1]} : vector<2x384xf32> to vector<2x80xf32>
    %231 = math.tanh %229 : vector<2x80xf32>
    %232 = arith.mulf %230, %231 : vector<2x80xf32>
    %233 = vector.extract_strided_slice %232 {offsets = [0, 0], sizes = [2, 40], strides = [1, 1]} : vector<2x80xf32> to vector<2x40xf32>
    %c8_83 = arith.constant 8 : index
    %c0_84 = arith.constant 0 : index
    %234 = vector.load %arg7[%c8_83, %c0_84] : memref<24x80xf32, #tpu.memory_space<vmem>>, vector<2x40xf32>
    tpu.vector_store %arg7[%c8_83, %c0_84], %233 {strides = array<i32>} : memref<24x80xf32, #tpu.memory_space<vmem>>, vector<2x40xf32>,
    %235 = vector.extract_strided_slice %232 {offsets = [0, 40], sizes = [2, 40], strides = [1, 1]} : vector<2x80xf32> to vector<2x40xf32>
    %c14_85 = arith.constant 14 : index
    %c40_86 = arith.constant 40 : index
    %236 = vector.load %arg7[%c14_85, %c40_86] : memref<24x80xf32, #tpu.memory_space<vmem>>, vector<2x40xf32>
    tpu.vector_store %arg7[%c14_85, %c40_86], %235 {strides = array<i32>} : memref<24x80xf32, #tpu.memory_space<vmem>>, vector<2x40xf32>,
    %237 = vector.extract_strided_slice %119 {offsets = [10, 0], sizes = [2, 512], strides = [1, 1]} : vector<24x512xf32> to vector<2x512xf32>
    %cst_87 = arith.constant dense<0.000000e+00> : vector<2x512xf32>
    %238 = tpu.matmul %232, %9, %cst_87 {dimension_numbers = #tpu.dot_dimension_numbers<[1], [0], [0], [1], [0, 0, 1, 1], [], []>} : vector<2x80xf32>, vector<80x512xf32>, vector<2x512xf32> -> vector<2x512xf32>
    %239 = arith.addf %237, %238 : vector<2x512xf32>
    %240 = vector.extract_strided_slice %239 {offsets = [0, 0], sizes = [2, 384], strides = [1, 1]} : vector<2x512xf32> to vector<2x384xf32>
    %241 = arith.negf %240 : vector<2x384xf32>
    %242 = math.exp %241 : vector<2x384xf32>
    %cst_88 = arith.constant 1.000000e+00 : f32
    %243 = vector.broadcast %cst_88 : f32 to vector<2x384xf32>
    %244 = arith.addf %243, %242 : vector<2x384xf32>
    %245 = arith.divf %243, %244 : vector<2x384xf32>
    %246 = vector.extract_strided_slice %239 {offsets = [0, 384], sizes = [2, 80], strides = [1, 1]} : vector<2x512xf32> to vector<2x80xf32>
    %247 = math.tanh %246 : vector<2x80xf32>
    %248 = vector.extract_strided_slice %245 {offsets = [0, 128], sizes = [2, 80], strides = [1, 1]} : vector<2x384xf32> to vector<2x80xf32>
    %249 = arith.mulf %248, %229 : vector<2x80xf32>
    %250 = vector.extract_strided_slice %245 {offsets = [0, 0], sizes = [2, 80], strides = [1, 1]} : vector<2x384xf32> to vector<2x80xf32>
    %251 = arith.mulf %250, %247 : vector<2x80xf32>
    %252 = arith.addf %249, %251 : vector<2x80xf32>
    %253 = vector.extract_strided_slice %245 {offsets = [0, 256], sizes = [2, 80], strides = [1, 1]} : vector<2x384xf32> to vector<2x80xf32>
    %254 = math.tanh %252 : vector<2x80xf32>
    %255 = arith.mulf %253, %254 : vector<2x80xf32>
    %256 = vector.extract_strided_slice %255 {offsets = [0, 0], sizes = [2, 40], strides = [1, 1]} : vector<2x80xf32> to vector<2x40xf32>
    %c10_89 = arith.constant 10 : index
    %c0_90 = arith.constant 0 : index
    %257 = vector.load %arg7[%c10_89, %c0_90] : memref<24x80xf32, #tpu.memory_space<vmem>>, vector<2x40xf32>
    tpu.vector_store %arg7[%c10_89, %c0_90], %256 {strides = array<i32>} : memref<24x80xf32, #tpu.memory_space<vmem>>, vector<2x40xf32>,
    %258 = vector.extract_strided_slice %255 {offsets = [0, 40], sizes = [2, 40], strides = [1, 1]} : vector<2x80xf32> to vector<2x40xf32>
    %c12_91 = arith.constant 12 : index
    %c40_92 = arith.constant 40 : index
    %259 = vector.load %arg7[%c12_91, %c40_92] : memref<24x80xf32, #tpu.memory_space<vmem>>, vector<2x40xf32>
    tpu.vector_store %arg7[%c12_91, %c40_92], %258 {strides = array<i32>} : memref<24x80xf32, #tpu.memory_space<vmem>>, vector<2x40xf32>,
    %260 = vector.extract_strided_slice %119 {offsets = [12, 0], sizes = [2, 512], strides = [1, 1]} : vector<24x512xf32> to vector<2x512xf32>
    %cst_93 = arith.constant dense<0.000000e+00> : vector<2x512xf32>
    %261 = tpu.matmul %255, %9, %cst_93 {dimension_numbers = #tpu.dot_dimension_numbers<[1], [0], [0], [1], [0, 0, 1, 1], [], []>} : vector<2x80xf32>, vector<80x512xf32>, vector<2x512xf32> -> vector<2x512xf32>
    %262 = arith.addf %260, %261 : vector<2x512xf32>
    %263 = vector.extract_strided_slice %262 {offsets = [0, 0], sizes = [2, 384], strides = [1, 1]} : vector<2x512xf32> to vector<2x384xf32>
    %264 = arith.negf %263 : vector<2x384xf32>
    %265 = math.exp %264 : vector<2x384xf32>
    %cst_94 = arith.constant 1.000000e+00 : f32
    %266 = vector.broadcast %cst_94 : f32 to vector<2x384xf32>
    %267 = arith.addf %266, %265 : vector<2x384xf32>
    %268 = arith.divf %266, %267 : vector<2x384xf32>
    %269 = vector.extract_strided_slice %262 {offsets = [0, 384], sizes = [2, 80], strides = [1, 1]} : vector<2x512xf32> to vector<2x80xf32>
    %270 = math.tanh %269 : vector<2x80xf32>
    %271 = vector.extract_strided_slice %268 {offsets = [0, 128], sizes = [2, 80], strides = [1, 1]} : vector<2x384xf32> to vector<2x80xf32>
    %272 = arith.mulf %271, %252 : vector<2x80xf32>
    %273 = vector.extract_strided_slice %268 {offsets = [0, 0], sizes = [2, 80], strides = [1, 1]} : vector<2x384xf32> to vector<2x80xf32>
    %274 = arith.mulf %273, %270 : vector<2x80xf32>
    %275 = arith.addf %272, %274 : vector<2x80xf32>
    %276 = vector.extract_strided_slice %268 {offsets = [0, 256], sizes = [2, 80], strides = [1, 1]} : vector<2x384xf32> to vector<2x80xf32>
    %277 = math.tanh %275 : vector<2x80xf32>
    %278 = arith.mulf %276, %277 : vector<2x80xf32>
    %279 = vector.extract_strided_slice %278 {offsets = [0, 0], sizes = [2, 40], strides = [1, 1]} : vector<2x80xf32> to vector<2x40xf32>
    %c12_95 = arith.constant 12 : index
    %c0_96 = arith.constant 0 : index
    %280 = vector.load %arg7[%c12_95, %c0_96] : memref<24x80xf32, #tpu.memory_space<vmem>>, vector<2x40xf32>
    tpu.vector_store %arg7[%c12_95, %c0_96], %279 {strides = array<i32>} : memref<24x80xf32, #tpu.memory_space<vmem>>, vector<2x40xf32>,
    %281 = vector.extract_strided_slice %278 {offsets = [0, 40], sizes = [2, 40], strides = [1, 1]} : vector<2x80xf32> to vector<2x40xf32>
    %c10_97 = arith.constant 10 : index
    %c40_98 = arith.constant 40 : index
    %282 = vector.load %arg7[%c10_97, %c40_98] : memref<24x80xf32, #tpu.memory_space<vmem>>, vector<2x40xf32>
    tpu.vector_store %arg7[%c10_97, %c40_98], %281 {strides = array<i32>} : memref<24x80xf32, #tpu.memory_space<vmem>>, vector<2x40xf32>,
    %283 = vector.extract_strided_slice %119 {offsets = [14, 0], sizes = [2, 512], strides = [1, 1]} : vector<24x512xf32> to vector<2x512xf32>
    %cst_99 = arith.constant dense<0.000000e+00> : vector<2x512xf32>
    %284 = tpu.matmul %278, %9, %cst_99 {dimension_numbers = #tpu.dot_dimension_numbers<[1], [0], [0], [1], [0, 0, 1, 1], [], []>} : vector<2x80xf32>, vector<80x512xf32>, vector<2x512xf32> -> vector<2x512xf32>
    %285 = arith.addf %283, %284 : vector<2x512xf32>
    %286 = vector.extract_strided_slice %285 {offsets = [0, 0], sizes = [2, 384], strides = [1, 1]} : vector<2x512xf32> to vector<2x384xf32>
    %287 = arith.negf %286 : vector<2x384xf32>
    %288 = math.exp %287 : vector<2x384xf32>
    %cst_100 = arith.constant 1.000000e+00 : f32
    %289 = vector.broadcast %cst_100 : f32 to vector<2x384xf32>
    %290 = arith.addf %289, %288 : vector<2x384xf32>
    %291 = arith.divf %289, %290 : vector<2x384xf32>
    %292 = vector.extract_strided_slice %285 {offsets = [0, 384], sizes = [2, 80], strides = [1, 1]} : vector<2x512xf32> to vector<2x80xf32>
    %293 = math.tanh %292 : vector<2x80xf32>
    %294 = vector.extract_strided_slice %291 {offsets = [0, 128], sizes = [2, 80], strides = [1, 1]} : vector<2x384xf32> to vector<2x80xf32>
    %295 = arith.mulf %294, %275 : vector<2x80xf32>
    %296 = vector.extract_strided_slice %291 {offsets = [0, 0], sizes = [2, 80], strides = [1, 1]} : vector<2x384xf32> to vector<2x80xf32>
    %297 = arith.mulf %296, %293 : vector<2x80xf32>
    %298 = arith.addf %295, %297 : vector<2x80xf32>
    %299 = vector.extract_strided_slice %291 {offsets = [0, 256], sizes = [2, 80], strides = [1, 1]} : vector<2x384xf32> to vector<2x80xf32>
    %300 = math.tanh %298 : vector<2x80xf32>
    %301 = arith.mulf %299, %300 : vector<2x80xf32>
    %302 = vector.extract_strided_slice %301 {offsets = [0, 0], sizes = [2, 40], strides = [1, 1]} : vector<2x80xf32> to vector<2x40xf32>
    %c14_101 = arith.constant 14 : index
    %c0_102 = arith.constant 0 : index
    %303 = vector.load %arg7[%c14_101, %c0_102] : memref<24x80xf32, #tpu.memory_space<vmem>>, vector<2x40xf32>
    tpu.vector_store %arg7[%c14_101, %c0_102], %302 {strides = array<i32>} : memref<24x80xf32, #tpu.memory_space<vmem>>, vector<2x40xf32>,
    %304 = vector.extract_strided_slice %301 {offsets = [0, 40], sizes = [2, 40], strides = [1, 1]} : vector<2x80xf32> to vector<2x40xf32>
    %c8_103 = arith.constant 8 : index
    %c40_104 = arith.constant 40 : index
    %305 = vector.load %arg7[%c8_103, %c40_104] : memref<24x80xf32, #tpu.memory_space<vmem>>, vector<2x40xf32>
    tpu.vector_store %arg7[%c8_103, %c40_104], %304 {strides = array<i32>} : memref<24x80xf32, #tpu.memory_space<vmem>>, vector<2x40xf32>,
    %306 = vector.extract_strided_slice %119 {offsets = [16, 0], sizes = [2, 512], strides = [1, 1]} : vector<24x512xf32> to vector<2x512xf32>
    %cst_105 = arith.constant dense<0.000000e+00> : vector<2x512xf32>
    %307 = tpu.matmul %301, %9, %cst_105 {dimension_numbers = #tpu.dot_dimension_numbers<[1], [0], [0], [1], [0, 0, 1, 1], [], []>} : vector<2x80xf32>, vector<80x512xf32>, vector<2x512xf32> -> vector<2x512xf32>
    %308 = arith.addf %306, %307 : vector<2x512xf32>
    %309 = vector.extract_strided_slice %308 {offsets = [0, 0], sizes = [2, 384], strides = [1, 1]} : vector<2x512xf32> to vector<2x384xf32>
    %310 = arith.negf %309 : vector<2x384xf32>
    %311 = math.exp %310 : vector<2x384xf32>
    %cst_106 = arith.constant 1.000000e+00 : f32
    %312 = vector.broadcast %cst_106 : f32 to vector<2x384xf32>
    %313 = arith.addf %312, %311 : vector<2x384xf32>
    %314 = arith.divf %312, %313 : vector<2x384xf32>
    %315 = vector.extract_strided_slice %308 {offsets = [0, 384], sizes = [2, 80], strides = [1, 1]} : vector<2x512xf32> to vector<2x80xf32>
    %316 = math.tanh %315 : vector<2x80xf32>
    %317 = vector.extract_strided_slice %314 {offsets = [0, 128], sizes = [2, 80], strides = [1, 1]} : vector<2x384xf32> to vector<2x80xf32>
    %318 = arith.mulf %317, %298 : vector<2x80xf32>
    %319 = vector.extract_strided_slice %314 {offsets = [0, 0], sizes = [2, 80], strides = [1, 1]} : vector<2x384xf32> to vector<2x80xf32>
    %320 = arith.mulf %319, %316 : vector<2x80xf32>
    %321 = arith.addf %318, %320 : vector<2x80xf32>
    %322 = vector.extract_strided_slice %314 {offsets = [0, 256], sizes = [2, 80], strides = [1, 1]} : vector<2x384xf32> to vector<2x80xf32>
    %323 = math.tanh %321 : vector<2x80xf32>
    %324 = arith.mulf %322, %323 : vector<2x80xf32>
    %325 = vector.extract_strided_slice %324 {offsets = [0, 0], sizes = [2, 40], strides = [1, 1]} : vector<2x80xf32> to vector<2x40xf32>
    %c16_107 = arith.constant 16 : index
    %c0_108 = arith.constant 0 : index
    %326 = vector.load %arg7[%c16_107, %c0_108] : memref<24x80xf32, #tpu.memory_space<vmem>>, vector<2x40xf32>
    tpu.vector_store %arg7[%c16_107, %c0_108], %325 {strides = array<i32>} : memref<24x80xf32, #tpu.memory_space<vmem>>, vector<2x40xf32>,
    %327 = vector.extract_strided_slice %324 {offsets = [0, 40], sizes = [2, 40], strides = [1, 1]} : vector<2x80xf32> to vector<2x40xf32>
    %c6_109 = arith.constant 6 : index
    %c40_110 = arith.constant 40 : index
    %328 = vector.load %arg7[%c6_109, %c40_110] : memref<24x80xf32, #tpu.memory_space<vmem>>, vector<2x40xf32>
    tpu.vector_store %arg7[%c6_109, %c40_110], %327 {strides = array<i32>} : memref<24x80xf32, #tpu.memory_space<vmem>>, vector<2x40xf32>,
    %329 = vector.extract_strided_slice %119 {offsets = [18, 0], sizes = [2, 512], strides = [1, 1]} : vector<24x512xf32> to vector<2x512xf32>
    %cst_111 = arith.constant dense<0.000000e+00> : vector<2x512xf32>
    %330 = tpu.matmul %324, %9, %cst_111 {dimension_numbers = #tpu.dot_dimension_numbers<[1], [0], [0], [1], [0, 0, 1, 1], [], []>} : vector<2x80xf32>, vector<80x512xf32>, vector<2x512xf32> -> vector<2x512xf32>
    %331 = arith.addf %329, %330 : vector<2x512xf32>
    %332 = vector.extract_strided_slice %331 {offsets = [0, 0], sizes = [2, 384], strides = [1, 1]} : vector<2x512xf32> to vector<2x384xf32>
    %333 = arith.negf %332 : vector<2x384xf32>
    %334 = math.exp %333 : vector<2x384xf32>
    %cst_112 = arith.constant 1.000000e+00 : f32
    %335 = vector.broadcast %cst_112 : f32 to vector<2x384xf32>
    %336 = arith.addf %335, %334 : vector<2x384xf32>
    %337 = arith.divf %335, %336 : vector<2x384xf32>
    %338 = vector.extract_strided_slice %331 {offsets = [0, 384], sizes = [2, 80], strides = [1, 1]} : vector<2x512xf32> to vector<2x80xf32>
    %339 = math.tanh %338 : vector<2x80xf32>
    %340 = vector.extract_strided_slice %337 {offsets = [0, 128], sizes = [2, 80], strides = [1, 1]} : vector<2x384xf32> to vector<2x80xf32>
    %341 = arith.mulf %340, %321 : vector<2x80xf32>
    %342 = vector.extract_strided_slice %337 {offsets = [0, 0], sizes = [2, 80], strides = [1, 1]} : vector<2x384xf32> to vector<2x80xf32>
    %343 = arith.mulf %342, %339 : vector<2x80xf32>
    %344 = arith.addf %341, %343 : vector<2x80xf32>
    %345 = vector.extract_strided_slice %337 {offsets = [0, 256], sizes = [2, 80], strides = [1, 1]} : vector<2x384xf32> to vector<2x80xf32>
    %346 = math.tanh %344 : vector<2x80xf32>
    %347 = arith.mulf %345, %346 : vector<2x80xf32>
    %348 = vector.extract_strided_slice %347 {offsets = [0, 0], sizes = [2, 40], strides = [1, 1]} : vector<2x80xf32> to vector<2x40xf32>
    %c18_113 = arith.constant 18 : index
    %c0_114 = arith.constant 0 : index
    %349 = vector.load %arg7[%c18_113, %c0_114] : memref<24x80xf32, #tpu.memory_space<vmem>>, vector<2x40xf32>
    tpu.vector_store %arg7[%c18_113, %c0_114], %348 {strides = array<i32>} : memref<24x80xf32, #tpu.memory_space<vmem>>, vector<2x40xf32>,
    %350 = vector.extract_strided_slice %347 {offsets = [0, 40], sizes = [2, 40], strides = [1, 1]} : vector<2x80xf32> to vector<2x40xf32>
    %c4_115 = arith.constant 4 : index
    %c40_116 = arith.constant 40 : index
    %351 = vector.load %arg7[%c4_115, %c40_116] : memref<24x80xf32, #tpu.memory_space<vmem>>, vector<2x40xf32>
    tpu.vector_store %arg7[%c4_115, %c40_116], %350 {strides = array<i32>} : memref<24x80xf32, #tpu.memory_space<vmem>>, vector<2x40xf32>,
    %352 = vector.extract_strided_slice %119 {offsets = [20, 0], sizes = [2, 512], strides = [1, 1]} : vector<24x512xf32> to vector<2x512xf32>
    %cst_117 = arith.constant dense<0.000000e+00> : vector<2x512xf32>
    %353 = tpu.matmul %347, %9, %cst_117 {dimension_numbers = #tpu.dot_dimension_numbers<[1], [0], [0], [1], [0, 0, 1, 1], [], []>} : vector<2x80xf32>, vector<80x512xf32>, vector<2x512xf32> -> vector<2x512xf32>
    %354 = arith.addf %352, %353 : vector<2x512xf32>
    %355 = vector.extract_strided_slice %354 {offsets = [0, 0], sizes = [2, 384], strides = [1, 1]} : vector<2x512xf32> to vector<2x384xf32>
    %356 = arith.negf %355 : vector<2x384xf32>
    %357 = math.exp %356 : vector<2x384xf32>
    %cst_118 = arith.constant 1.000000e+00 : f32
    %358 = vector.broadcast %cst_118 : f32 to vector<2x384xf32>
    %359 = arith.addf %358, %357 : vector<2x384xf32>
    %360 = arith.divf %358, %359 : vector<2x384xf32>
    %361 = vector.extract_strided_slice %354 {offsets = [0, 384], sizes = [2, 80], strides = [1, 1]} : vector<2x512xf32> to vector<2x80xf32>
    %362 = math.tanh %361 : vector<2x80xf32>
    %363 = vector.extract_strided_slice %360 {offsets = [0, 128], sizes = [2, 80], strides = [1, 1]} : vector<2x384xf32> to vector<2x80xf32>
    %364 = arith.mulf %363, %344 : vector<2x80xf32>
    %365 = vector.extract_strided_slice %360 {offsets = [0, 0], sizes = [2, 80], strides = [1, 1]} : vector<2x384xf32> to vector<2x80xf32>
    %366 = arith.mulf %365, %362 : vector<2x80xf32>
    %367 = arith.addf %364, %366 : vector<2x80xf32>
    %368 = vector.extract_strided_slice %360 {offsets = [0, 256], sizes = [2, 80], strides = [1, 1]} : vector<2x384xf32> to vector<2x80xf32>
    %369 = math.tanh %367 : vector<2x80xf32>
    %370 = arith.mulf %368, %369 : vector<2x80xf32>
    %371 = vector.extract_strided_slice %370 {offsets = [0, 0], sizes = [2, 40], strides = [1, 1]} : vector<2x80xf32> to vector<2x40xf32>
    %c20_119 = arith.constant 20 : index
    %c0_120 = arith.constant 0 : index
    %372 = vector.load %arg7[%c20_119, %c0_120] : memref<24x80xf32, #tpu.memory_space<vmem>>, vector<2x40xf32>
    tpu.vector_store %arg7[%c20_119, %c0_120], %371 {strides = array<i32>} : memref<24x80xf32, #tpu.memory_space<vmem>>, vector<2x40xf32>,
    %373 = vector.extract_strided_slice %370 {offsets = [0, 40], sizes = [2, 40], strides = [1, 1]} : vector<2x80xf32> to vector<2x40xf32>
    %c2_121 = arith.constant 2 : index
    %c40_122 = arith.constant 40 : index
    %374 = vector.load %arg7[%c2_121, %c40_122] : memref<24x80xf32, #tpu.memory_space<vmem>>, vector<2x40xf32>
    tpu.vector_store %arg7[%c2_121, %c40_122], %373 {strides = array<i32>} : memref<24x80xf32, #tpu.memory_space<vmem>>, vector<2x40xf32>,
    %375 = vector.extract_strided_slice %119 {offsets = [22, 0], sizes = [2, 512], strides = [1, 1]} : vector<24x512xf32> to vector<2x512xf32>
    %cst_123 = arith.constant dense<0.000000e+00> : vector<2x512xf32>
    %376 = tpu.matmul %370, %9, %cst_123 {dimension_numbers = #tpu.dot_dimension_numbers<[1], [0], [0], [1], [0, 0, 1, 1], [], []>} : vector<2x80xf32>, vector<80x512xf32>, vector<2x512xf32> -> vector<2x512xf32>
    %377 = arith.addf %375, %376 : vector<2x512xf32>
    %378 = vector.extract_strided_slice %377 {offsets = [0, 0], sizes = [2, 384], strides = [1, 1]} : vector<2x512xf32> to vector<2x384xf32>
    %379 = arith.negf %378 : vector<2x384xf32>
    %380 = math.exp %379 : vector<2x384xf32>
    %cst_124 = arith.constant 1.000000e+00 : f32
    %381 = vector.broadcast %cst_124 : f32 to vector<2x384xf32>
    %382 = arith.addf %381, %380 : vector<2x384xf32>
    %383 = arith.divf %381, %382 : vector<2x384xf32>
    %384 = vector.extract_strided_slice %377 {offsets = [0, 384], sizes = [2, 80], strides = [1, 1]} : vector<2x512xf32> to vector<2x80xf32>
    %385 = math.tanh %384 : vector<2x80xf32>
    %386 = vector.extract_strided_slice %383 {offsets = [0, 128], sizes = [2, 80], strides = [1, 1]} : vector<2x384xf32> to vector<2x80xf32>
    %387 = arith.mulf %386, %367 : vector<2x80xf32>
    %388 = vector.extract_strided_slice %383 {offsets = [0, 0], sizes = [2, 80], strides = [1, 1]} : vector<2x384xf32> to vector<2x80xf32>
    %389 = arith.mulf %388, %385 : vector<2x80xf32>
    %390 = arith.addf %387, %389 : vector<2x80xf32>
    %391 = vector.extract_strided_slice %383 {offsets = [0, 256], sizes = [2, 80], strides = [1, 1]} : vector<2x384xf32> to vector<2x80xf32>
    %392 = math.tanh %390 : vector<2x80xf32>
    %393 = arith.mulf %391, %392 : vector<2x80xf32>
    %394 = vector.extract_strided_slice %393 {offsets = [0, 0], sizes = [2, 40], strides = [1, 1]} : vector<2x80xf32> to vector<2x40xf32>
    %c22_125 = arith.constant 22 : index
    %c0_126 = arith.constant 0 : index
    %395 = vector.load %arg7[%c22_125, %c0_126] : memref<24x80xf32, #tpu.memory_space<vmem>>, vector<2x40xf32>
    tpu.vector_store %arg7[%c22_125, %c0_126], %394 {strides = array<i32>} : memref<24x80xf32, #tpu.memory_space<vmem>>, vector<2x40xf32>,
    %396 = vector.extract_strided_slice %393 {offsets = [0, 40], sizes = [2, 40], strides = [1, 1]} : vector<2x80xf32> to vector<2x40xf32>
    %c0_127 = arith.constant 0 : index
    %c40_128 = arith.constant 40 : index
    %397 = vector.load %arg7[%c0_127, %c40_128] : memref<24x80xf32, #tpu.memory_space<vmem>>, vector<2x40xf32>
    tpu.vector_store %arg7[%c0_127, %c40_128], %396 {strides = array<i32>} : memref<24x80xf32, #tpu.memory_space<vmem>>, vector<2x40xf32>,
    %c0_129 = arith.constant 0 : index
    %c0_130 = arith.constant 0 : index
    %398 = vector.load %arg7[%c0_129, %c0_130] : memref<24x80xf32, #tpu.memory_space<vmem>>, vector<24x80xf32>
    %cst_131 = arith.constant dense<0.000000e+00> : vector<24x16xf32>
    %399 = tpu.matmul %398, %5, %cst_131 {dimension_numbers = #tpu.dot_dimension_numbers<[1], [0], [0], [1], [0, 0, 1, 1], [], []>} : vector<24x80xf32>, vector<80x16xf32>, vector<24x16xf32> -> vector<24x16xf32>
    %400 = vector.broadcast %6 : vector<1x16xf32> to vector<24x16xf32>
    %401 = arith.addf %399, %400 : vector<24x16xf32>
    %402 = math.tanh %401 : vector<24x16xf32>
    %403 = vector.broadcast %7 : vector<1x16xf32> to vector<24x16xf32>
    %404 = arith.mulf %402, %403 : vector<24x16xf32>
    %cst_132 = arith.constant dense<0.000000e+00> : vector<24xf32>
    %405 = vector.multi_reduction <add>, %404, %cst_132 [1] : vector<24x16xf32> to vector<24xf32>
    %406 = vector.shape_cast %405 : vector<24xf32> to vector<24x1xf32>
    %407 = vector.extract_strided_slice %406 {offsets = [0, 0], sizes = [2, 1], strides = [1, 1]} : vector<24x1xf32> to vector<2x1xf32>
    %408 = vector.extract_strided_slice %406 {offsets = [2, 0], sizes = [2, 1], strides = [1, 1]} : vector<24x1xf32> to vector<2x1xf32>
    %409 = vector.extract_strided_slice %406 {offsets = [4, 0], sizes = [2, 1], strides = [1, 1]} : vector<24x1xf32> to vector<2x1xf32>
    %410 = vector.extract_strided_slice %406 {offsets = [6, 0], sizes = [2, 1], strides = [1, 1]} : vector<24x1xf32> to vector<2x1xf32>
    %411 = vector.extract_strided_slice %406 {offsets = [8, 0], sizes = [2, 1], strides = [1, 1]} : vector<24x1xf32> to vector<2x1xf32>
    %412 = vector.extract_strided_slice %406 {offsets = [10, 0], sizes = [2, 1], strides = [1, 1]} : vector<24x1xf32> to vector<2x1xf32>
    %413 = vector.extract_strided_slice %406 {offsets = [12, 0], sizes = [2, 1], strides = [1, 1]} : vector<24x1xf32> to vector<2x1xf32>
    %414 = vector.extract_strided_slice %406 {offsets = [14, 0], sizes = [2, 1], strides = [1, 1]} : vector<24x1xf32> to vector<2x1xf32>
    %415 = vector.extract_strided_slice %406 {offsets = [16, 0], sizes = [2, 1], strides = [1, 1]} : vector<24x1xf32> to vector<2x1xf32>
    %416 = vector.extract_strided_slice %406 {offsets = [18, 0], sizes = [2, 1], strides = [1, 1]} : vector<24x1xf32> to vector<2x1xf32>
    %417 = vector.extract_strided_slice %406 {offsets = [20, 0], sizes = [2, 1], strides = [1, 1]} : vector<24x1xf32> to vector<2x1xf32>
    %418 = vector.extract_strided_slice %406 {offsets = [22, 0], sizes = [2, 1], strides = [1, 1]} : vector<24x1xf32> to vector<2x1xf32>
    %419 = tpu.concatenate %407, %408, %409, %410, %411, %412, %413, %414, %415, %416, %417, %418 in 1 : vector<2x1xf32>, vector<2x1xf32>, vector<2x1xf32>, vector<2x1xf32>, vector<2x1xf32>, vector<2x1xf32>, vector<2x1xf32>, vector<2x1xf32>, vector<2x1xf32>, vector<2x1xf32>, vector<2x1xf32>, vector<2x1xf32> -> vector<2x12xf32>
    %cst_133 = arith.constant dense<0xFF800000> : vector<2xf32>
    %420 = vector.multi_reduction <maximumf>, %419, %cst_133 [1] : vector<2x12xf32> to vector<2xf32>
    %421 = vector.shape_cast %420 : vector<2xf32> to vector<2x1xf32>
    %422 = vector.broadcast %421 : vector<2x1xf32> to vector<2x12xf32>
    %423 = arith.subf %419, %422 : vector<2x12xf32>
    %424 = math.exp %423 : vector<2x12xf32>
    %cst_134 = arith.constant dense<0.000000e+00> : vector<2xf32>
    %425 = vector.multi_reduction <add>, %424, %cst_134 [1] : vector<2x12xf32> to vector<2xf32>
    %426 = vector.shape_cast %425 : vector<2xf32> to vector<2x1xf32>
    %427 = tpu.reciprocal %426 {approx = true} : vector<2x1xf32> -> vector<2x1xf32>
    %428 = vector.broadcast %427 : vector<2x1xf32> to vector<2x12xf32>
    %429 = arith.mulf %424, %428 : vector<2x12xf32>
    %c0_135 = arith.constant 0 : index
    %c0_136 = arith.constant 0 : index
    %430 = vector.load %arg5[%c0_135, %c0_136] : memref<2x12xf32, #tpu.memory_space<vmem>>, vector<2x12xf32>
    tpu.vector_store %arg5[%c0_135, %c0_136], %429 {strides = array<i32>} : memref<2x12xf32, #tpu.memory_space<vmem>>, vector<2x12xf32>,
    %431 = vector.extract_strided_slice %424 {offsets = [0, 0], sizes = [2, 1], strides = [1, 1]} : vector<2x12xf32> to vector<2x1xf32>
    %432 = vector.extract_strided_slice %398 {offsets = [0, 0], sizes = [2, 80], strides = [1, 1]} : vector<24x80xf32> to vector<2x80xf32>
    %433 = vector.broadcast %431 : vector<2x1xf32> to vector<2x80xf32>
    %434 = arith.mulf %433, %432 : vector<2x80xf32>
    %435 = vector.extract_strided_slice %424 {offsets = [0, 1], sizes = [2, 1], strides = [1, 1]} : vector<2x12xf32> to vector<2x1xf32>
    %436 = vector.extract_strided_slice %398 {offsets = [2, 0], sizes = [2, 80], strides = [1, 1]} : vector<24x80xf32> to vector<2x80xf32>
    %437 = vector.broadcast %435 : vector<2x1xf32> to vector<2x80xf32>
    %438 = arith.mulf %437, %436 : vector<2x80xf32>
    %439 = vector.extract_strided_slice %424 {offsets = [0, 2], sizes = [2, 1], strides = [1, 1]} : vector<2x12xf32> to vector<2x1xf32>
    %440 = vector.extract_strided_slice %398 {offsets = [4, 0], sizes = [2, 80], strides = [1, 1]} : vector<24x80xf32> to vector<2x80xf32>
    %441 = vector.broadcast %439 : vector<2x1xf32> to vector<2x80xf32>
    %442 = arith.mulf %441, %440 : vector<2x80xf32>
    %443 = vector.extract_strided_slice %424 {offsets = [0, 3], sizes = [2, 1], strides = [1, 1]} : vector<2x12xf32> to vector<2x1xf32>
    %444 = vector.extract_strided_slice %398 {offsets = [6, 0], sizes = [2, 80], strides = [1, 1]} : vector<24x80xf32> to vector<2x80xf32>
    %445 = vector.broadcast %443 : vector<2x1xf32> to vector<2x80xf32>
    %446 = arith.mulf %445, %444 : vector<2x80xf32>
    %447 = vector.extract_strided_slice %424 {offsets = [0, 4], sizes = [2, 1], strides = [1, 1]} : vector<2x12xf32> to vector<2x1xf32>
    %448 = vector.extract_strided_slice %398 {offsets = [8, 0], sizes = [2, 80], strides = [1, 1]} : vector<24x80xf32> to vector<2x80xf32>
    %449 = vector.broadcast %447 : vector<2x1xf32> to vector<2x80xf32>
    %450 = arith.mulf %449, %448 : vector<2x80xf32>
    %451 = vector.extract_strided_slice %424 {offsets = [0, 5], sizes = [2, 1], strides = [1, 1]} : vector<2x12xf32> to vector<2x1xf32>
    %452 = vector.extract_strided_slice %398 {offsets = [10, 0], sizes = [2, 80], strides = [1, 1]} : vector<24x80xf32> to vector<2x80xf32>
    %453 = vector.broadcast %451 : vector<2x1xf32> to vector<2x80xf32>
    %454 = arith.mulf %453, %452 : vector<2x80xf32>
    %455 = vector.extract_strided_slice %424 {offsets = [0, 6], sizes = [2, 1], strides = [1, 1]} : vector<2x12xf32> to vector<2x1xf32>
    %456 = vector.extract_strided_slice %398 {offsets = [12, 0], sizes = [2, 80], strides = [1, 1]} : vector<24x80xf32> to vector<2x80xf32>
    %457 = vector.broadcast %455 : vector<2x1xf32> to vector<2x80xf32>
    %458 = arith.mulf %457, %456 : vector<2x80xf32>
    %459 = vector.extract_strided_slice %424 {offsets = [0, 7], sizes = [2, 1], strides = [1, 1]} : vector<2x12xf32> to vector<2x1xf32>
    %460 = vector.extract_strided_slice %398 {offsets = [14, 0], sizes = [2, 80], strides = [1, 1]} : vector<24x80xf32> to vector<2x80xf32>
    %461 = vector.broadcast %459 : vector<2x1xf32> to vector<2x80xf32>
    %462 = arith.mulf %461, %460 : vector<2x80xf32>
    %463 = vector.extract_strided_slice %424 {offsets = [0, 8], sizes = [2, 1], strides = [1, 1]} : vector<2x12xf32> to vector<2x1xf32>
    %464 = vector.extract_strided_slice %398 {offsets = [16, 0], sizes = [2, 80], strides = [1, 1]} : vector<24x80xf32> to vector<2x80xf32>
    %465 = vector.broadcast %463 : vector<2x1xf32> to vector<2x80xf32>
    %466 = arith.mulf %465, %464 : vector<2x80xf32>
    %467 = vector.extract_strided_slice %424 {offsets = [0, 9], sizes = [2, 1], strides = [1, 1]} : vector<2x12xf32> to vector<2x1xf32>
    %468 = vector.extract_strided_slice %398 {offsets = [18, 0], sizes = [2, 80], strides = [1, 1]} : vector<24x80xf32> to vector<2x80xf32>
    %469 = vector.broadcast %467 : vector<2x1xf32> to vector<2x80xf32>
    %470 = arith.mulf %469, %468 : vector<2x80xf32>
    %471 = vector.extract_strided_slice %424 {offsets = [0, 10], sizes = [2, 1], strides = [1, 1]} : vector<2x12xf32> to vector<2x1xf32>
    %472 = vector.extract_strided_slice %398 {offsets = [20, 0], sizes = [2, 80], strides = [1, 1]} : vector<24x80xf32> to vector<2x80xf32>
    %473 = vector.broadcast %471 : vector<2x1xf32> to vector<2x80xf32>
    %474 = arith.mulf %473, %472 : vector<2x80xf32>
    %475 = vector.extract_strided_slice %424 {offsets = [0, 11], sizes = [2, 1], strides = [1, 1]} : vector<2x12xf32> to vector<2x1xf32>
    %476 = vector.extract_strided_slice %398 {offsets = [22, 0], sizes = [2, 80], strides = [1, 1]} : vector<24x80xf32> to vector<2x80xf32>
    %477 = vector.broadcast %475 : vector<2x1xf32> to vector<2x80xf32>
    %478 = arith.mulf %477, %476 : vector<2x80xf32>
    %479 = arith.addf %434, %438 : vector<2x80xf32>
    %480 = arith.addf %442, %446 : vector<2x80xf32>
    %481 = arith.addf %450, %454 : vector<2x80xf32>
    %482 = arith.addf %458, %462 : vector<2x80xf32>
    %483 = arith.addf %466, %470 : vector<2x80xf32>
    %484 = arith.addf %474, %478 : vector<2x80xf32>
    %485 = arith.addf %479, %480 : vector<2x80xf32>
    %486 = arith.addf %481, %482 : vector<2x80xf32>
    %487 = arith.addf %483, %484 : vector<2x80xf32>
    %488 = arith.addf %485, %486 : vector<2x80xf32>
    %489 = arith.addf %488, %487 : vector<2x80xf32>
    %490 = vector.broadcast %427 : vector<2x1xf32> to vector<2x80xf32>
    %491 = arith.mulf %489, %490 : vector<2x80xf32>
    %c0_137 = arith.constant 0 : index
    %c0_138 = arith.constant 0 : index
    %492 = vector.load %arg4[%c0_137, %c0_138] : memref<2x80xf32, #tpu.memory_space<vmem>>, vector<2x80xf32>
    tpu.vector_store %arg4[%c0_137, %c0_138], %491 {strides = array<i32>} : memref<2x80xf32, #tpu.memory_space<vmem>>, vector<2x80xf32>,
    return
  }
}

</mosaic_0001>

<bundles_post_ra>
// kernel: hm_crnn_forward.1
= control target key start
LH: loop header
LB: loop body
LE: loop exit
PB: predicated region body
PF: predicated region fallthrough
CT: control target
= control target key end

     0   :  { %11 = vsyncpa [#allocation5], 0  ;;  %v4234_v3 = vmov 0.0|0.0   ;;  %v4235_v6 = vmov 0.0   ;;  %vm4236_vm0 = vmmov 0   ;;  %s5310_s0 = inlined_call_operand.vmem [shape: f32[68,49], index: 0, kind: input, shape index: {}]   ;;  %s5311_s1 = inlined_call_operand.vmem [shape: f32[51,20], index: 1, kind: input, shape index: {}]   ;;  %s5312_s2 = inlined_call_operand.vmem [shape: f32[121,512], index: 2, kind: input, shape index: {}]   ;;  %s5313_s3 = inlined_call_operand.vmem [shape: f32[82,16], index: 3, kind: input, shape index: {}]   ;;  %s5314_s4 = inlined_call_operand.hbm [shape: f32[2,80], index: 4, kind: output, shape index: {0}]   ;;  %s5315_s5 = inlined_call_operand.hbm [shape: f32[2,12], index: 5, kind: output, shape index: {1}]  }
   0x1   :  { %v21_v0 = vld [vmem:[%s5311_s1] sm:$0xff]  ;;  %v22_v1 = vld [vmem:[%s5311_s1 + $0x8] sm:$0xff]  ;;  %v23_v2 = vld [vmem:[%s5311_s1 + $0x10] sm:$0xff]  ;;  %3431 = vmatprep.subr.bf16.mxu0 %v4234_v3  ;;  %601 = vmatprep.mubr.f32.mxu1 %v4235_v6 }
   0x2   :  { %v3432_v4 = vpack.c.bf16 %v22_v1, %v21_v0  ;;  %v24_v5 = vld [vmem:[%s5311_s1 + $0x18] sm:$0xff]  ;;  %3375 = vmatprep.mubr.msk.f32.mxu0 %vm4236_vm0, %v4235_v6  ;;  %v25_v8 = vld [vmem:[%s5311_s1 + $0x20] sm:$0xff]  ;;  %v26_v9 = vld [vmem:[%s5311_s1 + $0x28] sm:$0xff] }
   0x3   :  { %v3435_v7 = vpack.c.bf16 %v24_v5, %v23_v2 }
   0x4   :  { %3433 = vmatpush3.bf16.msra.mxu0 %v3432_v4 }
   0x5   :  { %3434 = vmatprep.subr.bf16.mxu0 %v4234_v3 }
   0x6   :  { %12 = vsyncpa [#allocation7], 0  ;;  %v3438_v10 = vpack.c.bf16 %v26_v9, %v25_v8  ;;  %v4310_v11 = vld [vmem:[%s5311_s1 + $0x30] sm:$0x7]  ;;  %vm138_vm1 = vcmask 1040384   ;;  %v101_v12 = vld [vmem:[%s5310_s0] sm:$0xff] }
   0x7   :  { %vm110_vm2 = vcmask 400384   ;;  %v102_v13 = vld [vmem:[%s5310_s0 + $0x8] sm:$0xff]  ;;  %v103_v14 = vld [vmem:[%s5310_s0 + $0x10] sm:$0xff]  ;;  %v104_v15 = vld [vmem:[%s5310_s0 + $0x18] sm:$0xff]  ;;  %vm252_vm3 = vcmask 162816   ;;  %vm268_vm4 = vcmask 158720  }
   0x8   :  { %3436 = vmatpush3.bf16.msra.mxu0 %v3435_v7  ;;  %v105_v16 = vld [vmem:[%s5310_s0 + $0x20] sm:$0xff]  ;;  %v106_v17 = vld [vmem:[%s5310_s0 + $0x28] sm:$0xff]  ;;  %v107_v18 = vld [vmem:[%s5310_s0 + $0x30] sm:$0xff]  ;;  %vm365_vm5 = vcmask 156672   ;;  %s4237_s27 = smov 20   ;;  %vm377_vm6 = vcmask 160772  }
   0x9   :  { %3437 = vmatprep.subr.bf16.mxu0 %v4234_v3  ;;  %v108_v19 = vld [vmem:[%s5310_s0 + $0x38] sm:$0xff]  ;;  %v109_v20 = vld [vmem:[%s5310_s0 + $0x40] sm:$0xf]  ;;  %vm417_vm7 = vcmask 162822   ;;  %vm389_vm8 = vcmask 158722   ;;  %vm371_vm9 = vcmask 320672  }
   0xa   :  { %vm395_vm10 = vcmask 322722   ;;  %vm423_vm11 = vcmask 326822   ;;  %vm383_vm12 = vcmask 324772   ;;  %vm527_vm13 = vcmask 326656   ;;  %s4251_s10 = smov [#allocation4]  }
   0xb   :  { %vm703_vm14 = vcmask 654336   ;;  %vm877_vm15 = vcmask 320512  }
   0xc   :  { %3439 = vmatpush3.bf16.msra.mxu0 %v3438_v10 }
   0xd   :  { %3373 = vmatprep.subr.mxu0 %v4235_v6 }
  0x10   :  { %3374 = vmatpush3.msk.msra.mxu0 %vm138_vm1, %v4310_v11  ;;  %vm879_vm1 = vcmask 648512  }
  0x11   :  { %3376 = vmatmul.mubr.msk.f32.vlgmr.msra.gmra.mrb[0].mxu0 %vm110_vm2, %v101_v12 }
  0x12   :  { %3378 = vmatprep.mubr.msk.f32.mxu0 %vm4236_vm0, %v4235_v6 }
  0x15   :  { %3379 = vmatmul.mubr.msk.f32.gmra.mrb[2].mxu0 %vm110_vm2, %v102_v13 }
  0x16   :  { %3381 = vmatprep.mubr.msk.f32.mxu0 %vm4236_vm0, %v4235_v6 }
  0x19   :  { %3382 = vmatmul.mubr.msk.f32.gmra.mrb[4].mxu0 %vm110_vm2, %v103_v14 }
  0x1a   :  { %3384 = vmatprep.mubr.msk.f32.mxu0 %vm4236_vm0, %v4235_v6 }
  0x1d   :  { %3385 = vmatmul.mubr.msk.f32.gmra.mrb[6].mxu0 %vm110_vm2, %v104_v15 }
  0x1e   :  { %3387 = vmatprep.mubr.msk.f32.mxu0 %vm4236_vm0, %v4235_v6 }
  0x21   :  { %3388 = vmatmul.mubr.msk.f32.gmra.mrb[8].mxu0 %vm110_vm2, %v105_v16 }
  0x22   :  { %3390 = vmatprep.mubr.msk.f32.mxu0 %vm4236_vm0, %v4235_v6 }
  0x25   :  { %3391 = vmatmul.mubr.msk.f32.gmra.mrb[10].mxu0 %vm110_vm2, %v106_v17 }
  0x26   :  { %3393 = vmatprep.mubr.msk.f32.mxu0 %vm4236_vm0, %v4235_v6 }
  0x29   :  { %3394 = vmatmul.mubr.msk.f32.gmra.mrb[12].mxu0 %vm110_vm2, %v107_v18 }
  0x2a   :  { %3396 = vmatprep.mubr.msk.f32.mxu0 %vm4236_vm0, %v4235_v6 }
  0x2d   :  { %3397 = vmatmul.mubr.msk.f32.gmra.mrb[14].mxu0 %vm110_vm2, %v108_v19 }
  0x2e   :  { %3399 = vmatprep.mubr.msk.f32.mxu0 %vm4236_vm0, %v4235_v6 }
  0x31   :  { %3400 = vmatmul.mubr.msk.f32.gmra.mrb[16].mxu0 %vm110_vm2, %v109_v20  ;;  %vm1069_vm2 = vcmask 322562  }
  0x32   :  { %842 = vmatprep.mubr.f32.mxu0 %v4235_v6 }
  0xe4   :  { %v4366_v21 = vpop.f32.mrb[0].mxu0 }
  0xe5   :  { %v3377_v22 = vpop.f32.mrb[1].mxu0  ;;  %v279_v23 = vmul.f32 %v4366_v21, %v4366_v21  ;;  %v253_v25 = vsel %vm252_vm3, %v4366_v21, 0.0 }
  0xe7   :  { %v288_v30 = vsel %vm252_vm3, %v279_v23, 0.0 }
  0xe8   :  { %v4370_v24 = vpop.f32.mrb[2].mxu0 }
  0xe9   :  { %v254_v26 = vsel %vm252_vm3, %v4370_v24, 0.0  ;;  %v280_v27 = vmul.f32 %v4370_v24, %v4370_v24  ;;  %v3380_v28 = vpop.f32.mrb[3].mxu0 }
  0xea   :  { %v255_v29 = vadd.f32 %v254_v26, %v253_v25 }
  0xeb   :  { %v289_v31 = vsel %vm252_vm3, %v280_v27, 0.0 }
  0xec   :  { %v290_v32 = vadd.f32 %v289_v31, %v288_v30  ;;  %v4380_v33 = vpop.f32.mrb[4].mxu0 }
  0xed   :  { %v256_v34 = vsel %vm252_vm3, %v4380_v33, 0.0  ;;  %v281_v35 = vmul.f32 %v4380_v33, %v4380_v33  ;;  %v3383_v36 = vpop.f32.mrb[5].mxu0 }
  0xee   :  { %v257_v37 = vadd.f32 %v256_v34, %v255_v29 }
  0xef   :  { %v291_v38 = vsel %vm252_vm3, %v281_v35, 0.0 }
  0xf0   :  { %v292_v39 = vadd.f32 %v291_v38, %v290_v32  ;;  %v4387_v40 = vpop.f32.mrb[6].mxu0 }
  0xf1   :  { %v258_v41 = vsel %vm252_vm3, %v4387_v40, 0.0  ;;  %v282_v42 = vmul.f32 %v4387_v40, %v4387_v40  ;;  %v3386_v43 = vpop.f32.mrb[7].mxu0 }
  0xf2   :  { %v259_v44 = vadd.f32 %v258_v41, %v257_v37 }
  0xf3   :  { %v293_v45 = vsel %vm252_vm3, %v282_v42, 0.0 }
  0xf4   :  { %v294_v46 = vadd.f32 %v293_v45, %v292_v39  ;;  %v4394_v47 = vpop.f32.mrb[8].mxu0 }
  0xf5   :  { %v260_v48 = vsel %vm252_vm3, %v4394_v47, 0.0  ;;  %v283_v49 = vmul.f32 %v4394_v47, %v4394_v47  ;;  %v3389_v50 = vpop.f32.mrb[9].mxu0 }
  0xf6   :  { %v261_v51 = vadd.f32 %v260_v48, %v259_v44 }
  0xf7   :  { %v295_v52 = vsel %vm252_vm3, %v283_v49, 0.0 }
  0xf8   :  { %v296_v53 = vadd.f32 %v295_v52, %v294_v46  ;;  %v4401_v54 = vpop.f32.mrb[10].mxu0 }
  0xf9   :  { %v262_v55 = vsel %vm252_vm3, %v4401_v54, 0.0  ;;  %v284_v56 = vmul.f32 %v4401_v54, %v4401_v54  ;;  %v3392_v57 = vpop.f32.mrb[11].mxu0 }
  0xfa   :  { %v263_v58 = vadd.f32 %v262_v55, %v261_v51  ;;  %v326_v51 = vlaneseq }
  0xfb   :  { %v297_v59 = vsel %vm252_vm3, %v284_v56, 0.0 }
  0xfc   :  { %v298_v60 = vadd.f32 %v297_v59, %v296_v53  ;;  %v238_v61 = vpop.f32.mrb[12].mxu0  ;;  %v4431_v52 = vshrl.u32 %v326_v51, 7 }
  0xfd   :  { %v264_v62 = vsel %vm252_vm3, %v238_v61, 0.0  ;;  %v285_v63 = vmul.f32 %v238_v61, %v238_v61  ;;  %v3395_v0 = vpop.f32.mrb[13].mxu0 }
  0xfe   :  { %v265_v1 = vadd.f32 %v264_v62, %v263_v58  ;;  %v4434_v53 = vsub.s32 1, %v4431_v52 }
  0xff   :  { %v299_v2 = vsel %vm252_vm3, %v285_v63, 0.0 }
 0x100   :  { %v300_v4 = vadd.f32 %v299_v2, %v298_v60  ;;  %v243_v5 = vpop.f32.mrb[14].mxu0 }
 0x101   :  { %v266_v7 = vsel %vm252_vm3, %v243_v5, 0.0  ;;  %v286_v8 = vmul.f32 %v243_v5, %v243_v5  ;;  %v3398_v9 = vpop.f32.mrb[15].mxu0 }
 0x102   :  { %v267_v10 = vadd.f32 %v266_v7, %v265_v1 }
 0x103   :  { %v301_v12 = vsel %vm252_vm3, %v286_v8, 0.0  ;;  %vm1071_vm3 = vcmask 650562  }
 0x104   :  { %v302_v13 = vadd.f32 %v301_v12, %v300_v4  ;;  %v248_v14 = vpop.f32.mrb[16].mxu0 }
 0x105   :  { %v269_v15 = vsel %vm268_vm4, %v248_v14, 0.0  ;;  %v287_v16 = vmul.f32 %v248_v14, %v248_v14  ;;  %v3401_v17 = vpop.f32.mrb[17].mxu0 }
 0x106   :  { %v270_v18 = vadd.f32 %v269_v15, %v267_v10 }
 0x107   :  { %v303_v19 = vsel %vm268_vm4, %v287_v16, 0.0  ;;  %vm1262_vm4 = vcmask 324612  }
 0x108   :  { %v271_v20 = vrot.slane %v270_v18, 4  ;;  %v304_v22 = vadd.f32 %v303_v19, %v302_v13 }
 0x10a   :  { %v272_v23 = vadd.f32 %v271_v20, %v270_v18  ;;  %v305_v25 = vrot.slane %v304_v22, 4 }
 0x10c   :  { %v273_v26 = vrot.slane %v272_v23, 2  ;;  %v306_v27 = vadd.f32 %v305_v25, %v304_v22 }
 0x10e   :  { %v274_v28 = vadd.f32 %v273_v26, %v272_v23  ;;  %v307_v29 = vrot.slane %v306_v27, 2 }
 0x110   :  { %v275_v30 = vrot.slane %v274_v28, 1  ;;  %v308_v31 = vadd.f32 %v307_v29, %v306_v27 }
 0x112   :  { %v276_v32 = vadd.f32 %v275_v30, %v274_v28  ;;  %v309_v34 = vrot.slane %v308_v31, 1 }
 0x114   :  { %v4412_v35 = vmul.f32 0.014705882, %v276_v32  ;;  %v310_v36 = vadd.f32 %v309_v34, %v308_v31 }
 0x116   :  { %v311_v37 = vmul.f32 0.014705882, %v310_v36  ;;  %v312_v38 = vmul.f32 %v4412_v35, %v4412_v35  ;;  %v325_v39 = vsub.f32 %v248_v14, %v4412_v35  ;;  %v317_v41 = vsub.f32 %v4366_v21, %v4412_v35  ;;  %v40_v36 = vld [vmem:[%s5312_s2 + $0x8] sm:$0xff] }
 0x117   :  { %v324_v42 = vsub.f32 %v243_v5, %v4412_v35  ;;  %v322_v43 = vsub.f32 %v4401_v54, %v4412_v35  ;;  %v323_v44 = vsub.f32 %v238_v61, %v4412_v35  ;;  %v320_v45 = vsub.f32 %v4387_v40, %v4412_v35 }
 0x118   :  { %v313_v46 = vsub.f32 %v311_v37, %v312_v38  ;;  %v321_v48 = vsub.f32 %v4394_v47, %v4412_v35  ;;  %v319_v49 = vsub.f32 %v4380_v33, %v4412_v35  ;;  %v318_v21 = vsub.f32 %v4370_v24, %v4412_v35  ;;  %v44_v37 = vld [vmem:[%s5312_s2 + $0x28] sm:$0xff]  ;;  %v51_v24 = vld [vmem:[%s5312_s2 + $0x60] sm:$0xff] }
 0x119   :  { %v341_v40 = vsub.s32 2, %v4431_v52 }
 0x11a   :  { %v314_v50 = vadd.f32 1e-05, %v313_v46 }
 0x11b   :  { %v4441_v33 = vrot.slane %v4310_v11, %v341_v40 }
 0x11c   :  { %3982 = vrsqrt.f32 %v314_v50 }
 0x126   :  { %v3983_v54 = vpop.eup %3982 }
 0x127   :  { %v316_v55 = vmul.f32 %v3983_v54, %v4310_v11 }
 0x129   :  { %v329_v47 = vrot.slane %v316_v55, %v4434_v53 }
 0x12b   :  { %v338_v56 = vmul.f32 %v329_v47, %v325_v39  ;;  %v330_v57 = vmul.f32 %v329_v47, %v317_v41  ;;  %v337_v58 = vmul.f32 %v329_v47, %v324_v42  ;;  %v335_v59 = vmul.f32 %v329_v47, %v322_v43  ;;  %v39_v41 = vld [vmem:[%s5312_s2] sm:$0xff] }
 0x12c   :  { %v336_v60 = vmul.f32 %v329_v47, %v323_v44  ;;  %v333_v61 = vmul.f32 %v329_v47, %v320_v45  ;;  %v334_v62 = vmul.f32 %v329_v47, %v321_v48  ;;  %v332_v63 = vmul.f32 %v329_v47, %v319_v49  ;;  %v43_v42 = vld [vmem:[%s5312_s2 + $0x20] sm:$0xff]  ;;  %v48_v48 = vld [vmem:[%s5312_s2 + $0x48] sm:$0xff] }
 0x12d   :  { %v351_v0 = vadd.f32 %v4441_v33, %v338_v56  ;;  %v343_v1 = vadd.f32 %v4441_v33, %v330_v57  ;;  %v350_v2 = vadd.f32 %v4441_v33, %v337_v58  ;;  %v348_v4 = vadd.f32 %v4441_v33, %v335_v59  ;;  %v52_v49 = vld [vmem:[%s5312_s2 + $0x68] sm:$0xff]  ;;  %v62_v56 = vld [vmem:[%s5312_s2 + $0xb8] sm:$0xff] }
 0x12e   :  { %v349_v11 = vadd.f32 %v4441_v33, %v336_v60  ;;  %v346_v5 = vadd.f32 %v4441_v33, %v333_v61  ;;  %v347_v7 = vadd.f32 %v4441_v33, %v334_v62  ;;  %v345_v8 = vadd.f32 %v4441_v33, %v332_v63  ;;  %v66_v57 = vld [vmem:[%s5312_s2 + $0xd8] sm:$0xff]  ;;  %v47_v60 = vld [vmem:[%s5312_s2 + $0x40] sm:$0xff]  ;;  %v61_v62 = vld [vmem:[%s5312_s2 + $0xb0] sm:$0xff] }
 0x12f   :  { %v360_v9 = vmax.f32 %v351_v0, 0.0  ;;  %v352_v10 = vmax.f32 %v343_v1, 0.0  ;;  %v359_v12 = vmax.f32 %v350_v2, 0.0  ;;  %v4454_v19 = vmax.f32 %v348_v4, 0.0  ;;  %v65_v63 = vld [vmem:[%s5312_s2 + $0xd0] sm:$0xff]  ;;  %v74_v4 = vld [vmem:[%s5312_s2 + $0x118] sm:$0xff] }
 0x130   :  { %v358_v13 = vmax.f32 %v349_v11, 0.0  ;;  %v355_v14 = vmax.f32 %v346_v5, 0.0  ;;  %v4452_v15 = vmax.f32 %v347_v7, 0.0  ;;  %v354_v25 = vmax.f32 %v345_v8, 0.0 }
 0x131   :  { %v494_v16 = vrot.slane %v360_v9, 2  ;;  %v362_v17 = vrot.slane %v352_v10, 2  ;;  %v483_v18 = vrot.slane %v359_v12, 2  ;;  %v474_v20 = vrot.slane %v359_v12, 4 }
 0x132   :  { %v460_v22 = vrot.slane %v358_v13, 2  ;;  %v411_v23 = vrot.slane %v355_v14, 2  ;;  %v463_v29 = vrot.slane %v358_v13, 4  ;;  %v427_v32 = vrot.slane %v4452_v15, 4 }
 0x133   :  { %v4456_v26 = vmax.f32 %v360_v9, %v494_v16  ;;  %v4458_v27 = vmax.f32 %v352_v10, %v362_v17  ;;  %v485_v28 = vmax.f32 %v359_v12, %v483_v18  ;;  %v414_v39 = vrot.slane %v355_v14, 4  ;;  %v56_v10 = vld [vmem:[%s5312_s2 + $0x88] sm:$0xff]  ;;  %v42_v16 = vld [vmem:[%s5312_s2 + $0x18] sm:$0xff] }
 0x134   :  { %v462_v30 = vmax.f32 %v4454_v19, %v460_v22  ;;  %v425_v31 = vmax.f32 %v355_v14, %v411_v23  ;;  %v472_v34 = vmax.f32 %v358_v13, %v460_v22  ;;  %v413_v38 = vmax.f32 %v354_v25, %v411_v23  ;;  %v46_v17 = vld [vmem:[%s5312_s2 + $0x38] sm:$0xff]  ;;  %v73_v22 = vld [vmem:[%s5312_s2 + $0x110] sm:$0xff] }
 0x135   :  { %499 = vrot.lane.b32.xlu1 %v4456_v26, %s4237_s27  ;;  %368 = vrot.lane.b32.xlu0 %v4458_v27, %s4237_s27  ;;  %366 = vst.msk [vmem:[#allocation2] sm:$0x3] %vm365_vm5, %v4458_v27  ;;  %v447_v46 = vrot.slane %v4454_v19, 2  ;;  %v4493_v50 = vmax.f32 %v485_v28, %v474_v20  ;;  %v331_v54 = vmul.f32 %v329_v47, %v318_v21  ;;  %v398_v55 = vrot.slane %v354_v25, 2 }
 0x136   :  { %v4480_v43 = vmax.f32 %v462_v30, %v463_v29  ;;  %v429_v44 = vmax.f32 %v425_v31, %v427_v32  ;;  %v4484_v45 = vmax.f32 %v472_v34, %v474_v20  ;;  %v416_v51 = vmax.f32 %v413_v38, %v414_v39  ;;  %v69_v20 = vld [vmem:[%s5312_s2 + $0xf0] sm:$0xff]  ;;  %v78_v29 = vld [vmem:[%s5312_s2 + $0x138] sm:$0xff] }
 0x137   :  { %v3440_v58 = vpack.c.bf16 %v44_v37, %v40_v36  ;;  %v3442_v59 = vpack.c.bf16 %v43_v42, %v39_v41  ;;  %v344_v35 = vadd.f32 %v4441_v33, %v331_v54  ;;  %v400_v21 = vmax.f32 %v354_v25, %v398_v55  ;;  %v70_v33 = vld [vmem:[%s5312_s2 + $0xf8] sm:$0xff]  ;;  %v77_v36 = vld [vmem:[%s5312_s2 + $0x130] sm:$0xff] }
 0x138   :  { %430 = vst.msk [vmem:[#allocation2 + $0x6] sm:$0x30] %vm377_vm6, %v429_v44  ;;  %v401_v47 = vrot.slane %v354_v25, 4  ;;  %v3444_v61 = vpack.c.bf16 %v52_v49, %v48_v48  ;;  %v449_v0 = vmax.f32 %v4454_v19, %v447_v46  ;;  %v436_v1 = vrot.slane %v4452_v15, 2  ;;  %v82_v30 = vld [vmem:[%s5312_s2 + $0x158] sm:$0xff]  ;;  %v81_v38 = vld [vmem:[%s5312_s2 + $0x150] sm:$0xff] }
 0x139   :  { %489 = vrot.lane.b32.xlu1 %v4493_v50, %s4237_s27  ;;  %468 = vrot.lane.b32.xlu0 %v4480_v43, %s4237_s27  ;;  %418 = vst.msk [vmem:[#allocation2 + $0x2] sm:$0xc0] %vm417_vm7, %v416_v51  ;;  %v4525_v2 = vpack.c.bf16 %v66_v57, %v62_v56  ;;  %v353_v11 = vmax.f32 %v344_v35, 0.0  ;;  %v3446_v7 = vpack.c.bf16 %v51_v24, %v47_v60  ;;  %v450_v9 = vrot.slane %v4454_v19, 4  ;;  %v86_v41 = vld [vmem:[%s5312_s2 + $0x178] sm:$0xff]  ;;  %v85_v48 = vld [vmem:[%s5312_s2 + $0x170] sm:$0xff] }
 0x13a   :  { %3441 = vmatprep.subr.bf16.mxu1 %v3440_v58  ;;  %v403_v5 = vmax.f32 %v400_v21, %v401_v47  ;;  %v4533_v8 = vpack.c.bf16 %v65_v63, %v61_v62  ;;  %v4540_v12 = vpack.c.bf16 %v74_v4, %v70_v33  ;;  %v438_v19 = vmax.f32 %v4452_v15, %v436_v1  ;;  %v90_v42 = vld [vmem:[%s5312_s2 + $0x198] sm:$0xff]  ;;  %v89_v49 = vld [vmem:[%s5312_s2 + $0x190] sm:$0xff] }
 0x13b   :  { %3443 = vmatpush1.bf16.msra.mxu1 %v3442_v59  ;;  %3477 = vmatprep.subr.bf16.mxu0 %v4525_v2  ;;  %v374_v13 = vrot.slane %v353_v11, 4  ;;  %v385_v14 = vrot.slane %v353_v11, 2  ;;  %v4552_v18 = vmax.f32 %v449_v0, %v450_v9  ;;  %v4564_v28 = vpack.c.bf16 %v73_v22, %v69_v20  ;;  %v94_v15 = vld [vmem:[%s5312_s2 + $0x1b8] sm:$0xff]  ;;  %v93_v55 = vld [vmem:[%s5312_s2 + $0x1b0] sm:$0xff] }
 0x13c   :  { %3445 = vmatprep.subr.bf16.mxu1 %v3444_v61  ;;  %404 = vst.msk [vmem:[#allocation2 + $0x6] sm:$0x3] %vm365_vm5, %v403_v5  ;;  %3479 = vmatpush1.bf16.msra.mxu0 %v4533_v8  ;;  %v3448_v31 = vpack.c.bf16 %v46_v17, %v42_v16  ;;  %v4575_v34 = vpack.c.bf16 %v82_v30, %v78_v29  ;;  %v97_v56 = vld [vmem:[%s5312_s2 + $0x1d0] sm:$0xff]  ;;  %v50_v63 = vld [vmem:[%s5312_s2 + $0x58] sm:$0xff]  ;;  %v60_v17 = vld [vmem:[%s5312_s2 + $0xa8] sm:$0xff] }
 0x13d   :  { %432 = vrot.lane.b32.xlu1 %v429_v44, %s4237_s27  ;;  %479 = vrot.lane.b32.xlu0 %v4484_v45, %s4237_s27  ;;  %v376_v23 = vmax.f32 %v4458_v27, %v374_v13  ;;  %v387_v25 = vmax.f32 %v353_v11, %v385_v14  ;;  %v55_v27 = vld [vmem:[%s5312_s2 + $0x80] sm:$0xff]  ;;  %v4588_v39 = vpack.c.bf16 %v81_v38, %v77_v36  ;;  %v45_v47 = vld [vmem:[%s5312_s2 + $0x30] sm:$0xff] }
 0x13e   :  { %3481 = vmatprep.subr.bf16.mxu0 %v4540_v12  ;;  %v439_v44 = vmax.f32 %v438_v19, %v427_v32  ;;  %v4600_v46 = vpack.c.bf16 %v90_v42, %v86_v41  ;;  %v4614_v32 = vpack.c.bf16 %v89_v49, %v85_v48  ;;  %v4631_v57 = vpack.c.bf16 %v97_v56, %v93_v55  ;;  %v54_v0 = vld [vmem:[%s5312_s2 + $0x78] sm:$0xff]  ;;  %v49_v4 = vld [vmem:[%s5312_s2 + $0x50] sm:$0xff]  ;;  %v76_v36 = vld [vmem:[%s5312_s2 + $0x128] sm:$0xff] }
 0x13f   :  { %3447 = vmatpush1.bf16.msra.mxu1 %v3446_v7  ;;  %v388_v37 = vmax.f32 %v387_v25, %v374_v13  ;;  %378 = vst.msk [vmem:[#allocation2 - $0x2] sm:$0x30] %vm377_vm6, %v376_v23  ;;  %v3452_v33 = vpack.c.bf16 %v54_v0, %v50_v63  ;;  %v53_v11 = vld [vmem:[%s5312_s2 + $0x70] sm:$0xff]  ;;  %v58_v16 = vld [vmem:[%s5312_s2 + $0x98] sm:$0xff]  ;;  %v72_v25 = vld [vmem:[%s5312_s2 + $0x108] sm:$0xff]  ;;  %v509_v0 = vsub.s32 0, %v4431_v52 }
 0x140   :  { %545 = vmatprep.subr.mxu1 %v56_v10  ;;  %3483 = vmatpush1.bf16.msra.mxu0 %v4564_v28  ;;  %v3454_v10 = vpack.c.bf16 %v53_v11, %v49_v4  ;;  %v75_v42 = vld [vmem:[%s5312_s2 + $0x120] sm:$0xff]  ;;  %v84_v48 = vld [vmem:[%s5312_s2 + $0x168] sm:$0xff] }
 0x141   :  { %455 = vrot.lane.b32.xlu1 %v4552_v18, %s4237_s27  ;;  %420 = vrot.lane.b32.xlu0 %v416_v51, %s4237_s27  ;;  %390 = vst.msk [vmem:[#allocation2 + $0x2] sm:$0xc] %vm389_vm8, %v388_v37  ;;  %v98_v51 = vld [vmem:[%s5312_s2 + $0x1d8] sm:$0xff]  ;;  %v88_v49 = vld [vmem:[%s5312_s2 + $0x188] sm:$0xff] }
 0x142   :  { %3485 = vmatprep.subr.bf16.mxu0 %v4575_v34  ;;  %v4620_v54 = vpack.c.bf16 %v98_v51, %v94_v15  ;;  %v4764_v51 = vpack.c.bf16 %v88_v49, %v84_v48  ;;  %v83_v55 = vld [vmem:[%s5312_s2 + $0x160] sm:$0xff] }
 0x143   :  { %546 = vmatpush1.msra.mxu1 %v55_v27  ;;  %v67_v27 = vld [vmem:[%s5312_s2 + $0xe0] sm:$0xff] }
 0x144   :  { %3449 = vmatprep.subr.bf16.mxu1 %v3448_v31  ;;  %3487 = vmatpush1.bf16.msra.mxu0 %v4588_v39  ;;  %v71_v31 = vld [vmem:[%s5312_s2 + $0x100] sm:$0xff] }
 0x145   :  { %442 = vrot.lane.b32.xlu0 %v439_v44, %s4237_s27  ;;  %380 = vrot.lane.b32.xlu1 %v376_v23, %s4237_s27  ;;  %v68_v23 = vld [vmem:[%s5312_s2 + $0xe8] sm:$0xff]  ;;  %v4741_v38 = vpack.c.bf16 %v71_v31, %v67_v27  ;;  %v87_v56 = vld [vmem:[%s5312_s2 + $0x180] sm:$0xff] }
 0x146   :  { %3489 = vmatprep.subr.bf16.mxu0 %v4600_v46  ;;  %v4724_v30 = vpack.c.bf16 %v72_v25, %v68_v23 }
 0x148   :  { %3491 = vmatpush1.bf16.msra.mxu0 %v4614_v32 }
 0x149   :  { %392 = vrot.lane.b32.xlu0 %v388_v37, %s4237_s27  ;;  %406 = vrot.lane.b32.xlu1 %v403_v5, %s4237_s27  ;;  %v80_v37 = vld [vmem:[%s5312_s2 + $0x148] sm:$0xff]  ;;  %s3232_s27 = sshll.u32 %s4251_s10, 4  ;;  %s3233_s27 = int_to_ptr.vmem [resolvable:$true] %s3232_s27 }
 0x14a   :  { %3493 = vmatprep.subr.bf16.mxu0 %v4620_v54  ;;  %v4744_v41 = vpack.c.bf16 %v80_v37, %v76_v36 }
 0x14c   :  { %3495 = vmatpush1.bf16.msra.mxu0 %v4631_v57 }
 0x14d   :  { %3517 = vmatprep.subr.bf16.mxu0 %v4525_v2 }
 0x14f   :  { %843 = vmatmul.mubr.f32.vlgmr.msra.gmra.mrb[18].mxu0 %v4235_v6 }
 0x150   :  { %3519 = vmatpush1.bf16.msra.mxu0 %v4533_v8  ;;  %1019 = vmatprep.mubr.f32.mxu0 %v4235_v6 }
 0x151   :  { %3521 = vmatprep.subr.bf16.mxu0 %v4540_v12 }
 0x154   :  { %3523 = vmatpush1.bf16.msra.mxu0 %v4564_v28 }
 0x155   :  { %3525 = vmatprep.subr.bf16.mxu0 %v4575_v34 }
 0x158   :  { %3527 = vmatpush1.bf16.msra.mxu0 %v4588_v39 }
 0x159   :  { %3529 = vmatprep.subr.bf16.mxu0 %v4600_v46 }
 0x15c   :  { %3531 = vmatpush1.bf16.msra.mxu0 %v4614_v32 }
 0x15d   :  { %3533 = vmatprep.subr.bf16.mxu0 %v4620_v54 }
 0x160   :  { %3535 = vmatpush1.bf16.msra.mxu0 %v4631_v57 }
 0x161   :  { %3557 = vmatprep.subr.bf16.mxu0 %v4525_v2 }
 0x1a7   :  { %v500_v58 = vpop.permute.xlu1 %499  ;;  %v369_v59 = vpop.permute.xlu0 %368 }
 0x1a8   :  { %502 = vst.msk [vmem:[#allocation2] sm:$0x3] %vm371_vm9, %v500_v58  ;;  %372 = vst.msk [vmem:[#allocation2 + $0x16] sm:$0x3] %vm371_vm9, %v369_v59  ;;  %v92_v58 = vld [vmem:[%s5312_s2 + $0x1a8] sm:$0xff] }
 0x1a9   :  { %497 = vst.msk [vmem:[#allocation2 + $0x16] sm:$0x3] %vm365_vm5, %v4456_v26  ;;  %v41_v26 = vld [vmem:[%s5312_s2 + $0x10] sm:$0xff]  ;;  %v96_v59 = vld [vmem:[%s5312_s2 + $0x1c8] sm:$0xff] }
 0x1aa   :  { %v3450_v1 = vpack.c.bf16 %v45_v47, %v41_v26 }
 0x1ab   :  { %v490_v60 = vpop.permute.xlu1 %489  ;;  %v469_v24 = vpop.permute.xlu0 %468 }
 0x1ac   :  { %492 = vst.msk [vmem:[#allocation2] sm:$0xc] %vm395_vm10, %v490_v60  ;;  %v4780_v60 = vpack.c.bf16 %v87_v56, %v83_v55 }
 0x1ad   :  { %471 = vst.msk [vmem:[#allocation2] sm:$0xc0] %vm423_vm11, %v469_v24  ;;  %v4784_v24 = vpack.c.bf16 %v96_v59, %v92_v58 }
 0x1af   :  { %v433_v35 = vpop.permute.xlu1 %432  ;;  %v480_v21 = vpop.permute.xlu0 %479 }
 0x1b0   :  { %435 = vst.msk [vmem:[#allocation2 + $0x8] sm:$0x30] %vm383_vm12, %v433_v35  ;;  %482 = vst.msk [vmem:[#allocation2] sm:$0x30] %vm383_vm12, %v480_v21  ;;  %v91_v35 = vld [vmem:[%s5312_s2 + $0x1a0] sm:$0xff] }
 0x1b1   :  { %440 = vst.msk [vmem:[#allocation2 + $0xa] sm:$0xc] %vm389_vm8, %v439_v44  ;;  %v79_v44 = vld [vmem:[%s5312_s2 + $0x140] sm:$0xff] }
 0x1b2   :  { %v4761_v15 = vpack.c.bf16 %v79_v44, %v75_v42  ;;  %v95_v21 = vld [vmem:[%s5312_s2 + $0x1c0] sm:$0xff] }
 0x1b3   :  { %v456_v61 = vpop.permute.xlu1 %455  ;;  %v421_v62 = vpop.permute.xlu0 %420  ;;  %v4793_v26 = vpack.c.bf16 %v95_v21, %v91_v35 }
 0x1b4   :  { %458 = vst.msk [vmem:[#allocation2 + $0x8] sm:$0x3] %vm371_vm9, %v456_v61 }
 0x1b5   :  { %424 = vst.msk [vmem:[#allocation2 + $0x8] sm:$0xc0] %vm423_vm11, %v421_v62  ;;  %vm3104_vm11 = vcmask 31744  }
 0x1b6   :  { %453 = vst.msk [vmem:[#allocation2 + $0xe] sm:$0x3] %vm365_vm5, %v4552_v18  ;;  %v64_v18 = vld [vmem:[%s5312_s2 + $0xc8] sm:$0xff]  ;;  %vm1264_vm5 = vcmask 652612  }
 0x1b7   :  { %v443_v5 = vpop.permute.xlu0 %442  ;;  %v381_v7 = vpop.permute.xlu1 %380  ;;  %v503_v9 = vld [vmem:[#allocation2] sm:$0xff]  ;;  %v4703_v19 = vpack.c.bf16 %v64_v18, %v60_v17  ;;  %v521_v18 = vsub.s32 3, %v4431_v52 }
 0x1b8   :  { %445 = vst.msk [vmem:[#allocation2 + $0x8] sm:$0xc] %vm395_vm10, %v443_v5  ;;  %3265 = vmatmul.mubr.msk.f32.vlgmr.msra.gmra.mrb[0].mxu1 %vm527_vm13, %v503_v9 }
 0x1b9   :  { %384 = vst.msk [vmem:[#allocation2 + $0x10] sm:$0x30] %vm383_vm12, %v381_v7  ;;  %3451 = vmatpush1.bf16.msra.mxu1 %v3450_v1  ;;  %607 = vmatprep.mubr.f32.mxu1 %v4235_v6  ;;  %v3254_v1 = vld [vmem:[%s5312_s2 + $0x1e0] ss:$8 sm:$0xf]  ;;  %vm3106_vm12 = vcmask 39936  }
 0x1ba   :  { %487 = vst.msk [vmem:[#allocation2 + $0x12] sm:$0xc] %vm389_vm8, %v4493_v50  ;;  %3453 = vmatprep.subr.bf16.mxu1 %v3452_v33  ;;  %v57_v50 = vld [vmem:[%s5312_s2 + $0x90] sm:$0xff]  ;;  %v510_v33 = vrot.slane %v3254_v1, %v509_v0  ;;  %v514_v4 = vrot.slane %v3254_v1, %v4434_v53  ;;  %vm3098_vm8 = vcmask 7168  }
 0x1bb   :  { %v393_v13 = vpop.permute.xlu0 %392  ;;  %v407_v14 = vpop.permute.xlu1 %406 }
 0x1bc   :  { %396 = vst.msk [vmem:[#allocation2 + $0x10] sm:$0xc] %vm395_vm10, %v393_v13  ;;  %vm3102_vm10 = vcmask 23552  }
 0x1bd   :  { %409 = vst.msk [vmem:[#allocation2 + $0x10] sm:$0x3] %vm371_vm9, %v407_v14  ;;  %3455 = vmatpush1.bf16.msra.mxu1 %v3454_v10  ;;  %vm3100_vm9 = vcmask 15360  }
 0x1be   :  { %477 = vst.msk [vmem:[#allocation2 + $0xe] sm:$0x30] %vm377_vm6, %v4484_v45  ;;  %628 = vmatprep.subr.mxu1 %v58_v16  ;;  %v63_v45 = vld [vmem:[%s5312_s2 + $0xc0] sm:$0xff]  ;;  %vm1455_vm6 = vcmask 326662  }
 0x1bf   :  { %466 = vst.msk [vmem:[#allocation2 + $0xa] sm:$0xc0] %vm417_vm7, %v4480_v43  ;;  %v504_v20 = vld [vmem:[#allocation2 + $0x8] sm:$0xff]  ;;  %v59_v43 = vld [vmem:[%s5312_s2 + $0xa0] sm:$0xff]  ;;  %vm1457_vm7 = vcmask 654662  }
 0x1c0   :  { %3266 = vmatmul.mubr.msk.f32.gmra.mrb[2].mxu1 %vm527_vm13, %v504_v20  ;;  %v4722_v29 = vpack.c.bf16 %v63_v45, %v59_v43  ;;  %v522_v43 = vrot.slane %v3254_v1, %v521_v18 }
 0x1c1   :  { %613 = vmatprep.mubr.f32.mxu1 %v4235_v6  ;;  %629 = vmatpush1.msra.mxu1 %v57_v50 }
 0x1c2   :  { %3457 = vmatprep.subr.bf16.mxu1 %v4703_v19 }
 0x1c6   :  { %v505_v22 = vld [vmem:[#allocation2 + $0x10] sm:$0xff] }
 0x1c7   :  { %3267 = vmatmul.mubr.msk.f32.gmra.mrb[4].mxu1 %vm527_vm13, %v505_v22 }
 0x1c8   :  { %684 = vmatprep.mubr.f32.mxu1 %v4235_v6 }
 0x1cb   :  { %3268 = vmatmul.mubr.msk.f32.vlgmr.msra.gmra.mrb[6].mxu1 %vm527_vm13, %v503_v9 }
 0x1cc   :  { %3459 = vmatpush1.bf16.msra.mxu1 %v4722_v29  ;;  %690 = vmatprep.mubr.f32.mxu1 %v4235_v6 }
 0x1cd   :  { %3461 = vmatprep.subr.bf16.mxu1 %v4724_v30 }
 0x1cf   :  { %3269 = vmatmul.mubr.msk.f32.gmra.mrb[8].mxu1 %vm527_vm13, %v504_v20  ;;  %v518_v20 = vrot.slane %v3254_v1, %v341_v40 }
 0x1d0   :  { %3463 = vmatpush1.bf16.msra.mxu1 %v4741_v38  ;;  %696 = vmatprep.mubr.f32.mxu1 %v4235_v6 }
 0x1d1   :  { %3465 = vmatprep.subr.bf16.mxu1 %v4744_v41 }
 0x1d3   :  { %3270 = vmatmul.mubr.msk.f32.gmra.mrb[10].mxu1 %vm527_vm13, %v505_v22  ;;  %vm3108_vm13 = vcmask 48128  }
 0x1d4   :  { %3467 = vmatpush1.bf16.msra.mxu1 %v4761_v15  ;;  %771 = vmatprep.mubr.f32.mxu1 %v4235_v6 }
 0x1d5   :  { %3469 = vmatprep.subr.bf16.mxu1 %v4764_v51 }
 0x1d8   :  { %3471 = vmatpush1.bf16.msra.mxu1 %v4780_v60 }
 0x1d9   :  { %3473 = vmatprep.subr.bf16.mxu1 %v4784_v24 }
 0x1dc   :  { %3475 = vmatpush1.bf16.msra.mxu1 %v4793_v26 }
 0x1dd   :  { %3497 = vmatprep.subr.bf16.mxu1 %v4703_v19 }
 0x1df   :  { %772 = vmatmul.mubr.f32.vlgmr.msra.gmra.mrb[12].mxu1 %v4235_v6 }
 0x1e0   :  { %3499 = vmatpush1.bf16.msra.mxu1 %v4722_v29  ;;  %948 = vmatprep.mubr.f32.mxu1 %v4235_v6 }
 0x1e1   :  { %3501 = vmatprep.subr.bf16.mxu1 %v4724_v30 }
 0x1e4   :  { %3503 = vmatpush1.bf16.msra.mxu1 %v4741_v38 }
 0x1e5   :  { %3505 = vmatprep.subr.bf16.mxu1 %v4744_v41 }
 0x1e8   :  { %3507 = vmatpush1.bf16.msra.mxu1 %v4761_v15 }
 0x1e9   :  { %3509 = vmatprep.subr.bf16.mxu1 %v4764_v51 }
 0x1ec   :  { %3511 = vmatpush1.bf16.msra.mxu1 %v4780_v60 }
 0x1ed   :  { %3513 = vmatprep.subr.bf16.mxu1 %v4784_v24 }
 0x1f0   :  { %3515 = vmatpush1.bf16.msra.mxu1 %v4793_v26 }
 0x1f1   :  { %3537 = vmatprep.subr.bf16.mxu1 %v4703_v19 }
 0x222   :  { %v844_v47 = vpop.f32.mrb[18].mxu0 }
 0x223   :  { %v846_v61 = vpop.f32.mrb[19].mxu0 }
 0x28b   :  { %v603_v62 = vpop.f32.mrb[0].mxu1 }
 0x28c   :  { %v605_v63 = vpop.f32.mrb[1].mxu1  ;;  %v4836_v42 = vadd.f32 %v603_v62, %v510_v33 }
 0x28d   :  { %v4838_v44 = vadd.f32 %v605_v63, %v514_v4 }
 0x293   :  { %v609_v11 = vpop.f32.mrb[2].mxu1 }
 0x294   :  { %v4817_v5 = vadd.f32 %v609_v11, %v510_v33  ;;  %v611_v7 = vpop.f32.mrb[3].mxu1 }
 0x295   :  { %v4819_v9 = vadd.f32 %v611_v7, %v514_v4 }
 0x29a   :  { %v615_v10 = vpop.f32.mrb[4].mxu1 }
 0x29b   :  { %v4821_v13 = vadd.f32 %v615_v10, %v510_v33  ;;  %v617_v14 = vpop.f32.mrb[5].mxu1 }
 0x29c   :  { %v4823_v16 = vadd.f32 %v617_v14, %v514_v4 }
 0x29e   :  { %v686_v17 = vpop.f32.mrb[6].mxu1 }
 0x29f   :  { %v688_v50 = vpop.f32.mrb[7].mxu1  ;;  %v4842_v58 = vadd.f32 %v686_v17, %v518_v20 }
 0x2a0   :  { %v4845_v21 = vadd.f32 %v688_v50, %v522_v43 }
 0x2a1   :  { %v851_v35 = vadd.f32 %v844_v47, %v4842_v58 }
 0x2a2   :  { %v692_v45 = vpop.f32.mrb[8].mxu1  ;;  %v852_v63 = vadd.f32 %v846_v61, %v4845_v21 }
 0x2a3   :  { %v4828_v22 = vadd.f32 %v692_v45, %v518_v20  ;;  %v694_v23 = vpop.f32.mrb[9].mxu1  ;;  %v3273_v62 = vmul.f32 -1.442695, %v851_v35 }
 0x2a4   :  { %v4830_v25 = vadd.f32 %v694_v23, %v522_v43 }
 0x2a6   :  { %v698_v27 = vpop.f32.mrb[10].mxu1 }
 0x2a7   :  { %v4832_v31 = vadd.f32 %v698_v27, %v518_v20  ;;  %v700_v36 = vpop.f32.mrb[11].mxu1 }
 0x2a8   :  { %v4834_v37 = vadd.f32 %v700_v36, %v522_v43 }
 0x2b2   :  { %v773_v48 = vpop.f32.mrb[12].mxu1 }
 0x2b3   :  { %v849_v40 = vadd.f32 %v773_v48, %v4836_v42  ;;  %v775_v49 = vpop.f32.mrb[13].mxu1 }
 0x2b4   :  { %v850_v55 = vadd.f32 %v775_v49, %v4838_v44 }
 0x2b5   :  { %v3271_v56 = vmul.f32 -1.442695, %v849_v40 }
 0x2b6   :  { %v3272_v59 = vmul.f32 -1.442695, %v850_v55 }
 0x2b7   :  { %3984 = vpow2.f32 %v3271_v56 }
 0x2b8   :  { %3986 = vpow2.f32 %v3272_v59 }
 0x2b9   :  { %3988 = vpow2.f32 %v3273_v62 }
 0x2ba   :  { %3990 = vtanh.f32 %v852_v63 }
 0x2c1   :  { %v3985_v1 = vpop.eup %3984 }
 0x2c2   :  { %v3987_v33 = vpop.eup %3986  ;;  %v862_v4 = vadd.f32 1.0, %v3985_v1 }
 0x2c3   :  { %v863_v11 = vadd.f32 1.0, %v3987_v33  ;;  %v3989_v7 = vpop.eup %3988 }
 0x2c4   :  { %3992 = vrcp.f32 %v862_v4  ;;  %v3991_v10 = vpop.eup %3990  ;;  %v864_v18 = vadd.f32 1.0, %v3989_v7 }
 0x2c5   :  { %3994 = vrcp.f32 %v863_v11 }
 0x2c6   :  { %3996 = vrcp.f32 %v864_v18 }
 0x2ce   :  { %v3993_v14 = vpop.eup %3992 }
 0x2cf   :  { %v3995_v17 = vpop.eup %3994  ;;  %v873_v20 = vmul.f32 %v3993_v14, %v3991_v10 }
 0x2d0   :  { %v872_v47 = vmul.f32 0.0, %v3995_v17  ;;  %v3997_v61 = vpop.eup %3996 }
 0x2d2   :  { %v4848_v50 = vadd.f32 %v873_v20, %v872_v47 }
 0x2d4   :  { %3998 = vtanh.f32 %v4848_v50  ;;  %v1062_v47 = vrot.slane %v4848_v50, 6 }
 0x2de   :  { %v3999_v43 = vpop.eup %3998 }
 0x2df   :  { %v876_v45 = vmul.f32 %v3999_v43, %v3997_v61 }
 0x2e1   :  { %878 = vst.msk [vmem:[#allocation3] sm:$0x3] %vm877_vm15, %v876_v45  ;;  %3274 = vmatmul.mubr.msk.f32.vlgmr.msra.gmra.mrb[14].mxu1 %vm703_vm14, %v876_v45  ;;  %3275 = vmatmul.mubr.msk.f32.vlgmr.msra.gmra.mrb[20].mxu0 %vm703_vm14, %v876_v45 }
 0x2e2   :  { %880 = vst.msk [vmem:[#allocation3 + $0x16] sm:$0x3] %vm879_vm1, %v876_v45  ;;  %3539 = vmatpush1.bf16.msra.mxu1 %v4722_v29  ;;  %3559 = vmatpush1.bf16.msra.mxu0 %v4533_v8 }
 0x2e3   :  { %3541 = vmatprep.subr.bf16.mxu1 %v4724_v30  ;;  %3561 = vmatprep.subr.bf16.mxu0 %v4540_v12 }
 0x2e4   :  { %1141 = vmatprep.mubr.f32.mxu1 %v4235_v6  ;;  %1212 = vmatprep.mubr.f32.mxu0 %v4235_v6 }
 0x2e6   :  { %3543 = vmatpush1.bf16.msra.mxu1 %v4741_v38  ;;  %3563 = vmatpush1.bf16.msra.mxu0 %v4564_v28 }
 0x2e7   :  { %3545 = vmatprep.subr.bf16.mxu1 %v4744_v41  ;;  %3565 = vmatprep.subr.bf16.mxu0 %v4575_v34 }
 0x2ea   :  { %3547 = vmatpush1.bf16.msra.mxu1 %v4761_v15  ;;  %3567 = vmatpush1.bf16.msra.mxu0 %v4588_v39 }
 0x2eb   :  { %3549 = vmatprep.subr.bf16.mxu1 %v4764_v51  ;;  %3569 = vmatprep.subr.bf16.mxu0 %v4600_v46 }
 0x2ee   :  { %3551 = vmatpush1.bf16.msra.mxu1 %v4780_v60  ;;  %3571 = vmatpush1.bf16.msra.mxu0 %v4614_v32 }
 0x2ef   :  { %3553 = vmatprep.subr.bf16.mxu1 %v4784_v24  ;;  %3573 = vmatprep.subr.bf16.mxu0 %v4620_v54 }
 0x2f2   :  { %3555 = vmatpush1.bf16.msra.mxu1 %v4793_v26  ;;  %3575 = vmatpush1.bf16.msra.mxu0 %v4631_v57 }
 0x2f3   :  { %3577 = vmatprep.subr.bf16.mxu1 %v4703_v19  ;;  %3597 = vmatprep.subr.bf16.mxu0 %v4525_v2 }
 0x3b4   :  { %v950_v23 = vpop.f32.mrb[14].mxu1  ;;  %v1021_v27 = vpop.f32.mrb[20].mxu0 }
 0x3b5   :  { %v1030_v36 = vrot.slane %v950_v23, 6  ;;  %v952_v48 = vpop.f32.mrb[15].mxu1  ;;  %v1023_v40 = vpop.f32.mrb[21].mxu0  ;;  %v1032_v62 = vrot.slane %v1021_v27, 6 }
 0x3b6   :  { %v1031_v49 = vrot.slane %v952_v48, 6  ;;  %v1033_v63 = vrot.slane %v1023_v40, 6 }
 0x3b7   :  { %v1038_v55 = vadd.f32 %v1030_v36, %v4836_v42  ;;  %v1040_v1 = vadd.f32 %v1032_v62, %v4842_v58 }
 0x3b8   :  { %v1039_v56 = vadd.f32 %v1031_v49, %v4838_v44  ;;  %v1041_v33 = vadd.f32 %v1033_v63, %v4845_v21 }
 0x3b9   :  { %v3276_v59 = vmul.f32 -1.442695, %v1038_v55  ;;  %v3278_v4 = vmul.f32 -1.442695, %v1040_v1 }
 0x3ba   :  { %v3277_v35 = vmul.f32 -1.442695, %v1039_v56 }
 0x3bb   :  { %4000 = vpow2.f32 %v3276_v59 }
 0x3bc   :  { %4002 = vpow2.f32 %v3277_v35 }
 0x3bd   :  { %4004 = vtanh.f32 %v1041_v33 }
 0x3be   :  { %4006 = vpow2.f32 %v3278_v4 }
 0x3c5   :  { %v4001_v11 = vpop.eup %4000 }
 0x3c6   :  { %v1051_v7 = vadd.f32 1.0, %v4001_v11  ;;  %v4003_v10 = vpop.eup %4002 }
 0x3c7   :  { %v1052_v14 = vadd.f32 1.0, %v4003_v10  ;;  %v4005_v17 = vpop.eup %4004 }
 0x3c8   :  { %4008 = vrcp.f32 %v1051_v7  ;;  %v4007_v18 = vpop.eup %4006 }
 0x3c9   :  { %4010 = vrcp.f32 %v1052_v14  ;;  %v1053_v45 = vadd.f32 1.0, %v4007_v18 }
 0x3cb   :  { %4012 = vrcp.f32 %v1053_v45 }
 0x3d2   :  { %v4009_v20 = vpop.eup %4008 }
 0x3d3   :  { %v1065_v61 = vmul.f32 %v4009_v20, %v4005_v17  ;;  %v4011_v43 = vpop.eup %4010 }
 0x3d4   :  { %v1064_v23 = vmul.f32 %v4011_v43, %v1062_v47 }
 0x3d5   :  { %v4013_v36 = vpop.eup %4012 }
 0x3d6   :  { %v4882_v27 = vadd.f32 %v1065_v61, %v1064_v23 }
 0x3d8   :  { %4014 = vtanh.f32 %v4882_v27 }
 0x3e2   :  { %v4015_v48 = vpop.eup %4014 }
 0x3e3   :  { %v1068_v40 = vmul.f32 %v4015_v48, %v4013_v36  ;;  %v1255_v36 = vrot.slane %v4882_v27, 6 }
 0x3e5   :  { %1070 = vst.msk [vmem:[#allocation3] sm:$0xc] %vm1069_vm2, %v1068_v40  ;;  %v1074_v49 = vrot.slane %v1068_v40, 2 }
 0x3e6   :  { %1072 = vst.msk [vmem:[#allocation3 + $0x12] sm:$0xc] %vm1071_vm3, %v1068_v40 }
 0x3e7   :  { %3279 = vmatmul.mubr.msk.f32.vlgmr.msra.gmra.mrb[16].mxu1 %vm703_vm14, %v1074_v49  ;;  %3280 = vmatmul.mubr.msk.f32.vlgmr.msra.gmra.mrb[22].mxu0 %vm703_vm14, %v1074_v49 }
 0x3e8   :  { %3579 = vmatpush1.bf16.msra.mxu1 %v4722_v29  ;;  %3599 = vmatpush1.bf16.msra.mxu0 %v4533_v8 }
 0x3e9   :  { %3581 = vmatprep.subr.bf16.mxu1 %v4724_v30  ;;  %3601 = vmatprep.subr.bf16.mxu0 %v4540_v12 }
 0x3ea   :  { %1334 = vmatprep.mubr.f32.mxu1 %v4235_v6  ;;  %1405 = vmatprep.mubr.f32.mxu0 %v4235_v6 }
 0x3ec   :  { %3583 = vmatpush1.bf16.msra.mxu1 %v4741_v38  ;;  %3603 = vmatpush1.bf16.msra.mxu0 %v4564_v28 }
 0x3ed   :  { %3585 = vmatprep.subr.bf16.mxu1 %v4744_v41  ;;  %3605 = vmatprep.subr.bf16.mxu0 %v4575_v34 }
 0x3f0   :  { %3587 = vmatpush1.bf16.msra.mxu1 %v4761_v15  ;;  %3607 = vmatpush1.bf16.msra.mxu0 %v4588_v39 }
 0x3f1   :  { %3589 = vmatprep.subr.bf16.mxu1 %v4764_v51  ;;  %3609 = vmatprep.subr.bf16.mxu0 %v4600_v46 }
 0x3f4   :  { %3591 = vmatpush1.bf16.msra.mxu1 %v4780_v60  ;;  %3611 = vmatpush1.bf16.msra.mxu0 %v4614_v32 }
 0x3f5   :  { %3593 = vmatprep.subr.bf16.mxu1 %v4784_v24  ;;  %3613 = vmatprep.subr.bf16.mxu0 %v4620_v54 }
 0x3f8   :  { %3595 = vmatpush1.bf16.msra.mxu1 %v4793_v26  ;;  %3615 = vmatpush1.bf16.msra.mxu0 %v4631_v57 }
 0x3f9   :  { %3617 = vmatprep.subr.bf16.mxu1 %v4703_v19  ;;  %3637 = vmatprep.subr.bf16.mxu0 %v4525_v2 }
 0x4ba   :  { %v1143_v50 = vpop.f32.mrb[16].mxu1  ;;  %v1214_v55 = vpop.f32.mrb[22].mxu0 }
 0x4bb   :  { %v1223_v56 = vrot.slane %v1143_v50, 4  ;;  %v1145_v59 = vpop.f32.mrb[17].mxu1  ;;  %v1216_v35 = vpop.f32.mrb[23].mxu0  ;;  %v1225_v11 = vrot.slane %v1214_v55, 4 }
 0x4bc   :  { %v1224_v62 = vrot.slane %v1145_v59, 4  ;;  %v1226_v7 = vrot.slane %v1216_v35, 4 }
 0x4bd   :  { %v1231_v63 = vadd.f32 %v1223_v56, %v4836_v42  ;;  %v1233_v10 = vadd.f32 %v1225_v11, %v4842_v58 }
 0x4be   :  { %v1232_v1 = vadd.f32 %v1224_v62, %v4838_v44  ;;  %v1234_v14 = vadd.f32 %v1226_v7, %v4845_v21 }
 0x4bf   :  { %v3281_v33 = vmul.f32 -1.442695, %v1231_v63  ;;  %v3283_v17 = vmul.f32 -1.442695, %v1233_v10 }
 0x4c0   :  { %v3282_v4 = vmul.f32 -1.442695, %v1232_v1 }
 0x4c1   :  { %4016 = vpow2.f32 %v3281_v33 }
 0x4c2   :  { %4018 = vpow2.f32 %v3282_v4 }
 0x4c3   :  { %4020 = vtanh.f32 %v1234_v14 }
 0x4c4   :  { %4022 = vpow2.f32 %v3283_v17 }
 0x4cb   :  { %v4017_v18 = vpop.eup %4016 }
 0x4cc   :  { %v1244_v20 = vadd.f32 1.0, %v4017_v18  ;;  %v4019_v47 = vpop.eup %4018 }
 0x4cd   :  { %v1245_v61 = vadd.f32 1.0, %v4019_v47  ;;  %v4021_v43 = vpop.eup %4020 }
 0x4ce   :  { %4024 = vrcp.f32 %v1244_v20  ;;  %v4023_v45 = vpop.eup %4022 }
 0x4cf   :  { %4026 = vrcp.f32 %v1245_v61  ;;  %v1246_v49 = vadd.f32 1.0, %v4023_v45 }
 0x4d1   :  { %4028 = vrcp.f32 %v1246_v49 }
 0x4d8   :  { %v4025_v23 = vpop.eup %4024 }
 0x4d9   :  { %v1258_v48 = vmul.f32 %v4025_v23, %v4021_v43  ;;  %v4027_v40 = vpop.eup %4026 }
 0x4da   :  { %v1257_v50 = vmul.f32 %v4027_v40, %v1255_v36 }
 0x4db   :  { %v4029_v56 = vpop.eup %4028 }
 0x4dc   :  { %v4916_v55 = vadd.f32 %v1258_v48, %v1257_v50 }
 0x4de   :  { %4030 = vtanh.f32 %v4916_v55  ;;  %v1448_v49 = vrot.slane %v4916_v55, 6 }
 0x4e8   :  { %v4031_v59 = vpop.eup %4030 }
 0x4e9   :  { %v1261_v35 = vmul.f32 %v4031_v59, %v4029_v56 }
 0x4eb   :  { %1263 = vst.msk [vmem:[#allocation3] sm:$0x30] %vm1262_vm4, %v1261_v35  ;;  %v1267_v62 = vrot.slane %v1261_v35, 4 }
 0x4ec   :  { %1265 = vst.msk [vmem:[#allocation3 + $0xe] sm:$0x30] %vm1264_vm5, %v1261_v35 }
 0x4ed   :  { %3284 = vmatmul.mubr.msk.f32.vlgmr.msra.gmra.mrb[18].mxu1 %vm703_vm14, %v1267_v62  ;;  %3285 = vmatmul.mubr.msk.f32.vlgmr.msra.gmra.mrb[24].mxu0 %vm703_vm14, %v1267_v62 }
 0x4ee   :  { %3619 = vmatpush1.bf16.msra.mxu1 %v4722_v29  ;;  %3639 = vmatpush1.bf16.msra.mxu0 %v4533_v8 }
 0x4ef   :  { %3621 = vmatprep.subr.bf16.mxu1 %v4724_v30  ;;  %3641 = vmatprep.subr.bf16.mxu0 %v4540_v12 }
 0x4f0   :  { %1527 = vmatprep.mubr.f32.mxu1 %v4235_v6  ;;  %1598 = vmatprep.mubr.f32.mxu0 %v4235_v6 }
 0x4f2   :  { %3623 = vmatpush1.bf16.msra.mxu1 %v4741_v38  ;;  %3643 = vmatpush1.bf16.msra.mxu0 %v4564_v28 }
 0x4f3   :  { %3625 = vmatprep.subr.bf16.mxu1 %v4744_v41  ;;  %3645 = vmatprep.subr.bf16.mxu0 %v4575_v34 }
 0x4f6   :  { %3627 = vmatpush1.bf16.msra.mxu1 %v4761_v15  ;;  %3647 = vmatpush1.bf16.msra.mxu0 %v4588_v39 }
 0x4f7   :  { %3629 = vmatprep.subr.bf16.mxu1 %v4764_v51  ;;  %3649 = vmatprep.subr.bf16.mxu0 %v4600_v46 }
 0x4fa   :  { %3631 = vmatpush1.bf16.msra.mxu1 %v4780_v60  ;;  %3651 = vmatpush1.bf16.msra.mxu0 %v4614_v32 }
 0x4fb   :  { %3633 = vmatprep.subr.bf16.mxu1 %v4784_v24  ;;  %3653 = vmatprep.subr.bf16.mxu0 %v4620_v54 }
 0x4fe   :  { %3635 = vmatpush1.bf16.msra.mxu1 %v4793_v26  ;;  %3655 = vmatpush1.bf16.msra.mxu0 %v4631_v57 }
 0x4ff   :  { %3657 = vmatprep.subr.bf16.mxu1 %v4703_v19  ;;  %3677 = vmatprep.subr.bf16.mxu0 %v4525_v2 }
 0x5c0   :  { %v1336_v27 = vpop.f32.mrb[18].mxu1  ;;  %v1407_v63 = vpop.f32.mrb[24].mxu0 }
 0x5c1   :  { %v1416_v1 = vrot.slane %v1336_v27, 2  ;;  %v1338_v33 = vpop.f32.mrb[19].mxu1  ;;  %v1409_v4 = vpop.f32.mrb[25].mxu0  ;;  %v1418_v18 = vrot.slane %v1407_v63, 2 }
 0x5c2   :  { %v1417_v11 = vrot.slane %v1338_v33, 2  ;;  %v1419_v20 = vrot.slane %v1409_v4, 2 }
 0x5c3   :  { %v1424_v7 = vadd.f32 %v1416_v1, %v4836_v42  ;;  %v1426_v47 = vadd.f32 %v1418_v18, %v4842_v58 }
 0x5c4   :  { %v1425_v10 = vadd.f32 %v1417_v11, %v4838_v44  ;;  %v1427_v61 = vadd.f32 %v1419_v20, %v4845_v21 }
 0x5c5   :  { %v3286_v14 = vmul.f32 -1.442695, %v1424_v7  ;;  %v3288_v43 = vmul.f32 -1.442695, %v1426_v47 }
 0x5c6   :  { %v3287_v17 = vmul.f32 -1.442695, %v1425_v10 }
 0x5c7   :  { %4032 = vpow2.f32 %v3286_v14 }
 0x5c8   :  { %4034 = vpow2.f32 %v3287_v17 }
 0x5c9   :  { %4036 = vtanh.f32 %v1427_v61 }
 0x5ca   :  { %4038 = vpow2.f32 %v3288_v43 }
 0x5d1   :  { %v4033_v45 = vpop.eup %4032 }
 0x5d2   :  { %v1437_v23 = vadd.f32 1.0, %v4033_v45  ;;  %v4035_v36 = vpop.eup %4034 }
 0x5d3   :  { %v1438_v42 = vadd.f32 1.0, %v4035_v36  ;;  %v4037_v44 = vpop.eup %4036 }
 0x5d4   :  { %4040 = vrcp.f32 %v1437_v23  ;;  %v4039_v48 = vpop.eup %4038 }
 0x5d5   :  { %4042 = vrcp.f32 %v1438_v42  ;;  %v1439_v59 = vadd.f32 1.0, %v4039_v48 }
 0x5d7   :  { %4044 = vrcp.f32 %v1439_v59 }
 0x5de   :  { %v4041_v40 = vpop.eup %4040 }
 0x5df   :  { %v1451_v50 = vmul.f32 %v4041_v40, %v4037_v44  ;;  %v4043_v56 = vpop.eup %4042 }
 0x5e0   :  { %v1450_v58 = vmul.f32 %v4043_v56, %v1448_v49 }
 0x5e1   :  { %v4045_v21 = vpop.eup %4044 }
 0x5e2   :  { %v4950_v35 = vadd.f32 %v1451_v50, %v1450_v58 }
 0x5e4   :  { %4046 = vtanh.f32 %v4950_v35  ;;  %v1629_v44 = vrot.slane %v4950_v35, 6 }
 0x5ee   :  { %v4047_v62 = vpop.eup %4046 }
 0x5ef   :  { %v1454_v27 = vmul.f32 %v4047_v62, %v4045_v21 }
 0x5f1   :  { %1456 = vst.msk [vmem:[#allocation3] sm:$0xc0] %vm1455_vm6, %v1454_v27  ;;  %v1460_v63 = vrot.slane %v1454_v27, 6 }
 0x5f2   :  { %1458 = vst.msk [vmem:[#allocation3 + $0xa] sm:$0xc0] %vm1457_vm7, %v1454_v27 }
 0x5f3   :  { %3289 = vmatmul.mubr.msk.f32.vlgmr.msra.gmra.mrb[20].mxu1 %vm703_vm14, %v1460_v63  ;;  %3290 = vmatmul.mubr.msk.f32.vlgmr.msra.gmra.mrb[26].mxu0 %vm703_vm14, %v1460_v63 }
 0x5f4   :  { %3659 = vmatpush1.bf16.msra.mxu1 %v4722_v29  ;;  %3679 = vmatpush1.bf16.msra.mxu0 %v4533_v8 }
 0x5f5   :  { %3661 = vmatprep.subr.bf16.mxu1 %v4724_v30  ;;  %3681 = vmatprep.subr.bf16.mxu0 %v4540_v12 }
 0x5f6   :  { %1705 = vmatprep.mubr.f32.mxu1 %v4235_v6  ;;  %1776 = vmatprep.mubr.f32.mxu0 %v4235_v6 }
 0x5f8   :  { %3663 = vmatpush1.bf16.msra.mxu1 %v4741_v38  ;;  %3683 = vmatpush1.bf16.msra.mxu0 %v4564_v28 }
 0x5f9   :  { %3665 = vmatprep.subr.bf16.mxu1 %v4744_v41  ;;  %3685 = vmatprep.subr.bf16.mxu0 %v4575_v34 }
 0x5fc   :  { %3667 = vmatpush1.bf16.msra.mxu1 %v4761_v15  ;;  %3687 = vmatpush1.bf16.msra.mxu0 %v4588_v39 }
 0x5fd   :  { %3669 = vmatprep.subr.bf16.mxu1 %v4764_v51  ;;  %3689 = vmatprep.subr.bf16.mxu0 %v4600_v46 }
 0x600   :  { %3671 = vmatpush1.bf16.msra.mxu1 %v4780_v60  ;;  %3691 = vmatpush1.bf16.msra.mxu0 %v4614_v32 }
 0x601   :  { %3673 = vmatprep.subr.bf16.mxu1 %v4784_v24  ;;  %3693 = vmatprep.subr.bf16.mxu0 %v4620_v54 }
 0x604   :  { %3675 = vmatpush1.bf16.msra.mxu1 %v4793_v26  ;;  %3695 = vmatpush1.bf16.msra.mxu0 %v4631_v57 }
 0x605   :  { %3697 = vmatprep.subr.bf16.mxu1 %v4703_v19  ;;  %3717 = vmatprep.subr.bf16.mxu0 %v4525_v2 }
 0x6c6   :  { %v1529_v55 = vpop.f32.mrb[20].mxu1  ;;  %v1600_v1 = vpop.f32.mrb[26].mxu0 }
 0x6c7   :  { %v1605_v33 = vadd.f32 %v1529_v55, %v4817_v5  ;;  %v1531_v4 = vpop.f32.mrb[21].mxu1  ;;  %v1602_v11 = vpop.f32.mrb[27].mxu0  ;;  %v1607_v17 = vadd.f32 %v1600_v1, %v4828_v22 }
 0x6c8   :  { %v1606_v7 = vadd.f32 %v1531_v4, %v4819_v9  ;;  %v1608_v18 = vadd.f32 %v1602_v11, %v4830_v25 }
 0x6c9   :  { %v3291_v10 = vmul.f32 -1.442695, %v1605_v33  ;;  %v3293_v20 = vmul.f32 -1.442695, %v1607_v17 }
 0x6ca   :  { %v3292_v14 = vmul.f32 -1.442695, %v1606_v7 }
 0x6cb   :  { %4048 = vpow2.f32 %v3291_v10 }
 0x6cc   :  { %4050 = vpow2.f32 %v3292_v14 }
 0x6cd   :  { %4052 = vtanh.f32 %v1608_v18 }
 0x6ce   :  { %4054 = vpow2.f32 %v3293_v20 }
 0x6d5   :  { %v4049_v47 = vpop.eup %4048 }
 0x6d6   :  { %v1618_v61 = vadd.f32 1.0, %v4049_v47  ;;  %v4051_v43 = vpop.eup %4050 }
 0x6d7   :  { %v1619_v45 = vadd.f32 1.0, %v4051_v43  ;;  %v4053_v23 = vpop.eup %4052 }
 0x6d8   :  { %4056 = vrcp.f32 %v1618_v61  ;;  %v4055_v36 = vpop.eup %4054 }
 0x6d9   :  { %4058 = vrcp.f32 %v1619_v45  ;;  %v1620_v49 = vadd.f32 1.0, %v4055_v36 }
 0x6db   :  { %4060 = vrcp.f32 %v1620_v49 }
 0x6e2   :  { %v4057_v42 = vpop.eup %4056 }
 0x6e3   :  { %v1632_v48 = vmul.f32 %v4057_v42, %v4053_v23  ;;  %v4059_v40 = vpop.eup %4058 }
 0x6e4   :  { %v1631_v50 = vmul.f32 %v4059_v40, %v1629_v44 }
 0x6e5   :  { %v4061_v59 = vpop.eup %4060 }
 0x6e6   :  { %v4984_v56 = vadd.f32 %v1632_v48, %v1631_v50 }
 0x6e8   :  { %4062 = vtanh.f32 %v4984_v56  ;;  %v1819_v44 = vrot.slane %v4984_v56, 6 }
 0x6f2   :  { %v4063_v58 = vpop.eup %4062 }
 0x6f3   :  { %v1635_v21 = vmul.f32 %v4063_v58, %v4061_v59 }
 0x6f5   :  { %1636 = vst.msk [vmem:[#allocation3 + $0x8] sm:$0x3] %vm877_vm15, %v1635_v21  ;;  %3294 = vmatmul.mubr.msk.f32.vlgmr.msra.gmra.mrb[22].mxu1 %vm703_vm14, %v1635_v21  ;;  %3295 = vmatmul.mubr.msk.f32.vlgmr.msra.gmra.mrb[28].mxu0 %vm703_vm14, %v1635_v21 }
 0x6f6   :  { %1637 = vst.msk [vmem:[#allocation3 + $0xe] sm:$0x3] %vm879_vm1, %v1635_v21  ;;  %3699 = vmatpush1.bf16.msra.mxu1 %v4722_v29  ;;  %3719 = vmatpush1.bf16.msra.mxu0 %v4533_v8 }
 0x6f7   :  { %3701 = vmatprep.subr.bf16.mxu1 %v4724_v30  ;;  %3721 = vmatprep.subr.bf16.mxu0 %v4540_v12 }
 0x6f8   :  { %1896 = vmatprep.mubr.f32.mxu1 %v4235_v6  ;;  %1967 = vmatprep.mubr.f32.mxu0 %v4235_v6 }
 0x6fa   :  { %3703 = vmatpush1.bf16.msra.mxu1 %v4741_v38  ;;  %3723 = vmatpush1.bf16.msra.mxu0 %v4564_v28 }
 0x6fb   :  { %3705 = vmatprep.subr.bf16.mxu1 %v4744_v41  ;;  %3725 = vmatprep.subr.bf16.mxu0 %v4575_v34 }
 0x6fe   :  { %3707 = vmatpush1.bf16.msra.mxu1 %v4761_v15  ;;  %3727 = vmatpush1.bf16.msra.mxu0 %v4588_v39 }
 0x6ff   :  { %3709 = vmatprep.subr.bf16.mxu1 %v4764_v51  ;;  %3729 = vmatprep.subr.bf16.mxu0 %v4600_v46 }
 0x702   :  { %3711 = vmatpush1.bf16.msra.mxu1 %v4780_v60  ;;  %3731 = vmatpush1.bf16.msra.mxu0 %v4614_v32 }
 0x703   :  { %3713 = vmatprep.subr.bf16.mxu1 %v4784_v24  ;;  %3733 = vmatprep.subr.bf16.mxu0 %v4620_v54 }
 0x706   :  { %3715 = vmatpush1.bf16.msra.mxu1 %v4793_v26  ;;  %3735 = vmatpush1.bf16.msra.mxu0 %v4631_v57 }
 0x707   :  { %3737 = vmatprep.subr.bf16.mxu1 %v4703_v19  ;;  %3757 = vmatprep.subr.bf16.mxu0 %v4525_v2 }
 0x7c8   :  { %v1707_v35 = vpop.f32.mrb[22].mxu1  ;;  %v1778_v62 = vpop.f32.mrb[28].mxu0 }
 0x7c9   :  { %v1787_v27 = vrot.slane %v1707_v35, 6  ;;  %v1709_v63 = vpop.f32.mrb[23].mxu1  ;;  %v1780_v55 = vpop.f32.mrb[29].mxu0  ;;  %v1789_v10 = vrot.slane %v1778_v62, 6 }
 0x7ca   :  { %v1788_v1 = vrot.slane %v1709_v63, 6  ;;  %v1790_v14 = vrot.slane %v1780_v55, 6 }
 0x7cb   :  { %v1795_v33 = vadd.f32 %v1787_v27, %v4817_v5  ;;  %v1797_v17 = vadd.f32 %v1789_v10, %v4828_v22 }
 0x7cc   :  { %v1796_v4 = vadd.f32 %v1788_v1, %v4819_v9  ;;  %v1798_v18 = vadd.f32 %v1790_v14, %v4830_v25 }
 0x7cd   :  { %v3296_v11 = vmul.f32 -1.442695, %v1795_v33  ;;  %v3298_v20 = vmul.f32 -1.442695, %v1797_v17 }
 0x7ce   :  { %v3297_v7 = vmul.f32 -1.442695, %v1796_v4 }
 0x7cf   :  { %4064 = vpow2.f32 %v3296_v11 }
 0x7d0   :  { %4066 = vpow2.f32 %v3297_v7 }
 0x7d1   :  { %4068 = vtanh.f32 %v1798_v18 }
 0x7d2   :  { %4070 = vpow2.f32 %v3298_v20 }
 0x7d9   :  { %v4065_v47 = vpop.eup %4064 }
 0x7da   :  { %v1808_v61 = vadd.f32 1.0, %v4065_v47  ;;  %v4067_v43 = vpop.eup %4066 }
 0x7db   :  { %v1809_v45 = vadd.f32 1.0, %v4067_v43  ;;  %v4069_v23 = vpop.eup %4068 }
 0x7dc   :  { %4072 = vrcp.f32 %v1808_v61  ;;  %v4071_v36 = vpop.eup %4070 }
 0x7dd   :  { %4074 = vrcp.f32 %v1809_v45  ;;  %v1810_v49 = vadd.f32 1.0, %v4071_v36 }
 0x7df   :  { %4076 = vrcp.f32 %v1810_v49 }
 0x7e6   :  { %v4073_v42 = vpop.eup %4072 }
 0x7e7   :  { %v1822_v48 = vmul.f32 %v4073_v42, %v4069_v23  ;;  %v4075_v40 = vpop.eup %4074 }
 0x7e8   :  { %v1821_v50 = vmul.f32 %v4075_v40, %v1819_v44 }
 0x7e9   :  { %v4077_v58 = vpop.eup %4076 }
 0x7ea   :  { %v5018_v59 = vadd.f32 %v1822_v48, %v1821_v50 }
 0x7ec   :  { %4078 = vtanh.f32 %v5018_v59  ;;  %v2010_v48 = vrot.slane %v5018_v59, 6 }
 0x7f6   :  { %v4079_v21 = vpop.eup %4078 }
 0x7f7   :  { %v1825_v35 = vmul.f32 %v4079_v21, %v4077_v58 }
 0x7f9   :  { %1826 = vst.msk [vmem:[#allocation3 + $0x8] sm:$0xc] %vm1069_vm2, %v1825_v35  ;;  %v1829_v62 = vrot.slane %v1825_v35, 2 }
 0x7fa   :  { %1827 = vst.msk [vmem:[#allocation3 + $0xa] sm:$0xc] %vm1071_vm3, %v1825_v35 }
 0x7fb   :  { %3299 = vmatmul.mubr.msk.f32.vlgmr.msra.gmra.mrb[24].mxu1 %vm703_vm14, %v1829_v62  ;;  %3300 = vmatmul.mubr.msk.f32.vlgmr.msra.gmra.mrb[30].mxu0 %vm703_vm14, %v1829_v62 }
 0x7fc   :  { %3739 = vmatpush1.bf16.msra.mxu1 %v4722_v29  ;;  %3759 = vmatpush1.bf16.msra.mxu0 %v4533_v8 }
 0x7fd   :  { %3741 = vmatprep.subr.bf16.mxu1 %v4724_v30  ;;  %3761 = vmatprep.subr.bf16.mxu0 %v4540_v12 }
 0x7fe   :  { %2087 = vmatprep.mubr.f32.mxu1 %v4235_v6  ;;  %2158 = vmatprep.mubr.f32.mxu0 %v4235_v6 }
 0x800   :  { %3743 = vmatpush1.bf16.msra.mxu1 %v4741_v38  ;;  %3763 = vmatpush1.bf16.msra.mxu0 %v4564_v28 }
 0x801   :  { %3745 = vmatprep.subr.bf16.mxu1 %v4744_v41  ;;  %3765 = vmatprep.subr.bf16.mxu0 %v4575_v34 }
 0x804   :  { %3747 = vmatpush1.bf16.msra.mxu1 %v4761_v15  ;;  %3767 = vmatpush1.bf16.msra.mxu0 %v4588_v39 }
 0x805   :  { %3749 = vmatprep.subr.bf16.mxu1 %v4764_v51  ;;  %3769 = vmatprep.subr.bf16.mxu0 %v4600_v46 }
 0x808   :  { %3751 = vmatpush1.bf16.msra.mxu1 %v4780_v60  ;;  %3771 = vmatpush1.bf16.msra.mxu0 %v4614_v32 }
 0x809   :  { %3753 = vmatprep.subr.bf16.mxu1 %v4784_v24  ;;  %3773 = vmatprep.subr.bf16.mxu0 %v4620_v54 }
 0x80c   :  { %3755 = vmatpush1.bf16.msra.mxu1 %v4793_v26  ;;  %3775 = vmatpush1.bf16.msra.mxu0 %v4631_v57 }
 0x80d   :  { %3777 = vmatprep.subr.bf16.mxu1 %v4703_v19  ;;  %3797 = vmatprep.subr.bf16.mxu0 %v4525_v2 }
 0x8ce   :  { %v1898_v56 = vpop.f32.mrb[24].mxu1  ;;  %v1969_v27 = vpop.f32.mrb[30].mxu0 }
 0x8cf   :  { %v1978_v63 = vrot.slane %v1898_v56, 4  ;;  %v1900_v55 = vpop.f32.mrb[25].mxu1  ;;  %v1971_v1 = vpop.f32.mrb[31].mxu0  ;;  %v1980_v14 = vrot.slane %v1969_v27, 4 }
 0x8d0   :  { %v1979_v33 = vrot.slane %v1900_v55, 4  ;;  %v1981_v17 = vrot.slane %v1971_v1, 4 }
 0x8d1   :  { %v1986_v4 = vadd.f32 %v1978_v63, %v4817_v5  ;;  %v1988_v18 = vadd.f32 %v1980_v14, %v4828_v22 }
 0x8d2   :  { %v1987_v11 = vadd.f32 %v1979_v33, %v4819_v9  ;;  %v1989_v20 = vadd.f32 %v1981_v17, %v4830_v25 }
 0x8d3   :  { %v3301_v7 = vmul.f32 -1.442695, %v1986_v4  ;;  %v3303_v47 = vmul.f32 -1.442695, %v1988_v18 }
 0x8d4   :  { %v3302_v10 = vmul.f32 -1.442695, %v1987_v11 }
 0x8d5   :  { %4080 = vpow2.f32 %v3301_v7 }
 0x8d6   :  { %4082 = vpow2.f32 %v3302_v10 }
 0x8d7   :  { %4084 = vtanh.f32 %v1989_v20 }
 0x8d8   :  { %4086 = vpow2.f32 %v3303_v47 }
 0x8df   :  { %v4081_v61 = vpop.eup %4080 }
 0x8e0   :  { %v1999_v43 = vadd.f32 1.0, %v4081_v61  ;;  %v4083_v45 = vpop.eup %4082 }
 0x8e1   :  { %v2000_v23 = vadd.f32 1.0, %v4083_v45  ;;  %v4085_v36 = vpop.eup %4084 }
 0x8e2   :  { %4088 = vrcp.f32 %v1999_v43  ;;  %v4087_v42 = vpop.eup %4086 }
 0x8e3   :  { %4090 = vrcp.f32 %v2000_v23  ;;  %v2001_v50 = vadd.f32 1.0, %v4087_v42 }
 0x8e5   :  { %4092 = vrcp.f32 %v2001_v50 }
 0x8ec   :  { %v4089_v44 = vpop.eup %4088 }
 0x8ed   :  { %v2013_v40 = vmul.f32 %v4089_v44, %v4085_v36  ;;  %v4091_v49 = vpop.eup %4090 }
 0x8ee   :  { %v2012_v58 = vmul.f32 %v4091_v49, %v2010_v48 }
 0x8ef   :  { %v4093_v35 = vpop.eup %4092 }
 0x8f0   :  { %v5052_v21 = vadd.f32 %v2013_v40, %v2012_v58 }
 0x8f2   :  { %4094 = vtanh.f32 %v5052_v21  ;;  %v2201_v44 = vrot.slane %v5052_v21, 6 }
 0x8fc   :  { %v4095_v62 = vpop.eup %4094 }
 0x8fd   :  { %v2016_v56 = vmul.f32 %v4095_v62, %v4093_v35 }
 0x8ff   :  { %2017 = vst.msk [vmem:[#allocation3 + $0x8] sm:$0x30] %vm1262_vm4, %v2016_v56  ;;  %v2020_v27 = vrot.slane %v2016_v56, 4 }
 0x900   :  { %2018 = vst.msk [vmem:[#allocation3 + $0x6] sm:$0x30] %vm1264_vm5, %v2016_v56 }
 0x901   :  { %3304 = vmatmul.mubr.msk.f32.vlgmr.msra.gmra.mrb[26].mxu1 %vm703_vm14, %v2020_v27  ;;  %3305 = vmatmul.mubr.msk.f32.vlgmr.msra.gmra.mrb[32].mxu0 %vm703_vm14, %v2020_v27 }
 0x902   :  { %3779 = vmatpush1.bf16.msra.mxu1 %v4722_v29  ;;  %3799 = vmatpush1.bf16.msra.mxu0 %v4533_v8 }
 0x903   :  { %3781 = vmatprep.subr.bf16.mxu1 %v4724_v30  ;;  %3801 = vmatprep.subr.bf16.mxu0 %v4540_v12 }
 0x904   :  { %2278 = vmatprep.mubr.f32.mxu1 %v4235_v6  ;;  %2349 = vmatprep.mubr.f32.mxu0 %v4235_v6 }
 0x906   :  { %3783 = vmatpush1.bf16.msra.mxu1 %v4741_v38  ;;  %3803 = vmatpush1.bf16.msra.mxu0 %v4564_v28 }
 0x907   :  { %3785 = vmatprep.subr.bf16.mxu1 %v4744_v41  ;;  %3805 = vmatprep.subr.bf16.mxu0 %v4575_v34 }
 0x90a   :  { %3787 = vmatpush1.bf16.msra.mxu1 %v4761_v15  ;;  %3807 = vmatpush1.bf16.msra.mxu0 %v4588_v39 }
 0x90b   :  { %3789 = vmatprep.subr.bf16.mxu1 %v4764_v51  ;;  %3809 = vmatprep.subr.bf16.mxu0 %v4600_v46 }
 0x90e   :  { %3791 = vmatpush1.bf16.msra.mxu1 %v4780_v60  ;;  %3811 = vmatpush1.bf16.msra.mxu0 %v4614_v32 }
 0x90f   :  { %3793 = vmatprep.subr.bf16.mxu1 %v4784_v24  ;;  %3813 = vmatprep.subr.bf16.mxu0 %v4620_v54 }
 0x912   :  { %3795 = vmatpush1.bf16.msra.mxu1 %v4793_v26  ;;  %3815 = vmatpush1.bf16.msra.mxu0 %v4631_v57 }
 0x913   :  { %3817 = vmatprep.subr.bf16.mxu1 %v4703_v19  ;;  %3837 = vmatprep.subr.bf16.mxu0 %v4525_v2 }
 0x9d4   :  { %v2089_v59 = vpop.f32.mrb[26].mxu1  ;;  %v2160_v63 = vpop.f32.mrb[32].mxu0 }
 0x9d5   :  { %v2169_v55 = vrot.slane %v2089_v59, 2  ;;  %v2091_v1 = vpop.f32.mrb[27].mxu1  ;;  %v2162_v33 = vpop.f32.mrb[33].mxu0  ;;  %v2171_v17 = vrot.slane %v2160_v63, 2 }
 0x9d6   :  { %v2170_v4 = vrot.slane %v2091_v1, 2  ;;  %v2172_v18 = vrot.slane %v2162_v33, 2 }
 0x9d7   :  { %v2177_v11 = vadd.f32 %v2169_v55, %v4817_v5  ;;  %v2179_v20 = vadd.f32 %v2171_v17, %v4828_v22 }
 0x9d8   :  { %v2178_v7 = vadd.f32 %v2170_v4, %v4819_v9  ;;  %v2180_v47 = vadd.f32 %v2172_v18, %v4830_v25 }
 0x9d9   :  { %v3306_v10 = vmul.f32 -1.442695, %v2177_v11  ;;  %v3308_v61 = vmul.f32 -1.442695, %v2179_v20 }
 0x9da   :  { %v3307_v14 = vmul.f32 -1.442695, %v2178_v7 }
 0x9db   :  { %4096 = vpow2.f32 %v3306_v10 }
 0x9dc   :  { %4098 = vpow2.f32 %v3307_v14 }
 0x9dd   :  { %4100 = vtanh.f32 %v2180_v47 }
 0x9de   :  { %4102 = vpow2.f32 %v3308_v61 }
 0x9e5   :  { %v4097_v43 = vpop.eup %4096 }
 0x9e6   :  { %v2190_v45 = vadd.f32 1.0, %v4097_v43  ;;  %v4099_v23 = vpop.eup %4098 }
 0x9e7   :  { %v2191_v5 = vadd.f32 1.0, %v4099_v23  ;;  %v4101_v9 = vpop.eup %4100 }
 0x9e8   :  { %4104 = vrcp.f32 %v2190_v45  ;;  %v4103_v36 = vpop.eup %4102 }
 0x9e9   :  { %4106 = vrcp.f32 %v2191_v5  ;;  %v2192_v49 = vadd.f32 1.0, %v4103_v36 }
 0x9eb   :  { %4108 = vrcp.f32 %v2192_v49 }
 0x9f2   :  { %v4105_v42 = vpop.eup %4104 }
 0x9f3   :  { %v2204_v48 = vmul.f32 %v4105_v42, %v4101_v9  ;;  %v4107_v40 = vpop.eup %4106 }
 0x9f4   :  { %v2203_v22 = vmul.f32 %v4107_v40, %v2201_v44 }
 0x9f5   :  { %v4109_v25 = vpop.eup %4108 }
 0x9f6   :  { %v2205_v50 = vadd.f32 %v2204_v48, %v2203_v22 }
 0x9f8   :  { %4110 = vtanh.f32 %v2205_v50  ;;  %v2380_v43 = vrot.slane %v2205_v50, 6 }
 0xa02   :  { %v4111_v58 = vpop.eup %4110 }
 0xa03   :  { %v2207_v35 = vmul.f32 %v4111_v58, %v4109_v25 }
 0xa05   :  { %2208 = vst.msk [vmem:[#allocation3 + $0x8] sm:$0xc0] %vm1455_vm6, %v2207_v35  ;;  %v2211_v62 = vrot.slane %v2207_v35, 6 }
 0xa06   :  { %2209 = vst.msk [vmem:[#allocation3 + $0x2] sm:$0xc0] %vm1457_vm7, %v2207_v35 }
 0xa07   :  { %3309 = vmatmul.mubr.msk.f32.vlgmr.msra.gmra.mrb[28].mxu1 %vm703_vm14, %v2211_v62  ;;  %3310 = vmatmul.mubr.msk.f32.vlgmr.msra.gmra.mrb[34].mxu0 %vm703_vm14, %v2211_v62 }
 0xa08   :  { %3819 = vmatpush1.bf16.msra.mxu1 %v4722_v29  ;;  %3839 = vmatpush1.bf16.msra.mxu0 %v4533_v8 }
 0xa09   :  { %3821 = vmatprep.subr.bf16.mxu1 %v4724_v30  ;;  %3841 = vmatprep.subr.bf16.mxu0 %v4540_v12 }
 0xa0a   :  { %2456 = vmatprep.mubr.f32.mxu1 %v4235_v6  ;;  %2527 = vmatprep.mubr.f32.mxu0 %v4235_v6 }
 0xa0c   :  { %3823 = vmatpush1.bf16.msra.mxu1 %v4741_v38  ;;  %3843 = vmatpush1.bf16.msra.mxu0 %v4564_v28 }
 0xa0d   :  { %3825 = vmatprep.subr.bf16.mxu1 %v4744_v41  ;;  %3845 = vmatprep.subr.bf16.mxu0 %v4575_v34 }
 0xa10   :  { %3827 = vmatpush1.bf16.msra.mxu1 %v4761_v15  ;;  %3847 = vmatpush1.bf16.msra.mxu0 %v4588_v39 }
 0xa11   :  { %3829 = vmatprep.subr.bf16.mxu1 %v4764_v51  ;;  %3849 = vmatprep.subr.bf16.mxu0 %v4600_v46 }
 0xa14   :  { %3831 = vmatpush1.bf16.msra.mxu1 %v4780_v60  ;;  %3851 = vmatpush1.bf16.msra.mxu0 %v4614_v32 }
 0xa15   :  { %3833 = vmatprep.subr.bf16.mxu1 %v4784_v24  ;;  %3853 = vmatprep.subr.bf16.mxu0 %v4620_v54 }
 0xa18   :  { %3835 = vmatpush1.bf16.msra.mxu1 %v4793_v26  ;;  %3855 = vmatpush1.bf16.msra.mxu0 %v4631_v57 }
 0xa19   :  { %3857 = vmatprep.subr.bf16.mxu1 %v4703_v19  ;;  %3877 = vmatprep.subr.bf16.mxu0 %v4525_v2 }
 0xada   :  { %v2280_v21 = vpop.f32.mrb[28].mxu1  ;;  %v2351_v56 = vpop.f32.mrb[34].mxu0 }
 0xadb   :  { %v2356_v27 = vadd.f32 %v2280_v21, %v4821_v13  ;;  %v2282_v59 = vpop.f32.mrb[29].mxu1  ;;  %v2353_v63 = vpop.f32.mrb[35].mxu0  ;;  %v2358_v4 = vadd.f32 %v2351_v56, %v4832_v31 }
 0xadc   :  { %v2357_v55 = vadd.f32 %v2282_v59, %v4823_v16  ;;  %v2359_v11 = vadd.f32 %v2353_v63, %v4834_v37 }
 0xadd   :  { %v3311_v1 = vmul.f32 -1.442695, %v2356_v27  ;;  %v3313_v7 = vmul.f32 -1.442695, %v2358_v4 }
 0xade   :  { %v3312_v33 = vmul.f32 -1.442695, %v2357_v55 }
 0xadf   :  { %4112 = vpow2.f32 %v3311_v1 }
 0xae0   :  { %4114 = vpow2.f32 %v3312_v33 }
 0xae1   :  { %4116 = vtanh.f32 %v2359_v11 }
 0xae2   :  { %4118 = vpow2.f32 %v3313_v7 }
 0xae9   :  { %v4113_v10 = vpop.eup %4112 }
 0xaea   :  { %v2369_v14 = vadd.f32 1.0, %v4113_v10  ;;  %v4115_v17 = vpop.eup %4114 }
 0xaeb   :  { %v2370_v18 = vadd.f32 1.0, %v4115_v17  ;;  %v4117_v20 = vpop.eup %4116 }
 0xaec   :  { %4120 = vrcp.f32 %v2369_v14  ;;  %v4119_v47 = vpop.eup %4118 }
 0xaed   :  { %4122 = vrcp.f32 %v2370_v18  ;;  %v2371_v5 = vadd.f32 1.0, %v4119_v47 }
 0xaef   :  { %4124 = vrcp.f32 %v2371_v5 }
 0xaf6   :  { %v4121_v61 = vpop.eup %4120 }
 0xaf7   :  { %v2383_v45 = vmul.f32 %v4121_v61, %v4117_v20  ;;  %v4123_v23 = vpop.eup %4122 }
 0xaf8   :  { %v2382_v9 = vmul.f32 %v4123_v23, %v2380_v43 }
 0xaf9   :  { %v4125_v42 = vpop.eup %4124 }
 0xafa   :  { %v5116_v36 = vadd.f32 %v2383_v45, %v2382_v9 }
 0xafc   :  { %4126 = vtanh.f32 %v5116_v36  ;;  %v2570_v14 = vrot.slane %v5116_v36, 6 }
 0xb06   :  { %v4127_v44 = vpop.eup %4126 }
 0xb07   :  { %v2386_v48 = vmul.f32 %v4127_v44, %v4125_v42 }
 0xb09   :  { %2387 = vst.msk [vmem:[#allocation3 + $0x10] sm:$0x3] %vm877_vm15, %v2386_v48  ;;  %3314 = vmatmul.mubr.msk.f32.vlgmr.msra.gmra.mrb[30].mxu1 %vm703_vm14, %v2386_v48  ;;  %3315 = vmatmul.mubr.msk.f32.vlgmr.msra.gmra.mrb[36].mxu0 %vm703_vm14, %v2386_v48  ;;  %vm3112_vm15 = vcmask 64512  }
 0xb0a   :  { %2388 = vst.msk [vmem:[#allocation3 + $0x6] sm:$0x3] %vm879_vm1, %v2386_v48  ;;  %3859 = vmatpush1.bf16.msra.mxu1 %v4722_v29  ;;  %3879 = vmatpush1.bf16.msra.mxu0 %v4533_v8  ;;  %vm3114_vm1 = vcmask 72704  }
 0xb0b   :  { %3861 = vmatprep.subr.bf16.mxu1 %v4724_v30  ;;  %3881 = vmatprep.subr.bf16.mxu0 %v4540_v12 }
 0xb0c   :  { %2647 = vmatprep.mubr.f32.mxu1 %v4235_v6  ;;  %2718 = vmatprep.mubr.f32.mxu0 %v4235_v6 }
 0xb0e   :  { %3863 = vmatpush1.bf16.msra.mxu1 %v4741_v38  ;;  %3883 = vmatpush1.bf16.msra.mxu0 %v4564_v28 }
 0xb0f   :  { %3865 = vmatprep.subr.bf16.mxu1 %v4744_v41  ;;  %3885 = vmatprep.subr.bf16.mxu0 %v4575_v34 }
 0xb12   :  { %3867 = vmatpush1.bf16.msra.mxu1 %v4761_v15  ;;  %3887 = vmatpush1.bf16.msra.mxu0 %v4588_v39 }
 0xb13   :  { %3869 = vmatprep.subr.bf16.mxu1 %v4764_v51  ;;  %3889 = vmatprep.subr.bf16.mxu0 %v4600_v46 }
 0xb16   :  { %3871 = vmatpush1.bf16.msra.mxu1 %v4780_v60  ;;  %3891 = vmatpush1.bf16.msra.mxu0 %v4614_v32 }
 0xb17   :  { %3873 = vmatprep.subr.bf16.mxu1 %v4784_v24  ;;  %3893 = vmatprep.subr.bf16.mxu0 %v4620_v54 }
 0xb1a   :  { %3875 = vmatpush1.bf16.msra.mxu1 %v4793_v26  ;;  %3895 = vmatpush1.bf16.msra.mxu0 %v4631_v57 }
 0xb1b   :  { %3897 = vmatprep.subr.bf16.mxu1 %v4703_v19  ;;  %3917 = vmatprep.subr.bf16.mxu0 %v4525_v2 }
 0xbdc   :  { %v2458_v40 = vpop.f32.mrb[30].mxu1  ;;  %v2529_v49 = vpop.f32.mrb[36].mxu0 }
 0xbdd   :  { %v2538_v22 = vrot.slane %v2458_v40, 6  ;;  %v2460_v50 = vpop.f32.mrb[31].mxu1  ;;  %v2531_v25 = vpop.f32.mrb[37].mxu0  ;;  %v2540_v27 = vrot.slane %v2529_v49, 6 }
 0xbde   :  { %v2539_v58 = vrot.slane %v2460_v50, 6  ;;  %v2541_v59 = vrot.slane %v2531_v25, 6 }
 0xbdf   :  { %v2546_v35 = vadd.f32 %v2538_v22, %v4821_v13  ;;  %v2548_v19 = vadd.f32 %v2540_v27, %v4832_v31  ;;  %v29_v27 = vld [vmem:[%s5313_s3 + $0x8] sm:$0xff] }
 0xbe0   :  { %v2547_v62 = vadd.f32 %v2539_v58, %v4823_v16  ;;  %v2549_v2 = vadd.f32 %v2541_v59, %v4834_v37 }
 0xbe1   :  { %v3316_v21 = vmul.f32 -1.442695, %v2546_v35  ;;  %v3318_v63 = vmul.f32 -1.442695, %v2548_v19  ;;  %v30_v19 = vld [vmem:[%s5313_s3 + $0x10] sm:$0xff] }
 0xbe2   :  { %v3317_v56 = vmul.f32 -1.442695, %v2547_v62 }
 0xbe3   :  { %4128 = vpow2.f32 %v3316_v21 }
 0xbe4   :  { %4130 = vpow2.f32 %v3317_v56  ;;  %v28_v56 = vld [vmem:[%s5313_s3] sm:$0xff] }
 0xbe5   :  { %4132 = vtanh.f32 %v2549_v2  ;;  %v3937_v59 = vpack.c.bf16 %v29_v27, %v28_v56  ;;  %v31_v2 = vld [vmem:[%s5313_s3 + $0x18] sm:$0xff] }
 0xbe6   :  { %4134 = vpow2.f32 %v3318_v63  ;;  %v3940_v63 = vpack.c.bf16 %v31_v2, %v30_v19 }
 0xbed   :  { %v4129_v55 = vpop.eup %4128 }
 0xbee   :  { %v2559_v1 = vadd.f32 1.0, %v4129_v55  ;;  %v4131_v33 = vpop.eup %4130  ;;  %v32_v55 = vld [vmem:[%s5313_s3 + $0x20] sm:$0xff] }
 0xbef   :  { %v2560_v4 = vadd.f32 1.0, %v4131_v33  ;;  %v4133_v11 = vpop.eup %4132 }
 0xbf0   :  { %4136 = vrcp.f32 %v2559_v1  ;;  %v4135_v7 = vpop.eup %4134  ;;  %v33_v1 = vld [vmem:[%s5313_s3 + $0x28] sm:$0xff] }
 0xbf1   :  { %4138 = vrcp.f32 %v2560_v4  ;;  %v2561_v20 = vadd.f32 1.0, %v4135_v7  ;;  %v3943_v33 = vpack.c.bf16 %v33_v1, %v32_v55  ;;  %v34_v4 = vld [vmem:[%s5313_s3 + $0x30] sm:$0xff] }
 0xbf3   :  { %4140 = vrcp.f32 %v2561_v20 }
 0xbfa   :  { %v4137_v10 = vpop.eup %4136 }
 0xbfb   :  { %v2573_v17 = vmul.f32 %v4137_v10, %v4133_v11  ;;  %v4139_v18 = vpop.eup %4138  ;;  %v35_v11 = vld [vmem:[%s5313_s3 + $0x38] sm:$0xff]  ;;  %v36_v10 = vld [vmem:[%s5313_s3 + $0x40] sm:$0xff] }
 0xbfc   :  { %v2572_v47 = vmul.f32 %v4139_v18, %v2570_v14  ;;  %v3946_v7 = vpack.c.bf16 %v35_v11, %v34_v4  ;;  %v37_v14 = vld [vmem:[%s5313_s3 + $0x48] sm:$0xff] }
 0xbfd   :  { %v4141_v43 = vpop.eup %4140 }
 0xbfe   :  { %v5150_v61 = vadd.f32 %v2573_v17, %v2572_v47  ;;  %v3949_v17 = vpack.c.bf16 %v37_v14, %v36_v10 }
 0xc00   :  { %4142 = vtanh.f32 %v5150_v61  ;;  %v2761_v48 = vrot.slane %v5150_v61, 6 }
 0xc0a   :  { %v4143_v45 = vpop.eup %4142 }
 0xc0b   :  { %v2576_v23 = vmul.f32 %v4143_v45, %v4141_v43 }
 0xc0d   :  { %2577 = vst.msk [vmem:[#allocation3 + $0x10] sm:$0xc] %vm1069_vm2, %v2576_v23  ;;  %v2580_v5 = vrot.slane %v2576_v23, 2  ;;  %vm3116_vm2 = vcmask 80896  }
 0xc0e   :  { %2578 = vst.msk [vmem:[#allocation3 + $0x2] sm:$0xc] %vm1071_vm3, %v2576_v23  ;;  %vm3118_vm3 = vcmask 89088  }
 0xc0f   :  { %3319 = vmatmul.mubr.msk.f32.vlgmr.msra.gmra.mrb[32].mxu1 %vm703_vm14, %v2580_v5  ;;  %3320 = vmatmul.mubr.msk.f32.vlgmr.msra.gmra.mrb[38].mxu0 %vm703_vm14, %v2580_v5 }
 0xc10   :  { %3899 = vmatpush1.bf16.msra.mxu1 %v4722_v29  ;;  %3919 = vmatpush1.bf16.msra.mxu0 %v4533_v8 }
 0xc11   :  { %3901 = vmatprep.subr.bf16.mxu1 %v4724_v30  ;;  %3921 = vmatprep.subr.bf16.mxu0 %v4540_v12 }
 0xc12   :  { %2838 = vmatprep.mubr.f32.mxu1 %v4235_v6  ;;  %2909 = vmatprep.mubr.f32.mxu0 %v4235_v6 }
 0xc14   :  { %3903 = vmatpush1.bf16.msra.mxu1 %v4741_v38  ;;  %3923 = vmatpush1.bf16.msra.mxu0 %v4564_v28 }
 0xc15   :  { %3905 = vmatprep.subr.bf16.mxu1 %v4744_v41  ;;  %3925 = vmatprep.subr.bf16.mxu0 %v4575_v34 }
 0xc18   :  { %3907 = vmatpush1.bf16.msra.mxu1 %v4761_v15  ;;  %3927 = vmatpush1.bf16.msra.mxu0 %v4588_v39 }
 0xc19   :  { %3909 = vmatprep.subr.bf16.mxu1 %v4764_v51  ;;  %3929 = vmatprep.subr.bf16.mxu0 %v4600_v46 }
 0xc1c   :  { %3911 = vmatpush1.bf16.msra.mxu1 %v4780_v60  ;;  %3931 = vmatpush1.bf16.msra.mxu0 %v4614_v32 }
 0xc1d   :  { %3913 = vmatprep.subr.bf16.mxu1 %v4784_v24  ;;  %3933 = vmatprep.subr.bf16.mxu0 %v4620_v54 }
 0xc20   :  { %3915 = vmatpush1.bf16.msra.mxu1 %v4793_v26  ;;  %3935 = vmatpush1.bf16.msra.mxu0 %v4631_v57 }
 0xc21   :  { %3936 = vmatprep.subr.bf16.mxu1 %v4234_v3 }
 0xce2   :  { %v2649_v8 = vpop.f32.mrb[32].mxu1  ;;  %v2720_v12 = vpop.f32.mrb[38].mxu0 }
 0xce3   :  { %v2729_v28 = vrot.slane %v2649_v8, 4  ;;  %v2651_v34 = vpop.f32.mrb[33].mxu1  ;;  %v2722_v39 = vpop.f32.mrb[39].mxu0  ;;  %v2731_v54 = vrot.slane %v2720_v12, 4 }
 0xce4   :  { %v2730_v46 = vrot.slane %v2651_v34, 4  ;;  %v2732_v41 = vrot.slane %v2722_v39, 4 }
 0xce5   :  { %v2737_v29 = vadd.f32 %v2729_v28, %v4821_v13  ;;  %v2739_v57 = vadd.f32 %v2731_v54, %v4832_v31 }
 0xce6   :  { %v2738_v32 = vadd.f32 %v2730_v46, %v4823_v16  ;;  %v2740_v15 = vadd.f32 %v2732_v41, %v4834_v37 }
 0xce7   :  { %v3321_v30 = vmul.f32 -1.442695, %v2737_v29  ;;  %v3323_v51 = vmul.f32 -1.442695, %v2739_v57 }
 0xce8   :  { %v3322_v38 = vmul.f32 -1.442695, %v2738_v32 }
 0xce9   :  { %4144 = vpow2.f32 %v3321_v30 }
 0xcea   :  { %4146 = vpow2.f32 %v3322_v38 }
 0xceb   :  { %4148 = vtanh.f32 %v2740_v15 }
 0xcec   :  { %4150 = vpow2.f32 %v3323_v51 }
 0xcf3   :  { %v4145_v60 = vpop.eup %4144 }
 0xcf4   :  { %v2750_v24 = vadd.f32 1.0, %v4145_v60  ;;  %v4147_v26 = vpop.eup %4146 }
 0xcf5   :  { %v2751_v9 = vadd.f32 1.0, %v4147_v26  ;;  %v4149_v36 = vpop.eup %4148 }
 0xcf6   :  { %4152 = vrcp.f32 %v2750_v24  ;;  %v4151_v42 = vpop.eup %4150 }
 0xcf7   :  { %4154 = vrcp.f32 %v2751_v9  ;;  %v2752_v22 = vadd.f32 1.0, %v4151_v42 }
 0xcf9   :  { %4156 = vrcp.f32 %v2752_v22 }
 0xd00   :  { %v4153_v44 = vpop.eup %4152 }
 0xd01   :  { %v2764_v40 = vmul.f32 %v4153_v44, %v4149_v36  ;;  %v4155_v49 = vpop.eup %4154  ;;  %v5239_v36 = vld [vmem:[#allocation3 + $0x8] sm:$0xff]  ;;  %v38_v44 = vld [vmem:[%s5313_s3 + $0x50] sm:$0x3]  ;;  %s4250_s3 = smov [#allocation6]  }
 0xd02   :  { %v2763_v50 = vmul.f32 %v4155_v49, %v2761_v48  ;;  %v2967_v48 = vrot.slane %v38_v44, %v509_v0  ;;  %s3242_s9 = sshll.u32 %s4250_s3, 4  ;;  %s3243_s9 = int_to_ptr.vmem [resolvable:$true] %s3242_s9 }
 0xd03   :  { %v4157_v58 = vpop.eup %4156  ;;  %s4186_s1 = scalar_lea.vmem %s3243_s9, 32  ;;  %p4191_p1 = scmp.lt.s32.totalorder %s3243_s9, %s3243_s9 }
 0xd04   :  { %v5183_v25 = vadd.f32 %v2764_v40, %v2763_v50  ;;  %p4187_p0 = scmp.ne.s32.totalorder %s3243_s9, %s4186_s1  ;;  %p4192_p2 = scmp.lt.s32.totalorder %s4186_s1, %s4186_s1 }
 0xd06   :  { %4158 = vtanh.f32 %v5183_v25  ;;  %v2952_v41 = vrot.slane %v5183_v25, 6  ;;  %p4193_p3 = por %p4192_p2, %p4191_p1 }
 0xd08   :  { %p4194_p4 = pnand %p4193_p3, %p4187_p0 }
 0xd10   :  { %v4159_v35 = vpop.eup %4158 }
 0xd11   :  { %v2767_v62 = vmul.f32 %v4159_v35, %v4157_v58 }
 0xd13   :  { %2768 = vst.msk [vmem:[#allocation3 + $0x10] sm:$0x30] %vm1262_vm4, %v2767_v62  ;;  %v2771_v21 = vrot.slane %v2767_v62, 4  ;;  %vm3120_vm4 = vcmask 91136  }
 0xd14   :  { %2769 = vst.msk [vmem:[#allocation3 - $0x2] sm:$0x30] %vm1264_vm5, %v2767_v62  ;;  %vm3224_vm5 = vcmask 648192  }
 0xd15   :  { %3324 = vmatmul.mubr.msk.f32.vlgmr.msra.gmra.mrb[34].mxu1 %vm703_vm14, %v2771_v21  ;;  %3325 = vmatmul.mubr.msk.f32.vlgmr.msra.gmra.mrb[40].mxu0 %vm703_vm14, %v2771_v21  ;;  %v3063_v21 = vrot.slane %v38_v44, %v4434_v53 }
 0xd16   :  { %3422 = vmatprep.mubr.msk.f32.mxu1 %vm4236_vm0, %v4235_v6  ;;  %3938 = vmatpush3.bf16.msra.mxu1 %v3937_v59 }
 0xd17   :  { %3939 = vmatprep.subr.bf16.mxu1 %v4234_v3 }
 0xd1a   :  { %3941 = vmatpush3.bf16.msra.mxu1 %v3940_v63 }
 0xd1b   :  { %3942 = vmatprep.subr.bf16.mxu1 %v4234_v3 }
 0xd1e   :  { %3944 = vmatpush3.bf16.msra.mxu1 %v3943_v33 }
 0xd1f   :  { %3945 = vmatprep.subr.bf16.mxu1 %v4234_v3 }
 0xd22   :  { %3947 = vmatpush3.bf16.msra.mxu1 %v3946_v7 }
 0xd23   :  { %3948 = vmatprep.subr.bf16.mxu1 %v4234_v3 }
 0xd26   :  { %3950 = vmatpush3.bf16.msra.mxu1 %v3949_v17 }
 0xde8   :  { %v2840_v18 = vpop.f32.mrb[34].mxu1  ;;  %v2911_v20 = vpop.f32.mrb[40].mxu0 }
 0xde9   :  { %v2920_v47 = vrot.slane %v2840_v18, 2  ;;  %v2842_v61 = vpop.f32.mrb[35].mxu1  ;;  %v2913_v43 = vpop.f32.mrb[41].mxu0  ;;  %v2922_v28 = vrot.slane %v2911_v20, 2 }
 0xdea   :  { %v2921_v45 = vrot.slane %v2842_v61, 2  ;;  %v2923_v34 = vrot.slane %v2913_v43, 2 }
 0xdeb   :  { %v2928_v23 = vadd.f32 %v2920_v47, %v4821_v13  ;;  %v2930_v39 = vadd.f32 %v2922_v28, %v4832_v31 }
 0xdec   :  { %v2929_v5 = vadd.f32 %v2921_v45, %v4823_v16  ;;  %v2931_v3 = vadd.f32 %v2923_v34, %v4834_v37 }
 0xded   :  { %v3326_v8 = vmul.f32 -1.442695, %v2928_v23  ;;  %v3328_v46 = vmul.f32 -1.442695, %v2930_v39 }
 0xdee   :  { %v3327_v12 = vmul.f32 -1.442695, %v2929_v5 }
 0xdef   :  { %4160 = vpow2.f32 %v3326_v8 }
 0xdf0   :  { %4162 = vpow2.f32 %v3327_v12 }
 0xdf1   :  { %4164 = vtanh.f32 %v2931_v3 }
 0xdf2   :  { %4166 = vpow2.f32 %v3328_v46 }
 0xdf9   :  { %v4161_v29 = vpop.eup %4160 }
 0xdfa   :  { %v2941_v32 = vadd.f32 1.0, %v4161_v29  ;;  %v4163_v30 = vpop.eup %4162  ;;  %v4238_v29 = vmov 1  }
 0xdfb   :  { %v2942_v13 = vadd.f32 1.0, %v4163_v30  ;;  %v4165_v16 = vpop.eup %4164  ;;  %3970 = vset.pattern.permute.xlu1 %v4238_v29 }
 0xdfc   :  { %4168 = vrcp.f32 %v2941_v32  ;;  %v4167_v38 = vpop.eup %4166  ;;  %v4239_v32 = vmov 0  }
 0xdfd   :  { %4170 = vrcp.f32 %v2942_v13  ;;  %v2943_v51 = vadd.f32 1.0, %v4167_v38  ;;  %3969 = vset.pattern.permute.xlu0 %v4239_v32 }
 0xdff   :  { %4172 = vrcp.f32 %v2943_v51  ;;  %v4244_v51 = vmov 4  }
 0xe06   :  { %v4169_v54 = vpop.eup %4168 }
 0xe07   :  { %v2955_v57 = vmul.f32 %v4169_v54, %v4165_v16  ;;  %v4171_v15 = vpop.eup %4170  ;;  %v4240_v54 = vmov 2  }
 0xe08   :  { %v2954_v31 = vmul.f32 %v4171_v15, %v2952_v41  ;;  %v4241_v41 = vmov 9   ;;  %v4243_v15 = vmov 11  }
 0xe09   :  { %v4173_v37 = vpop.eup %4172 }
 0xe0a   :  { %v2956_v60 = vadd.f32 %v2955_v57, %v2954_v31  ;;  %v4242_v57 = vmov 3   ;;  %v4245_v31 = vmov 5  }
 0xe0c   :  { %4174 = vtanh.f32 %v2956_v60  ;;  %v4246_v60 = vmov 6  }
 0xe16   :  { %v4175_v24 = vpop.eup %4174 }
 0xe17   :  { %v2958_v26 = vmul.f32 %v4175_v24, %v4173_v37  ;;  %v4247_v37 = vmov 7   ;;  %v4248_v24 = vmov 8  }
 0xe19   :  { %2959 = vst.msk [vmem:[#allocation3 + $0x10] sm:$0xc0] %vm1455_vm6, %v2958_v26 }
 0xe1a   :  { %2960 = vst.msk [vmem:[#allocation3 - $0x6] sm:$0xc0] %vm1457_vm7, %v2958_v26  ;;  %v4249_v26 = vmov 10  }
 0xe20   :  { %v5245_v42 = vld [vmem:[#allocation3 + $0x10] sm:$0xff] }
 0xe21   :  { %v5233_v9 = vld [vmem:[#allocation3] sm:$0xff] }
 0xe22   :  { %3423 = vmatmul.mubr.msk.f32.vlgmr.msra.gmra.mrb[36].mxu1 %vm703_vm14, %v5233_v9 }
 0xe23   :  { %3425 = vmatprep.mubr.msk.f32.mxu1 %vm4236_vm0, %v4235_v6 }
 0xe26   :  { %3426 = vmatmul.mubr.msk.f32.gmra.mrb[38].mxu1 %vm703_vm14, %v5239_v36 }
 0xe27   :  { %3428 = vmatprep.mubr.msk.f32.mxu1 %vm4236_vm0, %v4235_v6  ;;  %vm3067_vm0 = vcmask 130048  }
 0xe2a   :  { %3429 = vmatmul.mubr.msk.f32.gmra.mrb[40].mxu1 %vm703_vm14, %v5245_v42  ;;  %vm3110_vm14 = vcmask 56320  }
 0xef5   :  { %v3043_v40 = vpop.f32.mrb[36].mxu1 }
 0xef6   :  { %v3044_v49 = vadd.f32 %v3043_v40, %v2967_v48  ;;  %v3424_v22 = vpop.f32.mrb[37].mxu1 }
 0xef8   :  { %4176 = vtanh.f32 %v3044_v49 }
 0xef9   :  { %v3048_v50 = vpop.f32.mrb[38].mxu1 }
 0xefa   :  { %v3049_v25 = vadd.f32 %v3048_v50, %v2967_v48  ;;  %v3427_v58 = vpop.f32.mrb[39].mxu1 }
 0xefc   :  { %4178 = vtanh.f32 %v3049_v25 }
 0xefd   :  { %v3053_v6 = vpop.f32.mrb[40].mxu1 }
 0xefe   :  { %v3054_v35 = vadd.f32 %v3053_v6, %v2967_v48  ;;  %v3430_v62 = vpop.f32.mrb[41].mxu1 }
 0xf00   :  { %4180 = vtanh.f32 %v3054_v35  ;;  %v3183_v35 = vrot.slane %v5239_v36, 6 }
 0xf02   :  { %v4177_v56 = vpop.eup %4176 }
 0xf03   :  { %v3064_v27 = vmul.f32 %v4177_v56, %v3063_v21  ;;  %v3157_v56 = vrot.slane %v5233_v9, 6 }
 0xf05   :  { %v3068_v59 = vsel %vm3067_vm0, %v3064_v27, 0.0  ;;  %v3169_v27 = vrot.slane %v5239_v36, 2 }
 0xf06   :  { %v4179_v52 = vpop.eup %4178  ;;  %3069 = vadd.xlane.f32.xlu0 %v3068_v59  ;;  %v3176_v59 = vrot.slane %v5239_v36, 4 }
 0xf07   :  { %v3065_v0 = vmul.f32 %v4179_v52, %v3063_v21 }
 0xf09   :  { %v3071_v19 = vsel %vm3067_vm0, %v3065_v0, 0.0  ;;  %v3143_v0 = vrot.slane %v5233_v9, 2 }
 0xf0a   :  { %v4181_v2 = vpop.eup %4180  ;;  %3072 = vadd.xlane.f32.xlu1 %v3071_v19  ;;  %v3150_v19 = vrot.slane %v5233_v9, 4 }
 0xf0b   :  { %v3066_v63 = vmul.f32 %v4181_v2, %v3063_v21 }
 0xf0d   :  { %v3074_v55 = vsel %vm3067_vm0, %v3066_v63, 0.0 }
 0xf0e   :  { %3075 = vadd.xlane.f32.xlu0 %v3074_v55 }
 0xf93   :  { %v3070_v1 = vpop.xlane.xlu0 %3069 }
 0xf94   :  { %v3078_v33 = vrot.slane %v3070_v1, 2  ;;  %v3080_v4 = vrot.slane %v3070_v1, 4  ;;  %v3082_v53 = vrot.slane %v3070_v1, 6 }
 0xf96   :  { %v3099_v11 = vsel %vm3098_vm8, %v3070_v1, %v3078_v33 }
 0xf97   :  { %v3101_v7 = vsel %vm3100_vm9, %v3099_v11, %v3080_v4  ;;  %v3073_v10 = vpop.xlane.xlu1 %3072 }
 0xf98   :  { %v3103_v14 = vsel %vm3102_vm10, %v3101_v7, %v3082_v53  ;;  %v3085_v17 = vrot.slane %v3073_v10, 2  ;;  %v3087_v18 = vrot.slane %v3073_v10, 4  ;;  %v3089_v47 = vrot.slane %v3073_v10, 6 }
 0xf99   :  { %v3105_v20 = vsel %vm3104_vm11, %v3103_v14, %v3073_v10  ;;  %v3195_v10 = vrot.slane %v5245_v42, 2 }
 0xf9a   :  { %v3107_v61 = vsel %vm3106_vm12, %v3105_v20, %v3085_v17  ;;  %v3202_v17 = vrot.slane %v5245_v42, 4 }
 0xf9b   :  { %v3109_v43 = vsel %vm3108_vm13, %v3107_v61, %v3087_v18  ;;  %v3076_v45 = vpop.xlane.xlu0 %3075  ;;  %v3209_v61 = vrot.slane %v5245_v42, 6 }
 0xf9c   :  { %v3111_v23 = vsel %vm3110_vm14, %v3109_v43, %v3089_v47  ;;  %v3092_v5 = vrot.slane %v3076_v45, 2  ;;  %v3094_v8 = vrot.slane %v3076_v45, 4  ;;  %v3096_v28 = vrot.slane %v3076_v45, 6 }
 0xf9d   :  { %v3113_v12 = vsel %vm3112_vm15, %v3111_v23, %v3076_v45 }
 0xf9e   :  { %v3115_v34 = vsel %vm3114_vm1, %v3113_v12, %v3092_v5 }
 0xf9f   :  { %v3117_v39 = vsel %vm3116_vm2, %v3115_v34, %v3094_v8 }
 0xfa0   :  { %v3119_v3 = vsel %vm3118_vm3, %v3117_v39, %v3096_v28 }
 0xfa1   :  { %v3121_v46 = vsel %vm3120_vm4, %v3119_v3, -inf }
 0xfa2   :  { %3122 = vmax.xlane.f32.xlu0 %v3121_v46 }
0x102f   :  { %v3123_v30 = vpop.xlane.xlu0 %3122 }
0x1030   :  { %v3124_v13 = vsub.f32 %v3119_v3, %v3123_v30 }
0x1032   :  { %v3125_v16 = vmul.f32 1.442695, %v3124_v13 }
0x1034   :  { %4182 = vpow2.f32 %v3125_v16 }
0x103e   :  { %v5256_v38 = vpop.eup %4182 }
0x103f   :  { %3140 = vperm.xlu1 %3970, %v5256_v38   ;;  %3135 = vperm.xlu0 %3969, %v5256_v38   ;;  %v3127_v44 = vsel %vm3120_vm4, %v5256_v38, 0.0 }
0x1043   :  { %3971 = vset.pattern.permute.xlu1 %v4240_v54  ;;  %3978 = vset.pattern.permute.xlu0 %v4241_v41 }
0x1044   :  { %3147 = vperm.xlu1 %3971, %v5256_v38   ;;  %3192 = vperm.xlu0 %3978, %v5256_v38  }
0x1048   :  { %3972 = vset.pattern.permute.xlu1 %v4242_v57  ;;  %3981 = vset.pattern.permute.xlu0 %v4243_v15 }
0x1049   :  { %3154 = vperm.xlu1 %3972, %v5256_v38  }
0x104d   :  { %3973 = vset.pattern.permute.xlu1 %v4244_v51 }
0x104e   :  { %3161 = vperm.xlu1 %3973, %v5256_v38  }
0x1052   :  { %3974 = vset.pattern.permute.xlu1 %v4245_v31 }
0x1053   :  { %3166 = vperm.xlu1 %3974, %v5256_v38  }
0x1057   :  { %3975 = vset.pattern.permute.xlu1 %v4246_v60 }
0x1058   :  { %3173 = vperm.xlu1 %3975, %v5256_v38  }
0x105c   :  { %3976 = vset.pattern.permute.xlu1 %v4247_v37 }
0x105d   :  { %3180 = vperm.xlu1 %3976, %v5256_v38  }
0x1061   :  { %3977 = vset.pattern.permute.xlu1 %v4248_v24 }
0x1062   :  { %3187 = vperm.xlu1 %3977, %v5256_v38  }
0x1066   :  { %3979 = vset.pattern.permute.xlu1 %v4249_v26 }
0x1067   :  { %3199 = vperm.xlu1 %3979, %v5256_v38  }
0x106b   :  { %3980 = vset.pattern.permute.xlu1 %v4243_v15 }
0x108b   :  { %3128 = vadd.xlane.f32.xlu1 %v3127_v44 }
0x109c   :  { %3206 = vperm.xlu1 %3980, %v5256_v38  }
0x10be   :  { %v3141_v48 = vpop.permute.xlu1 %3140  ;;  %v3136_v62 = vpop.permute.xlu0 %3135 }
0x10bf   :  { %v3145_v1 = vmul.f32 %v3143_v0, %v3141_v48  ;;  %v3138_v33 = vmul.f32 %v3136_v62, %v5233_v9 }
0x10c1   :  { %v3212_v43 = vadd.f32 %v3145_v1, %v3138_v33 }
0x10c3   :  { %v3148_v40 = vpop.permute.xlu1 %3147  ;;  %v3193_v14 = vpop.permute.xlu0 %3192 }
0x10c4   :  { %v3152_v53 = vmul.f32 %v3150_v19, %v3148_v40  ;;  %v3197_v9 = vmul.f32 %v3195_v10, %v3193_v14 }
0x10c8   :  { %v3155_v49 = vpop.permute.xlu1 %3154 }
0x10c9   :  { %v3159_v2 = vmul.f32 %v3157_v56, %v3155_v49 }
0x10cb   :  { %v3213_v18 = vadd.f32 %v3159_v2, %v3152_v53 }
0x10cd   :  { %v3162_v22 = vpop.permute.xlu1 %3161 }
0x10ce   :  { %v3164_v11 = vmul.f32 %v3162_v22, %v5239_v36  ;;  %v3218_v36 = vadd.f32 %v3213_v18, %v3212_v43 }
0x10d2   :  { %v3167_v50 = vpop.permute.xlu1 %3166 }
0x10d3   :  { %v3171_v63 = vmul.f32 %v3169_v27, %v3167_v50 }
0x10d5   :  { %v3214_v20 = vadd.f32 %v3171_v63, %v3164_v11 }
0x10d7   :  { %v3174_v25 = vpop.permute.xlu1 %3173 }
0x10d8   :  { %v3178_v55 = vmul.f32 %v3176_v59, %v3174_v25 }
0x10dc   :  { %v3181_v58 = vpop.permute.xlu1 %3180 }
0x10dd   :  { %v3185_v52 = vmul.f32 %v3183_v35, %v3181_v58 }
0x10df   :  { %v3215_v7 = vadd.f32 %v3185_v52, %v3178_v55 }
0x10e1   :  { %v3188_v6 = vpop.permute.xlu1 %3187  ;;  %v3219_v23 = vadd.f32 %v3215_v7, %v3214_v20 }
0x10e2   :  { %v3190_v47 = vmul.f32 %v3188_v6, %v5245_v42 }
0x10e3   :  { %v3221_v39 = vadd.f32 %v3219_v23, %v3218_v36 }
0x10e4   :  { %v3216_v12 = vadd.f32 %v3197_v9, %v3190_v47 }
0x10e6   :  { %v3200_v21 = vpop.permute.xlu1 %3199 }
0x10e7   :  { %v3204_v5 = vmul.f32 %v3202_v17, %v3200_v21 }
0x1118   :  { %v3129_v4 = vpop.xlane.xlu1 %3128 }
0x1119   :  { %4184 = vrcp.f32 %v3129_v4 }
0x111c   :  { %v3207_v45 = vpop.permute.xlu1 %3206 }
0x111d   :  { %v3211_v8 = vmul.f32 %v3209_v61, %v3207_v45 }
0x111f   :  { %v3217_v28 = vadd.f32 %v3211_v8, %v3204_v5 }
0x1121   :  { %v3220_v34 = vadd.f32 %v3217_v28, %v3216_v12 }
0x1123   :  { %v4185_v3 = vpop.eup %4184  ;;  %v3222_v46 = vadd.f32 %v3221_v39, %v3220_v34 }
0x1124   :  { %v3131_v42 = vmul.f32 %v4185_v3, %v5256_v38 }
0x1125   :  { %v3223_v29 = vmul.f32 %v4185_v3, %v3222_v46 }
0x1126   :  { %3132 = vst.msk [vmem:[#allocation6] sm:$0x3] %vm3120_vm4, %v3131_v42 }
0x1127   :  { %3225 = vst.msk [vmem:[#allocation4] sm:$0x3] %vm3224_vm5, %v3223_v29 }
0x1128   :  { %4197 = shalt.err (!%p4194_p4)
}
0x1129   :  { %s4198_s2 = scalar_lea.hbm %s5315_s5, 32 }
0x112a   :  { %p4199_p5 = scmp.ne.s32.totalorder %s5315_s5, %s4198_s2  ;;  %p4202_p6 = scmp.lt.u32.totalorder %s4198_s2, %s5315_s5 }
0x112c   :  { %p4204_p7 = pnand %p4202_p6, %p4199_p5 }
0x112e   :  { %4207 = shalt.err (!%p4204_p7)
}
0x112f   :  { %3245 = dma.vmem_to_hbm [thread:$0]  %s3243_s9, 32, %s5315_s5, [#allocation7]  }
0x1130   :  { %s4208_s19 = scalar_lea.vmem %s3233_s27, 32  ;;  %p4213_p9 = scmp.lt.s32.totalorder %s3233_s27, %s3233_s27 }
0x1131   :  { %p4209_p8 = scmp.ne.s32.totalorder %s3233_s27, %s4208_s19  ;;  %p4214_p10 = scmp.lt.s32.totalorder %s4208_s19, %s4208_s19 }
0x1133   :  { %p4215_p11 = por %p4214_p10, %p4213_p9 }
0x1135   :  { %p4216_p12 = pnand %p4215_p11, %p4209_p8 }
0x1137   :  { %4219 = shalt.err (!%p4216_p12)
}
0x1138   :  { %s4220_s22 = scalar_lea.hbm %s5314_s4, 32 }
0x1139   :  { %p4221_p13 = scmp.ne.s32.totalorder %s5314_s4, %s4220_s22  ;;  %p4224_p0 = scmp.lt.u32.totalorder %s4220_s22, %s5314_s4 }
0x113b   :  { %p4226_p1 = pnand %p4224_p0, %p4221_p13 }
0x113d   :  { %4229 = shalt.err (!%p4226_p1)
}
0x113e   :  { %3235 = dma.vmem_to_hbm [thread:$0]  %s3233_s27, 32, %s5314_s4, [#allocation5]  }
0x113f   :  { %4230 = dma.done.wait [#allocation5], 32  }
0x1140   :  { %4231 = vsyncadd [#allocation5], 4294967264 }
0x1141   :  { %4232 = dma.done.wait [#allocation7], 32  }
0x1142   :  { %4233 = vsyncadd [#allocation7], 4294967264 }
0x1143   :  { %3252 = vsyncpa [#allocation5], 1 }
0x1144   :  { %3253 = vsyncpa [#allocation7], 1 }

</bundles_post_ra>
